<compile_context>
chip_gen: v5e
topology: v5e:2x2
jax: 0.10.0
libtpu: 0.0.40
codegen_flags: <defaults>
</compile_context>

<pallas_src>
import functools

import jax
import jax.numpy as jnp
import numpy as np
from jax.experimental import pallas as pl
from jax.experimental.pallas import tpu as pltpu


def _tcn_block_kernel(x_ref, b1_ref, w1_ref, g1_ref, be1_ref, wd_ref, bd_ref,
                      g2_ref, be2_ref, w2_ref, b2_ref, alpha_ref, o_ref,
                      *, dilations, eps):
    """One batch element of the whole TCNBlock.

    x_ref  : (1, Cin, T)      input features (NCT layout, time on lanes)
    b1_ref : (1, L, H, 1)     per-batch effective bias of conv1 (layer 0 also
                              carries the folded speaker projection)
    w1_ref : (L, H, Cin)      1x1 conv-in weights (x part only for layer 0)
    g1/be1 : (L, H, 1)        gLN #1 gamma / beta
    wd_ref : (L, 3, H, 1)     depthwise conv taps (k, channel)
    bd_ref : (L, H, 1)        depthwise conv bias
    g2/be2 : (L, H, 1)        gLN #2 gamma / beta
    w2_ref : (L, Cin, H)      1x1 conv-out weights
    b2_ref : (L, Cin, 1)      1x1 conv-out bias
    alpha_ref: (L, 2) SMEM    PReLU scalars (alpha1, alpha2) per layer
    o_ref  : (1, Cin, T)      output (NCT)
    """
    x = x_ref[0]                                   # (Cin, T) f32
    T = x.shape[1]
    H = w1_ref.shape[1]
    col = jax.lax.broadcasted_iota(jnp.int32, (H, T), 1)
    inv_n = 1.0 / float(H * T)

    def gln(z, gamma, beta):
        # GlobalChannelLayerNorm: stats over (channels, time) of this sample.
        mu = jnp.sum(z) * inv_n
        zc = z - mu
        var = jnp.sum(zc * zc) * inv_n
        return gamma * zc * jax.lax.rsqrt(var + eps) + beta

    for l, d in enumerate(dilations):
        # --- 1x1 conv in (+ folded speaker bias on layer 0), PReLU, gLN ---
        h = jnp.dot(w1_ref[l], x,
                    preferred_element_type=jnp.float32,
                    precision=jax.lax.Precision.HIGHEST) + b1_ref[0, l]
        h = jnp.where(h >= 0.0, h, alpha_ref[l, 0] * h)
        h = gln(h, g1_ref[l], be1_ref[l])

        # --- depthwise conv, kernel=3, dilation=d, zero "same" padding ------
        # out[c,t] = w0*h[c,t-d] + w1*h[c,t] + w2*h[c,t+d]
        past = jnp.where(col >= d, pltpu.roll(h, d, axis=1), 0.0)
        fut = jnp.where(col < T - d, pltpu.roll(h, T - d, axis=1), 0.0)
        y = (wd_ref[l, 0] * past + wd_ref[l, 1] * h + wd_ref[l, 2] * fut
             + bd_ref[l])
        y = jnp.where(y >= 0.0, y, alpha_ref[l, 1] * y)
        y = gln(y, g2_ref[l], be2_ref[l])

        # --- 1x1 conv out + residual ----------------------------------------
        x = x + jnp.dot(w2_ref[l], y,
                        preferred_element_type=jnp.float32,
                        precision=jax.lax.Precision.HIGHEST) + b2_ref[l]

    o_ref[0] = x


def tcn_block_forward(params, x, v):
    """Mirrors TCNBlock.forward.  x: (B, Cin, T) f32, v: (B, spk) f32 -> (B, Cin, T)."""
    B, Cin, T = x.shape
    layers = params["layers"]
    dilations = tuple(params["dilations"])
    eps = float(params["eps"])
    L = len(layers)
    H = layers[0]["w1"].shape[0]

    # ---- pack per-layer parameters into stacked, kernel-friendly arrays ----
    w1_all = jnp.stack([layers[0]["w1"][:, :Cin]]
                       + [lp["w1"] for lp in layers[1:]])          # (L, H, Cin)
    w1v = layers[0]["w1"][:, Cin:]                                 # (H, spk)
    b1 = jnp.stack([lp["b1"] for lp in layers])                    # (L, H)
    b1_eff = jnp.broadcast_to(b1[None], (B, L, H))
    b1_eff = b1_eff.at[:, 0, :].add(v @ w1v.T)                     # fold speaker proj
    b1_eff = b1_eff[..., None]                                     # (B, L, H, 1)

    def stack_col(name):
        return jnp.stack([lp[name] for lp in layers])[..., None]   # (L, H, 1)

    g1_all, be1_all = stack_col("gamma1"), stack_col("beta1")
    bd_all = stack_col("bd")
    g2_all, be2_all = stack_col("gamma2"), stack_col("beta2")
    wd_all = jnp.stack([jnp.transpose(lp["wd"], (1, 0))
                        for lp in layers])[..., None]              # (L, 3, H, 1)
    w2_all = jnp.stack([lp["w2"] for lp in layers])                # (L, Cin, H)
    b2_all = jnp.stack([lp["b2"] for lp in layers])[..., None]     # (L, Cin, 1)
    alphas = jnp.stack([jnp.stack([lp["alpha1"], lp["alpha2"]])
                        for lp in layers]).astype(jnp.float32)     # (L, 2)

    def full_spec(*shape):
        return pl.BlockSpec(shape, lambda b: (0,) * len(shape))

    kernel = functools.partial(_tcn_block_kernel, dilations=dilations, eps=eps)
    return pl.pallas_call(
        kernel,
        out_shape=jax.ShapeDtypeStruct((B, Cin, T), jnp.float32),
        grid=(B,),
        in_specs=[
            pl.BlockSpec((1, Cin, T), lambda b: (b, 0, 0)),        # x
            pl.BlockSpec((1, L, H, 1), lambda b: (b, 0, 0, 0)),    # b1_eff
            full_spec(L, H, Cin),                                  # w1
            full_spec(L, H, 1),                                    # gamma1
            full_spec(L, H, 1),                                    # beta1
            full_spec(L, 3, H, 1),                                 # depthwise w
            full_spec(L, H, 1),                                    # depthwise b
            full_spec(L, H, 1),                                    # gamma2
            full_spec(L, H, 1),                                    # beta2
            full_spec(L, Cin, H),                                  # w2
            full_spec(L, Cin, 1),                                  # b2
            pl.BlockSpec(memory_space=pltpu.MemorySpace.SMEM),     # PReLU alphas
        ],
        out_specs=pl.BlockSpec((1, Cin, T), lambda b: (b, 0, 0)),
        compiler_params=pltpu.CompilerParams(
            dimension_semantics=("parallel",)),
    )(x, b1_eff, w1_all, g1_all, be1_all, wd_all, bd_all,
      g2_all, be2_all, w2_all, b2_all, alphas)


# --------------------------- pure numpy reference ---------------------------
def _ref_tcn_block(params, x, v, dilations, eps):
    """Mirrors the torch module literally (repeat + concat of v, etc.)."""
    x = np.asarray(x, np.float64)
    v = np.asarray(v, np.float64)
    B, Cin, T = x.shape

    def prelu(z, a):
        return np.where(z >= 0, z, a * z)

    def gln(z, g, b):
        mu = z.mean(axis=(1, 2), keepdims=True)
        var = ((z - mu) ** 2).mean(axis=(1, 2), keepdims=True)
        return g[None, :, None] * (z - mu) / np.sqrt(var + eps) + b[None, :, None]

    out = x
    for l, d in enumerate(dilations):
        lp = {k: np.asarray(val, np.float64) for k, val in params["layers"][l].items()}
        if l == 0:
            vrep = np.repeat(v[:, :, None], T, axis=2)
            inp = np.concatenate([out, vrep], axis=1)      # torch.cat([x, v], 1)
        else:
            inp = out
        h = np.einsum("hc,bct->bht", lp["w1"], inp) + lp["b1"][None, :, None]
        h = prelu(h, lp["alpha1"])
        h = gln(h, lp["gamma1"], lp["beta1"])
        hp = np.pad(h, ((0, 0), (0, 0), (d, d)))
        y = (lp["wd"][None, :, 0, None] * hp[:, :, 0:T]
             + lp["wd"][None, :, 1, None] * hp[:, :, d:d + T]
             + lp["wd"][None, :, 2, None] * hp[:, :, 2 * d:2 * d + T]
             + lp["bd"][None, :, None])
        y = prelu(y, lp["alpha2"])
        y = gln(y, lp["gamma2"], lp["beta2"])
        z = np.einsum("oh,bht->bot", lp["w2"], y) + lp["b2"][None, :, None]
        out = out + z
    return out


if __name__ == "__main__":
    # Small shapes consistent with the module: batch=2, in_channels=16,
    # hidden=32, speaker_dim=8, T=128 (lane-dense), TCNBlock B=3 -> dilations 1,2,4.
    Bb, Cin, H, spk, T = 2, 16, 32, 8, 128
    n_repeats = 3
    dilations = tuple(2 ** i for i in range(n_repeats))
    eps = 1e-7

    key = jax.random.PRNGKey(0)
    keys = jax.random.split(key, n_repeats + 2)

    def xavier(k, shape, fan_in, fan_out):
        bound = float(np.sqrt(6.0 / (fan_in + fan_out)))
        return jax.random.uniform(k, shape, jnp.float32, -bound, bound)

    def make_layer(k, cin_l):
        ks = jax.random.split(k, 12)
        return dict(
            w1=xavier(ks[0], (H, cin_l), cin_l, H),
            b1=0.05 * jax.random.normal(ks[1], (H,), jnp.float32),
            alpha1=0.05 + 0.45 * jax.random.uniform(ks[10], (), jnp.float32),
            gamma1=1.0 + 0.1 * jax.random.normal(ks[2], (H,), jnp.float32),
            beta1=0.1 * jax.random.normal(ks[3], (H,), jnp.float32),
            wd=xavier(ks[4], (H, 3), 3, 3),
            bd=0.05 * jax.random.normal(ks[5], (H,), jnp.float32),
            alpha2=0.05 + 0.45 * jax.random.uniform(ks[11], (), jnp.float32),
            gamma2=1.0 + 0.1 * jax.random.normal(ks[6], (H,), jnp.float32),
            beta2=0.1 * jax.random.normal(ks[7], (H,), jnp.float32),
            w2=xavier(ks[8], (Cin, H), H, Cin),
            b2=0.05 * jax.random.normal(ks[9], (Cin,), jnp.float32),
        )

    layers = [make_layer(keys[0], Cin + spk)] + \
             [make_layer(keys[i], Cin) for i in range(1, n_repeats)]
    params = dict(layers=layers, dilations=dilations, eps=eps)

    x = jax.random.normal(keys[-2], (Bb, Cin, T), jnp.float32)
    v = jax.random.normal(keys[-1], (Bb, spk), jnp.float32)

    out = tcn_block_forward(params, x, v)
    jax.block_until_ready(out)

    ref = _ref_tcn_block(params, np.asarray(x), np.asarray(v), dilations, eps)
    assert out.shape == ref.shape
    # Tolerance allows for MXU f32 multi-pass rounding inside the kernel.
    np.testing.assert_allclose(np.asarray(out), ref, rtol=2e-3, atol=2e-3)

    print("KERNEL_OK")
</pallas_src>

<mosaic_0001>
module attributes {stable_mosaic.version = 11 : i64} {
  func.func @_tcn_block_kernel(%arg0: i32, %arg1: memref<1x16x128xf32, #tpu.memory_space<vmem>>, %arg2: memref<1x3x32x1xf32, #tpu.memory_space<vmem>>, %arg3: memref<3x32x16xf32, #tpu.memory_space<vmem>>, %arg4: memref<3x32x1xf32, #tpu.memory_space<vmem>>, %arg5: memref<3x32x1xf32, #tpu.memory_space<vmem>>, %arg6: memref<3x3x32x1xf32, #tpu.memory_space<vmem>>, %arg7: memref<3x32x1xf32, #tpu.memory_space<vmem>>, %arg8: memref<3x32x1xf32, #tpu.memory_space<vmem>>, %arg9: memref<3x32x1xf32, #tpu.memory_space<vmem>>, %arg10: memref<3x16x32xf32, #tpu.memory_space<vmem>>, %arg11: memref<3x16x1xf32, #tpu.memory_space<vmem>>, %arg12: memref<3x2xf32, #tpu.memory_space<smem>>, %arg13: memref<1x16x128xf32, #tpu.memory_space<vmem>>) attributes {dimension_semantics = [#tpu.dimension_semantics<parallel>], iteration_bounds = array<i64: 2>, scalar_prefetch = 0 : i64, scratch_operands = 0 : i64, tpu.core_type = #tpu.core_type<tc>, window_params = [{transform_indices = @transform_0, window_bounds = array<i64: 1, 16, 128>}, {transform_indices = @transform_1, window_bounds = array<i64: 1, 3, 32, 1>}, {pipeline_mode = #tpu.pipeline_mode<synchronous>, transform_indices = @transform_2, window_bounds = array<i64: 3, 32, 16>}, {pipeline_mode = #tpu.pipeline_mode<synchronous>, transform_indices = @transform_3, window_bounds = array<i64: 3, 32, 1>}, {pipeline_mode = #tpu.pipeline_mode<synchronous>, transform_indices = @transform_4, window_bounds = array<i64: 3, 32, 1>}, {pipeline_mode = #tpu.pipeline_mode<synchronous>, transform_indices = @transform_5, window_bounds = array<i64: 3, 3, 32, 1>}, {pipeline_mode = #tpu.pipeline_mode<synchronous>, transform_indices = @transform_6, window_bounds = array<i64: 3, 32, 1>}, {pipeline_mode = #tpu.pipeline_mode<synchronous>, transform_indices = @transform_7, window_bounds = array<i64: 3, 32, 1>}, {pipeline_mode = #tpu.pipeline_mode<synchronous>, transform_indices = @transform_8, window_bounds = array<i64: 3, 32, 1>}, {pipeline_mode = #tpu.pipeline_mode<synchronous>, transform_indices = @transform_9, window_bounds = array<i64: 3, 16, 32>}, {pipeline_mode = #tpu.pipeline_mode<synchronous>, transform_indices = @transform_10, window_bounds = array<i64: 3, 16, 1>}, {transform_indices = @transform_11, window_bounds = array<i64: 3, 2>}, {transform_indices = @transform_12, window_bounds = array<i64: 1, 16, 128>}]} {
    %c0 = arith.constant 0 : index
    %c0_0 = arith.constant 0 : index
    %c0_1 = arith.constant 0 : index
    %0 = vector.load %arg1[%c0, %c0_0, %c0_1] : memref<1x16x128xf32, #tpu.memory_space<vmem>>, vector<1x16x128xf32>
    %1 = vector.shape_cast %0 : vector<1x16x128xf32> to vector<16x128xf32>
    %2 = tpu.iota {dimensions = array<i32: 1>} : vector<32x128xi32>
    %c0_2 = arith.constant 0 : index
    %c0_3 = arith.constant 0 : index
    %c0_4 = arith.constant 0 : index
    %3 = vector.load %arg3[%c0_2, %c0_3, %c0_4] : memref<3x32x16xf32, #tpu.memory_space<vmem>>, vector<1x32x16xf32>
    %4 = vector.shape_cast %3 : vector<1x32x16xf32> to vector<32x16xf32>
    %cst = arith.constant dense<0.000000e+00> : vector<32x128xf32>
    %5 = tpu.matmul %4, %1, %cst {dimension_numbers = #tpu.dot_dimension_numbers<[1], [0], [0], [1], [0, 0, 1, 1], [], []>, precision = #tpu.contract_precision<fp32>} : vector<32x16xf32>, vector<16x128xf32>, vector<32x128xf32> -> vector<32x128xf32>
    %c0_5 = arith.constant 0 : index
    %c0_6 = arith.constant 0 : index
    %c0_7 = arith.constant 0 : index
    %c0_8 = arith.constant 0 : index
    %6 = vector.load %arg2[%c0_5, %c0_6, %c0_7, %c0_8] : memref<1x3x32x1xf32, #tpu.memory_space<vmem>>, vector<1x1x32x1xf32>
    %7 = vector.shape_cast %6 : vector<1x1x32x1xf32> to vector<32x1xf32>
    %8 = vector.broadcast %7 : vector<32x1xf32> to vector<32x128xf32>
    %9 = arith.addf %5, %8 : vector<32x128xf32>
    %cst_9 = arith.constant 0.000000e+00 : f32
    %10 = vector.broadcast %cst_9 : f32 to vector<32x128xf32>
    %11 = arith.cmpf oge, %9, %10 : vector<32x128xf32>
    %c0_10 = arith.constant 0 : index
    %c0_11 = arith.constant 0 : index
    %12 = memref.load %arg12[%c0_10, %c0_11] : memref<3x2xf32, #tpu.memory_space<smem>>
    %13 = vector.broadcast %12 : f32 to vector<32x128xf32>
    %14 = arith.mulf %13, %9 : vector<32x128xf32>
    %15 = arith.select %11, %9, %14 : vector<32x128xi1>, vector<32x128xf32>
    %c0_12 = arith.constant 0 : index
    %c0_13 = arith.constant 0 : index
    %c0_14 = arith.constant 0 : index
    %16 = vector.load %arg4[%c0_12, %c0_13, %c0_14] : memref<3x32x1xf32, #tpu.memory_space<vmem>>, vector<1x32x1xf32>
    %17 = vector.shape_cast %16 : vector<1x32x1xf32> to vector<32x1xf32>
    %c0_15 = arith.constant 0 : index
    %c0_16 = arith.constant 0 : index
    %c0_17 = arith.constant 0 : index
    %18 = vector.load %arg5[%c0_15, %c0_16, %c0_17] : memref<3x32x1xf32, #tpu.memory_space<vmem>>, vector<1x32x1xf32>
    %19 = vector.shape_cast %18 : vector<1x32x1xf32> to vector<32x1xf32>
    %20 = vector.shape_cast %15 : vector<32x128xf32> to vector<1x32x128xf32>
    %cst_18 = arith.constant dense<0.000000e+00> : vector<1xf32>
    %21 = vector.multi_reduction <add>, %20, %cst_18 [1, 2] : vector<1x32x128xf32> to vector<1xf32>
    %22 = vector.shape_cast %21 : vector<1xf32> to vector<1x1x1xf32>
    %23 = vector.extract %22[0, 0, 0] : f32 from vector<1x1x1xf32>
    %cst_19 = arith.constant 2.44140625E-4 : f32
    %24 = arith.mulf %23, %cst_19 : f32
    %25 = vector.broadcast %24 : f32 to vector<32x128xf32>
    %26 = arith.subf %15, %25 : vector<32x128xf32>
    %27 = arith.mulf %26, %26 : vector<32x128xf32>
    %28 = vector.shape_cast %27 : vector<32x128xf32> to vector<1x32x128xf32>
    %cst_20 = arith.constant dense<0.000000e+00> : vector<1xf32>
    %29 = vector.multi_reduction <add>, %28, %cst_20 [1, 2] : vector<1x32x128xf32> to vector<1xf32>
    %30 = vector.shape_cast %29 : vector<1xf32> to vector<1x1x1xf32>
    %31 = vector.extract %30[0, 0, 0] : f32 from vector<1x1x1xf32>
    %cst_21 = arith.constant 2.44140625E-4 : f32
    %32 = arith.mulf %31, %cst_21 : f32
    %33 = vector.broadcast %17 : vector<32x1xf32> to vector<32x128xf32>
    %34 = arith.mulf %33, %26 : vector<32x128xf32>
    %cst_22 = arith.constant 1.000000e-07 : f32
    %35 = arith.addf %32, %cst_22 : f32
    %36 = math.rsqrt %35 : f32
    %37 = vector.broadcast %36 : f32 to vector<32x128xf32>
    %38 = arith.mulf %34, %37 : vector<32x128xf32>
    %39 = vector.broadcast %19 : vector<32x1xf32> to vector<32x128xf32>
    %40 = arith.addf %38, %39 : vector<32x128xf32>
    %c1_i32 = arith.constant 1 : i32
    %41 = vector.broadcast %c1_i32 : i32 to vector<32x128xi32>
    %42 = arith.cmpi sge, %2, %41 : vector<32x128xi32>
    %c1_i32_23 = arith.constant 1 : i32
    %43 = tpu.dynamic_rotate %40 by %c1_i32_23 dim 1 : vector<32x128xf32>, i32 -> vector<32x128xf32>
    %cst_24 = arith.constant 0.000000e+00 : f32
    %44 = vector.broadcast %cst_24 : f32 to vector<32x128xf32>
    %45 = arith.select %42, %43, %44 : vector<32x128xi1>, vector<32x128xf32>
    %c127_i32 = arith.constant 127 : i32
    %46 = vector.broadcast %c127_i32 : i32 to vector<32x128xi32>
    %47 = arith.cmpi slt, %2, %46 : vector<32x128xi32>
    %c127_i32_25 = arith.constant 127 : i32
    %48 = tpu.dynamic_rotate %40 by %c127_i32_25 dim 1 : vector<32x128xf32>, i32 -> vector<32x128xf32>
    %cst_26 = arith.constant 0.000000e+00 : f32
    %49 = vector.broadcast %cst_26 : f32 to vector<32x128xf32>
    %50 = arith.select %47, %48, %49 : vector<32x128xi1>, vector<32x128xf32>
    %c0_27 = arith.constant 0 : index
    %c0_28 = arith.constant 0 : index
    %c0_29 = arith.constant 0 : index
    %c0_30 = arith.constant 0 : index
    %51 = vector.load %arg6[%c0_27, %c0_28, %c0_29, %c0_30] : memref<3x3x32x1xf32, #tpu.memory_space<vmem>>, vector<1x1x32x1xf32>
    %52 = vector.shape_cast %51 : vector<1x1x32x1xf32> to vector<32x1xf32>
    %53 = vector.broadcast %52 : vector<32x1xf32> to vector<32x128xf32>
    %54 = arith.mulf %53, %45 : vector<32x128xf32>
    %c0_31 = arith.constant 0 : index
    %c1 = arith.constant 1 : index
    %c0_32 = arith.constant 0 : index
    %c0_33 = arith.constant 0 : index
    %55 = vector.load %arg6[%c0_31, %c1, %c0_32, %c0_33] : memref<3x3x32x1xf32, #tpu.memory_space<vmem>>, vector<1x1x32x1xf32>
    %56 = vector.shape_cast %55 : vector<1x1x32x1xf32> to vector<32x1xf32>
    %57 = vector.broadcast %56 : vector<32x1xf32> to vector<32x128xf32>
    %58 = arith.mulf %57, %40 : vector<32x128xf32>
    %59 = arith.addf %54, %58 : vector<32x128xf32>
    %c0_34 = arith.constant 0 : index
    %c2 = arith.constant 2 : index
    %c0_35 = arith.constant 0 : index
    %c0_36 = arith.constant 0 : index
    %60 = vector.load %arg6[%c0_34, %c2, %c0_35, %c0_36] : memref<3x3x32x1xf32, #tpu.memory_space<vmem>>, vector<1x1x32x1xf32>
    %61 = vector.shape_cast %60 : vector<1x1x32x1xf32> to vector<32x1xf32>
    %62 = vector.broadcast %61 : vector<32x1xf32> to vector<32x128xf32>
    %63 = arith.mulf %62, %50 : vector<32x128xf32>
    %64 = arith.addf %59, %63 : vector<32x128xf32>
    %c0_37 = arith.constant 0 : index
    %c0_38 = arith.constant 0 : index
    %c0_39 = arith.constant 0 : index
    %65 = vector.load %arg7[%c0_37, %c0_38, %c0_39] : memref<3x32x1xf32, #tpu.memory_space<vmem>>, vector<1x32x1xf32>
    %66 = vector.shape_cast %65 : vector<1x32x1xf32> to vector<32x1xf32>
    %67 = vector.broadcast %66 : vector<32x1xf32> to vector<32x128xf32>
    %68 = arith.addf %64, %67 : vector<32x128xf32>
    %cst_40 = arith.constant 0.000000e+00 : f32
    %69 = vector.broadcast %cst_40 : f32 to vector<32x128xf32>
    %70 = arith.cmpf oge, %68, %69 : vector<32x128xf32>
    %c0_41 = arith.constant 0 : index
    %c1_42 = arith.constant 1 : index
    %71 = memref.load %arg12[%c0_41, %c1_42] : memref<3x2xf32, #tpu.memory_space<smem>>
    %72 = vector.broadcast %71 : f32 to vector<32x128xf32>
    %73 = arith.mulf %72, %68 : vector<32x128xf32>
    %74 = arith.select %70, %68, %73 : vector<32x128xi1>, vector<32x128xf32>
    %c0_43 = arith.constant 0 : index
    %c0_44 = arith.constant 0 : index
    %c0_45 = arith.constant 0 : index
    %75 = vector.load %arg8[%c0_43, %c0_44, %c0_45] : memref<3x32x1xf32, #tpu.memory_space<vmem>>, vector<1x32x1xf32>
    %76 = vector.shape_cast %75 : vector<1x32x1xf32> to vector<32x1xf32>
    %c0_46 = arith.constant 0 : index
    %c0_47 = arith.constant 0 : index
    %c0_48 = arith.constant 0 : index
    %77 = vector.load %arg9[%c0_46, %c0_47, %c0_48] : memref<3x32x1xf32, #tpu.memory_space<vmem>>, vector<1x32x1xf32>
    %78 = vector.shape_cast %77 : vector<1x32x1xf32> to vector<32x1xf32>
    %79 = vector.shape_cast %74 : vector<32x128xf32> to vector<1x32x128xf32>
    %cst_49 = arith.constant dense<0.000000e+00> : vector<1xf32>
    %80 = vector.multi_reduction <add>, %79, %cst_49 [1, 2] : vector<1x32x128xf32> to vector<1xf32>
    %81 = vector.shape_cast %80 : vector<1xf32> to vector<1x1x1xf32>
    %82 = vector.extract %81[0, 0, 0] : f32 from vector<1x1x1xf32>
    %cst_50 = arith.constant 2.44140625E-4 : f32
    %83 = arith.mulf %82, %cst_50 : f32
    %84 = vector.broadcast %83 : f32 to vector<32x128xf32>
    %85 = arith.subf %74, %84 : vector<32x128xf32>
    %86 = arith.mulf %85, %85 : vector<32x128xf32>
    %87 = vector.shape_cast %86 : vector<32x128xf32> to vector<1x32x128xf32>
    %cst_51 = arith.constant dense<0.000000e+00> : vector<1xf32>
    %88 = vector.multi_reduction <add>, %87, %cst_51 [1, 2] : vector<1x32x128xf32> to vector<1xf32>
    %89 = vector.shape_cast %88 : vector<1xf32> to vector<1x1x1xf32>
    %90 = vector.extract %89[0, 0, 0] : f32 from vector<1x1x1xf32>
    %cst_52 = arith.constant 2.44140625E-4 : f32
    %91 = arith.mulf %90, %cst_52 : f32
    %92 = vector.broadcast %76 : vector<32x1xf32> to vector<32x128xf32>
    %93 = arith.mulf %92, %85 : vector<32x128xf32>
    %cst_53 = arith.constant 1.000000e-07 : f32
    %94 = arith.addf %91, %cst_53 : f32
    %95 = math.rsqrt %94 : f32
    %96 = vector.broadcast %95 : f32 to vector<32x128xf32>
    %97 = arith.mulf %93, %96 : vector<32x128xf32>
    %98 = vector.broadcast %78 : vector<32x1xf32> to vector<32x128xf32>
    %99 = arith.addf %97, %98 : vector<32x128xf32>
    %c0_54 = arith.constant 0 : index
    %c0_55 = arith.constant 0 : index
    %c0_56 = arith.constant 0 : index
    %100 = vector.load %arg10[%c0_54, %c0_55, %c0_56] : memref<3x16x32xf32, #tpu.memory_space<vmem>>, vector<1x16x32xf32>
    %101 = vector.shape_cast %100 : vector<1x16x32xf32> to vector<16x32xf32>
    %cst_57 = arith.constant dense<0.000000e+00> : vector<16x128xf32>
    %102 = tpu.matmul %101, %99, %cst_57 {dimension_numbers = #tpu.dot_dimension_numbers<[1], [0], [0], [1], [0, 0, 1, 1], [], []>, precision = #tpu.contract_precision<fp32>} : vector<16x32xf32>, vector<32x128xf32>, vector<16x128xf32> -> vector<16x128xf32>
    %103 = arith.addf %1, %102 : vector<16x128xf32>
    %c0_58 = arith.constant 0 : index
    %c0_59 = arith.constant 0 : index
    %c0_60 = arith.constant 0 : index
    %104 = vector.load %arg11[%c0_58, %c0_59, %c0_60] : memref<3x16x1xf32, #tpu.memory_space<vmem>>, vector<1x16x1xf32>
    %105 = vector.shape_cast %104 : vector<1x16x1xf32> to vector<16x1xf32>
    %106 = vector.broadcast %105 : vector<16x1xf32> to vector<16x128xf32>
    %107 = arith.addf %103, %106 : vector<16x128xf32>
    %c1_61 = arith.constant 1 : index
    %c0_62 = arith.constant 0 : index
    %c0_63 = arith.constant 0 : index
    %108 = vector.load %arg3[%c1_61, %c0_62, %c0_63] : memref<3x32x16xf32, #tpu.memory_space<vmem>>, vector<1x32x16xf32>
    %109 = vector.shape_cast %108 : vector<1x32x16xf32> to vector<32x16xf32>
    %cst_64 = arith.constant dense<0.000000e+00> : vector<32x128xf32>
    %110 = tpu.matmul %109, %107, %cst_64 {dimension_numbers = #tpu.dot_dimension_numbers<[1], [0], [0], [1], [0, 0, 1, 1], [], []>, precision = #tpu.contract_precision<fp32>} : vector<32x16xf32>, vector<16x128xf32>, vector<32x128xf32> -> vector<32x128xf32>
    %c0_65 = arith.constant 0 : index
    %c1_66 = arith.constant 1 : index
    %c0_67 = arith.constant 0 : index
    %c0_68 = arith.constant 0 : index
    %111 = vector.load %arg2[%c0_65, %c1_66, %c0_67, %c0_68] : memref<1x3x32x1xf32, #tpu.memory_space<vmem>>, vector<1x1x32x1xf32>
    %112 = vector.shape_cast %111 : vector<1x1x32x1xf32> to vector<32x1xf32>
    %113 = vector.broadcast %112 : vector<32x1xf32> to vector<32x128xf32>
    %114 = arith.addf %110, %113 : vector<32x128xf32>
    %cst_69 = arith.constant 0.000000e+00 : f32
    %115 = vector.broadcast %cst_69 : f32 to vector<32x128xf32>
    %116 = arith.cmpf oge, %114, %115 : vector<32x128xf32>
    %c1_70 = arith.constant 1 : index
    %c0_71 = arith.constant 0 : index
    %117 = memref.load %arg12[%c1_70, %c0_71] : memref<3x2xf32, #tpu.memory_space<smem>>
    %118 = vector.broadcast %117 : f32 to vector<32x128xf32>
    %119 = arith.mulf %118, %114 : vector<32x128xf32>
    %120 = arith.select %116, %114, %119 : vector<32x128xi1>, vector<32x128xf32>
    %c1_72 = arith.constant 1 : index
    %c0_73 = arith.constant 0 : index
    %c0_74 = arith.constant 0 : index
    %121 = vector.load %arg4[%c1_72, %c0_73, %c0_74] : memref<3x32x1xf32, #tpu.memory_space<vmem>>, vector<1x32x1xf32>
    %122 = vector.shape_cast %121 : vector<1x32x1xf32> to vector<32x1xf32>
    %c1_75 = arith.constant 1 : index
    %c0_76 = arith.constant 0 : index
    %c0_77 = arith.constant 0 : index
    %123 = vector.load %arg5[%c1_75, %c0_76, %c0_77] : memref<3x32x1xf32, #tpu.memory_space<vmem>>, vector<1x32x1xf32>
    %124 = vector.shape_cast %123 : vector<1x32x1xf32> to vector<32x1xf32>
    %125 = vector.shape_cast %120 : vector<32x128xf32> to vector<1x32x128xf32>
    %cst_78 = arith.constant dense<0.000000e+00> : vector<1xf32>
    %126 = vector.multi_reduction <add>, %125, %cst_78 [1, 2] : vector<1x32x128xf32> to vector<1xf32>
    %127 = vector.shape_cast %126 : vector<1xf32> to vector<1x1x1xf32>
    %128 = vector.extract %127[0, 0, 0] : f32 from vector<1x1x1xf32>
    %cst_79 = arith.constant 2.44140625E-4 : f32
    %129 = arith.mulf %128, %cst_79 : f32
    %130 = vector.broadcast %129 : f32 to vector<32x128xf32>
    %131 = arith.subf %120, %130 : vector<32x128xf32>
    %132 = arith.mulf %131, %131 : vector<32x128xf32>
    %133 = vector.shape_cast %132 : vector<32x128xf32> to vector<1x32x128xf32>
    %cst_80 = arith.constant dense<0.000000e+00> : vector<1xf32>
    %134 = vector.multi_reduction <add>, %133, %cst_80 [1, 2] : vector<1x32x128xf32> to vector<1xf32>
    %135 = vector.shape_cast %134 : vector<1xf32> to vector<1x1x1xf32>
    %136 = vector.extract %135[0, 0, 0] : f32 from vector<1x1x1xf32>
    %cst_81 = arith.constant 2.44140625E-4 : f32
    %137 = arith.mulf %136, %cst_81 : f32
    %138 = vector.broadcast %122 : vector<32x1xf32> to vector<32x128xf32>
    %139 = arith.mulf %138, %131 : vector<32x128xf32>
    %cst_82 = arith.constant 1.000000e-07 : f32
    %140 = arith.addf %137, %cst_82 : f32
    %141 = math.rsqrt %140 : f32
    %142 = vector.broadcast %141 : f32 to vector<32x128xf32>
    %143 = arith.mulf %139, %142 : vector<32x128xf32>
    %144 = vector.broadcast %124 : vector<32x1xf32> to vector<32x128xf32>
    %145 = arith.addf %143, %144 : vector<32x128xf32>
    %c2_i32 = arith.constant 2 : i32
    %146 = vector.broadcast %c2_i32 : i32 to vector<32x128xi32>
    %147 = arith.cmpi sge, %2, %146 : vector<32x128xi32>
    %c2_i32_83 = arith.constant 2 : i32
    %148 = tpu.dynamic_rotate %145 by %c2_i32_83 dim 1 : vector<32x128xf32>, i32 -> vector<32x128xf32>
    %cst_84 = arith.constant 0.000000e+00 : f32
    %149 = vector.broadcast %cst_84 : f32 to vector<32x128xf32>
    %150 = arith.select %147, %148, %149 : vector<32x128xi1>, vector<32x128xf32>
    %c126_i32 = arith.constant 126 : i32
    %151 = vector.broadcast %c126_i32 : i32 to vector<32x128xi32>
    %152 = arith.cmpi slt, %2, %151 : vector<32x128xi32>
    %c126_i32_85 = arith.constant 126 : i32
    %153 = tpu.dynamic_rotate %145 by %c126_i32_85 dim 1 : vector<32x128xf32>, i32 -> vector<32x128xf32>
    %cst_86 = arith.constant 0.000000e+00 : f32
    %154 = vector.broadcast %cst_86 : f32 to vector<32x128xf32>
    %155 = arith.select %152, %153, %154 : vector<32x128xi1>, vector<32x128xf32>
    %c1_87 = arith.constant 1 : index
    %c0_88 = arith.constant 0 : index
    %c0_89 = arith.constant 0 : index
    %c0_90 = arith.constant 0 : index
    %156 = vector.load %arg6[%c1_87, %c0_88, %c0_89, %c0_90] : memref<3x3x32x1xf32, #tpu.memory_space<vmem>>, vector<1x1x32x1xf32>
    %157 = vector.shape_cast %156 : vector<1x1x32x1xf32> to vector<32x1xf32>
    %158 = vector.broadcast %157 : vector<32x1xf32> to vector<32x128xf32>
    %159 = arith.mulf %158, %150 : vector<32x128xf32>
    %c1_91 = arith.constant 1 : index
    %c1_92 = arith.constant 1 : index
    %c0_93 = arith.constant 0 : index
    %c0_94 = arith.constant 0 : index
    %160 = vector.load %arg6[%c1_91, %c1_92, %c0_93, %c0_94] : memref<3x3x32x1xf32, #tpu.memory_space<vmem>>, vector<1x1x32x1xf32>
    %161 = vector.shape_cast %160 : vector<1x1x32x1xf32> to vector<32x1xf32>
    %162 = vector.broadcast %161 : vector<32x1xf32> to vector<32x128xf32>
    %163 = arith.mulf %162, %145 : vector<32x128xf32>
    %164 = arith.addf %159, %163 : vector<32x128xf32>
    %c1_95 = arith.constant 1 : index
    %c2_96 = arith.constant 2 : index
    %c0_97 = arith.constant 0 : index
    %c0_98 = arith.constant 0 : index
    %165 = vector.load %arg6[%c1_95, %c2_96, %c0_97, %c0_98] : memref<3x3x32x1xf32, #tpu.memory_space<vmem>>, vector<1x1x32x1xf32>
    %166 = vector.shape_cast %165 : vector<1x1x32x1xf32> to vector<32x1xf32>
    %167 = vector.broadcast %166 : vector<32x1xf32> to vector<32x128xf32>
    %168 = arith.mulf %167, %155 : vector<32x128xf32>
    %169 = arith.addf %164, %168 : vector<32x128xf32>
    %c1_99 = arith.constant 1 : index
    %c0_100 = arith.constant 0 : index
    %c0_101 = arith.constant 0 : index
    %170 = vector.load %arg7[%c1_99, %c0_100, %c0_101] : memref<3x32x1xf32, #tpu.memory_space<vmem>>, vector<1x32x1xf32>
    %171 = vector.shape_cast %170 : vector<1x32x1xf32> to vector<32x1xf32>
    %172 = vector.broadcast %171 : vector<32x1xf32> to vector<32x128xf32>
    %173 = arith.addf %169, %172 : vector<32x128xf32>
    %cst_102 = arith.constant 0.000000e+00 : f32
    %174 = vector.broadcast %cst_102 : f32 to vector<32x128xf32>
    %175 = arith.cmpf oge, %173, %174 : vector<32x128xf32>
    %c1_103 = arith.constant 1 : index
    %c1_104 = arith.constant 1 : index
    %176 = memref.load %arg12[%c1_103, %c1_104] : memref<3x2xf32, #tpu.memory_space<smem>>
    %177 = vector.broadcast %176 : f32 to vector<32x128xf32>
    %178 = arith.mulf %177, %173 : vector<32x128xf32>
    %179 = arith.select %175, %173, %178 : vector<32x128xi1>, vector<32x128xf32>
    %c1_105 = arith.constant 1 : index
    %c0_106 = arith.constant 0 : index
    %c0_107 = arith.constant 0 : index
    %180 = vector.load %arg8[%c1_105, %c0_106, %c0_107] : memref<3x32x1xf32, #tpu.memory_space<vmem>>, vector<1x32x1xf32>
    %181 = vector.shape_cast %180 : vector<1x32x1xf32> to vector<32x1xf32>
    %c1_108 = arith.constant 1 : index
    %c0_109 = arith.constant 0 : index
    %c0_110 = arith.constant 0 : index
    %182 = vector.load %arg9[%c1_108, %c0_109, %c0_110] : memref<3x32x1xf32, #tpu.memory_space<vmem>>, vector<1x32x1xf32>
    %183 = vector.shape_cast %182 : vector<1x32x1xf32> to vector<32x1xf32>
    %184 = vector.shape_cast %179 : vector<32x128xf32> to vector<1x32x128xf32>
    %cst_111 = arith.constant dense<0.000000e+00> : vector<1xf32>
    %185 = vector.multi_reduction <add>, %184, %cst_111 [1, 2] : vector<1x32x128xf32> to vector<1xf32>
    %186 = vector.shape_cast %185 : vector<1xf32> to vector<1x1x1xf32>
    %187 = vector.extract %186[0, 0, 0] : f32 from vector<1x1x1xf32>
    %cst_112 = arith.constant 2.44140625E-4 : f32
    %188 = arith.mulf %187, %cst_112 : f32
    %189 = vector.broadcast %188 : f32 to vector<32x128xf32>
    %190 = arith.subf %179, %189 : vector<32x128xf32>
    %191 = arith.mulf %190, %190 : vector<32x128xf32>
    %192 = vector.shape_cast %191 : vector<32x128xf32> to vector<1x32x128xf32>
    %cst_113 = arith.constant dense<0.000000e+00> : vector<1xf32>
    %193 = vector.multi_reduction <add>, %192, %cst_113 [1, 2] : vector<1x32x128xf32> to vector<1xf32>
    %194 = vector.shape_cast %193 : vector<1xf32> to vector<1x1x1xf32>
    %195 = vector.extract %194[0, 0, 0] : f32 from vector<1x1x1xf32>
    %cst_114 = arith.constant 2.44140625E-4 : f32
    %196 = arith.mulf %195, %cst_114 : f32
    %197 = vector.broadcast %181 : vector<32x1xf32> to vector<32x128xf32>
    %198 = arith.mulf %197, %190 : vector<32x128xf32>
    %cst_115 = arith.constant 1.000000e-07 : f32
    %199 = arith.addf %196, %cst_115 : f32
    %200 = math.rsqrt %199 : f32
    %201 = vector.broadcast %200 : f32 to vector<32x128xf32>
    %202 = arith.mulf %198, %201 : vector<32x128xf32>
    %203 = vector.broadcast %183 : vector<32x1xf32> to vector<32x128xf32>
    %204 = arith.addf %202, %203 : vector<32x128xf32>
    %c1_116 = arith.constant 1 : index
    %c0_117 = arith.constant 0 : index
    %c0_118 = arith.constant 0 : index
    %205 = vector.load %arg10[%c1_116, %c0_117, %c0_118] : memref<3x16x32xf32, #tpu.memory_space<vmem>>, vector<1x16x32xf32>
    %206 = vector.shape_cast %205 : vector<1x16x32xf32> to vector<16x32xf32>
    %cst_119 = arith.constant dense<0.000000e+00> : vector<16x128xf32>
    %207 = tpu.matmul %206, %204, %cst_119 {dimension_numbers = #tpu.dot_dimension_numbers<[1], [0], [0], [1], [0, 0, 1, 1], [], []>, precision = #tpu.contract_precision<fp32>} : vector<16x32xf32>, vector<32x128xf32>, vector<16x128xf32> -> vector<16x128xf32>
    %208 = arith.addf %107, %207 : vector<16x128xf32>
    %c1_120 = arith.constant 1 : index
    %c0_121 = arith.constant 0 : index
    %c0_122 = arith.constant 0 : index
    %209 = vector.load %arg11[%c1_120, %c0_121, %c0_122] : memref<3x16x1xf32, #tpu.memory_space<vmem>>, vector<1x16x1xf32>
    %210 = vector.shape_cast %209 : vector<1x16x1xf32> to vector<16x1xf32>
    %211 = vector.broadcast %210 : vector<16x1xf32> to vector<16x128xf32>
    %212 = arith.addf %208, %211 : vector<16x128xf32>
    %c2_123 = arith.constant 2 : index
    %c0_124 = arith.constant 0 : index
    %c0_125 = arith.constant 0 : index
    %213 = vector.load %arg3[%c2_123, %c0_124, %c0_125] : memref<3x32x16xf32, #tpu.memory_space<vmem>>, vector<1x32x16xf32>
    %214 = vector.shape_cast %213 : vector<1x32x16xf32> to vector<32x16xf32>
    %cst_126 = arith.constant dense<0.000000e+00> : vector<32x128xf32>
    %215 = tpu.matmul %214, %212, %cst_126 {dimension_numbers = #tpu.dot_dimension_numbers<[1], [0], [0], [1], [0, 0, 1, 1], [], []>, precision = #tpu.contract_precision<fp32>} : vector<32x16xf32>, vector<16x128xf32>, vector<32x128xf32> -> vector<32x128xf32>
    %c0_127 = arith.constant 0 : index
    %c2_128 = arith.constant 2 : index
    %c0_129 = arith.constant 0 : index
    %c0_130 = arith.constant 0 : index
    %216 = vector.load %arg2[%c0_127, %c2_128, %c0_129, %c0_130] : memref<1x3x32x1xf32, #tpu.memory_space<vmem>>, vector<1x1x32x1xf32>
    %217 = vector.shape_cast %216 : vector<1x1x32x1xf32> to vector<32x1xf32>
    %218 = vector.broadcast %217 : vector<32x1xf32> to vector<32x128xf32>
    %219 = arith.addf %215, %218 : vector<32x128xf32>
    %cst_131 = arith.constant 0.000000e+00 : f32
    %220 = vector.broadcast %cst_131 : f32 to vector<32x128xf32>
    %221 = arith.cmpf oge, %219, %220 : vector<32x128xf32>
    %c2_132 = arith.constant 2 : index
    %c0_133 = arith.constant 0 : index
    %222 = memref.load %arg12[%c2_132, %c0_133] : memref<3x2xf32, #tpu.memory_space<smem>>
    %223 = vector.broadcast %222 : f32 to vector<32x128xf32>
    %224 = arith.mulf %223, %219 : vector<32x128xf32>
    %225 = arith.select %221, %219, %224 : vector<32x128xi1>, vector<32x128xf32>
    %c2_134 = arith.constant 2 : index
    %c0_135 = arith.constant 0 : index
    %c0_136 = arith.constant 0 : index
    %226 = vector.load %arg4[%c2_134, %c0_135, %c0_136] : memref<3x32x1xf32, #tpu.memory_space<vmem>>, vector<1x32x1xf32>
    %227 = vector.shape_cast %226 : vector<1x32x1xf32> to vector<32x1xf32>
    %c2_137 = arith.constant 2 : index
    %c0_138 = arith.constant 0 : index
    %c0_139 = arith.constant 0 : index
    %228 = vector.load %arg5[%c2_137, %c0_138, %c0_139] : memref<3x32x1xf32, #tpu.memory_space<vmem>>, vector<1x32x1xf32>
    %229 = vector.shape_cast %228 : vector<1x32x1xf32> to vector<32x1xf32>
    %230 = vector.shape_cast %225 : vector<32x128xf32> to vector<1x32x128xf32>
    %cst_140 = arith.constant dense<0.000000e+00> : vector<1xf32>
    %231 = vector.multi_reduction <add>, %230, %cst_140 [1, 2] : vector<1x32x128xf32> to vector<1xf32>
    %232 = vector.shape_cast %231 : vector<1xf32> to vector<1x1x1xf32>
    %233 = vector.extract %232[0, 0, 0] : f32 from vector<1x1x1xf32>
    %cst_141 = arith.constant 2.44140625E-4 : f32
    %234 = arith.mulf %233, %cst_141 : f32
    %235 = vector.broadcast %234 : f32 to vector<32x128xf32>
    %236 = arith.subf %225, %235 : vector<32x128xf32>
    %237 = arith.mulf %236, %236 : vector<32x128xf32>
    %238 = vector.shape_cast %237 : vector<32x128xf32> to vector<1x32x128xf32>
    %cst_142 = arith.constant dense<0.000000e+00> : vector<1xf32>
    %239 = vector.multi_reduction <add>, %238, %cst_142 [1, 2] : vector<1x32x128xf32> to vector<1xf32>
    %240 = vector.shape_cast %239 : vector<1xf32> to vector<1x1x1xf32>
    %241 = vector.extract %240[0, 0, 0] : f32 from vector<1x1x1xf32>
    %cst_143 = arith.constant 2.44140625E-4 : f32
    %242 = arith.mulf %241, %cst_143 : f32
    %243 = vector.broadcast %227 : vector<32x1xf32> to vector<32x128xf32>
    %244 = arith.mulf %243, %236 : vector<32x128xf32>
    %cst_144 = arith.constant 1.000000e-07 : f32
    %245 = arith.addf %242, %cst_144 : f32
    %246 = math.rsqrt %245 : f32
    %247 = vector.broadcast %246 : f32 to vector<32x128xf32>
    %248 = arith.mulf %244, %247 : vector<32x128xf32>
    %249 = vector.broadcast %229 : vector<32x1xf32> to vector<32x128xf32>
    %250 = arith.addf %248, %249 : vector<32x128xf32>
    %c4_i32 = arith.constant 4 : i32
    %251 = vector.broadcast %c4_i32 : i32 to vector<32x128xi32>
    %252 = arith.cmpi sge, %2, %251 : vector<32x128xi32>
    %c4_i32_145 = arith.constant 4 : i32
    %253 = tpu.dynamic_rotate %250 by %c4_i32_145 dim 1 : vector<32x128xf32>, i32 -> vector<32x128xf32>
    %cst_146 = arith.constant 0.000000e+00 : f32
    %254 = vector.broadcast %cst_146 : f32 to vector<32x128xf32>
    %255 = arith.select %252, %253, %254 : vector<32x128xi1>, vector<32x128xf32>
    %c124_i32 = arith.constant 124 : i32
    %256 = vector.broadcast %c124_i32 : i32 to vector<32x128xi32>
    %257 = arith.cmpi slt, %2, %256 : vector<32x128xi32>
    %c124_i32_147 = arith.constant 124 : i32
    %258 = tpu.dynamic_rotate %250 by %c124_i32_147 dim 1 : vector<32x128xf32>, i32 -> vector<32x128xf32>
    %cst_148 = arith.constant 0.000000e+00 : f32
    %259 = vector.broadcast %cst_148 : f32 to vector<32x128xf32>
    %260 = arith.select %257, %258, %259 : vector<32x128xi1>, vector<32x128xf32>
    %c2_149 = arith.constant 2 : index
    %c0_150 = arith.constant 0 : index
    %c0_151 = arith.constant 0 : index
    %c0_152 = arith.constant 0 : index
    %261 = vector.load %arg6[%c2_149, %c0_150, %c0_151, %c0_152] : memref<3x3x32x1xf32, #tpu.memory_space<vmem>>, vector<1x1x32x1xf32>
    %262 = vector.shape_cast %261 : vector<1x1x32x1xf32> to vector<32x1xf32>
    %263 = vector.broadcast %262 : vector<32x1xf32> to vector<32x128xf32>
    %264 = arith.mulf %263, %255 : vector<32x128xf32>
    %c2_153 = arith.constant 2 : index
    %c1_154 = arith.constant 1 : index
    %c0_155 = arith.constant 0 : index
    %c0_156 = arith.constant 0 : index
    %265 = vector.load %arg6[%c2_153, %c1_154, %c0_155, %c0_156] : memref<3x3x32x1xf32, #tpu.memory_space<vmem>>, vector<1x1x32x1xf32>
    %266 = vector.shape_cast %265 : vector<1x1x32x1xf32> to vector<32x1xf32>
    %267 = vector.broadcast %266 : vector<32x1xf32> to vector<32x128xf32>
    %268 = arith.mulf %267, %250 : vector<32x128xf32>
    %269 = arith.addf %264, %268 : vector<32x128xf32>
    %c2_157 = arith.constant 2 : index
    %c2_158 = arith.constant 2 : index
    %c0_159 = arith.constant 0 : index
    %c0_160 = arith.constant 0 : index
    %270 = vector.load %arg6[%c2_157, %c2_158, %c0_159, %c0_160] : memref<3x3x32x1xf32, #tpu.memory_space<vmem>>, vector<1x1x32x1xf32>
    %271 = vector.shape_cast %270 : vector<1x1x32x1xf32> to vector<32x1xf32>
    %272 = vector.broadcast %271 : vector<32x1xf32> to vector<32x128xf32>
    %273 = arith.mulf %272, %260 : vector<32x128xf32>
    %274 = arith.addf %269, %273 : vector<32x128xf32>
    %c2_161 = arith.constant 2 : index
    %c0_162 = arith.constant 0 : index
    %c0_163 = arith.constant 0 : index
    %275 = vector.load %arg7[%c2_161, %c0_162, %c0_163] : memref<3x32x1xf32, #tpu.memory_space<vmem>>, vector<1x32x1xf32>
    %276 = vector.shape_cast %275 : vector<1x32x1xf32> to vector<32x1xf32>
    %277 = vector.broadcast %276 : vector<32x1xf32> to vector<32x128xf32>
    %278 = arith.addf %274, %277 : vector<32x128xf32>
    %cst_164 = arith.constant 0.000000e+00 : f32
    %279 = vector.broadcast %cst_164 : f32 to vector<32x128xf32>
    %280 = arith.cmpf oge, %278, %279 : vector<32x128xf32>
    %c2_165 = arith.constant 2 : index
    %c1_166 = arith.constant 1 : index
    %281 = memref.load %arg12[%c2_165, %c1_166] : memref<3x2xf32, #tpu.memory_space<smem>>
    %282 = vector.broadcast %281 : f32 to vector<32x128xf32>
    %283 = arith.mulf %282, %278 : vector<32x128xf32>
    %284 = arith.select %280, %278, %283 : vector<32x128xi1>, vector<32x128xf32>
    %c2_167 = arith.constant 2 : index
    %c0_168 = arith.constant 0 : index
    %c0_169 = arith.constant 0 : index
    %285 = vector.load %arg8[%c2_167, %c0_168, %c0_169] : memref<3x32x1xf32, #tpu.memory_space<vmem>>, vector<1x32x1xf32>
    %286 = vector.shape_cast %285 : vector<1x32x1xf32> to vector<32x1xf32>
    %c2_170 = arith.constant 2 : index
    %c0_171 = arith.constant 0 : index
    %c0_172 = arith.constant 0 : index
    %287 = vector.load %arg9[%c2_170, %c0_171, %c0_172] : memref<3x32x1xf32, #tpu.memory_space<vmem>>, vector<1x32x1xf32>
    %288 = vector.shape_cast %287 : vector<1x32x1xf32> to vector<32x1xf32>
    %289 = vector.shape_cast %284 : vector<32x128xf32> to vector<1x32x128xf32>
    %cst_173 = arith.constant dense<0.000000e+00> : vector<1xf32>
    %290 = vector.multi_reduction <add>, %289, %cst_173 [1, 2] : vector<1x32x128xf32> to vector<1xf32>
    %291 = vector.shape_cast %290 : vector<1xf32> to vector<1x1x1xf32>
    %292 = vector.extract %291[0, 0, 0] : f32 from vector<1x1x1xf32>
    %cst_174 = arith.constant 2.44140625E-4 : f32
    %293 = arith.mulf %292, %cst_174 : f32
    %294 = vector.broadcast %293 : f32 to vector<32x128xf32>
    %295 = arith.subf %284, %294 : vector<32x128xf32>
    %296 = arith.mulf %295, %295 : vector<32x128xf32>
    %297 = vector.shape_cast %296 : vector<32x128xf32> to vector<1x32x128xf32>
    %cst_175 = arith.constant dense<0.000000e+00> : vector<1xf32>
    %298 = vector.multi_reduction <add>, %297, %cst_175 [1, 2] : vector<1x32x128xf32> to vector<1xf32>
    %299 = vector.shape_cast %298 : vector<1xf32> to vector<1x1x1xf32>
    %300 = vector.extract %299[0, 0, 0] : f32 from vector<1x1x1xf32>
    %cst_176 = arith.constant 2.44140625E-4 : f32
    %301 = arith.mulf %300, %cst_176 : f32
    %302 = vector.broadcast %286 : vector<32x1xf32> to vector<32x128xf32>
    %303 = arith.mulf %302, %295 : vector<32x128xf32>
    %cst_177 = arith.constant 1.000000e-07 : f32
    %304 = arith.addf %301, %cst_177 : f32
    %305 = math.rsqrt %304 : f32
    %306 = vector.broadcast %305 : f32 to vector<32x128xf32>
    %307 = arith.mulf %303, %306 : vector<32x128xf32>
    %308 = vector.broadcast %288 : vector<32x1xf32> to vector<32x128xf32>
    %309 = arith.addf %307, %308 : vector<32x128xf32>
    %c2_178 = arith.constant 2 : index
    %c0_179 = arith.constant 0 : index
    %c0_180 = arith.constant 0 : index
    %310 = vector.load %arg10[%c2_178, %c0_179, %c0_180] : memref<3x16x32xf32, #tpu.memory_space<vmem>>, vector<1x16x32xf32>
    %311 = vector.shape_cast %310 : vector<1x16x32xf32> to vector<16x32xf32>
    %cst_181 = arith.constant dense<0.000000e+00> : vector<16x128xf32>
    %312 = tpu.matmul %311, %309, %cst_181 {dimension_numbers = #tpu.dot_dimension_numbers<[1], [0], [0], [1], [0, 0, 1, 1], [], []>, precision = #tpu.contract_precision<fp32>} : vector<16x32xf32>, vector<32x128xf32>, vector<16x128xf32> -> vector<16x128xf32>
    %313 = arith.addf %212, %312 : vector<16x128xf32>
    %c2_182 = arith.constant 2 : index
    %c0_183 = arith.constant 0 : index
    %c0_184 = arith.constant 0 : index
    %314 = vector.load %arg11[%c2_182, %c0_183, %c0_184] : memref<3x16x1xf32, #tpu.memory_space<vmem>>, vector<1x16x1xf32>
    %315 = vector.shape_cast %314 : vector<1x16x1xf32> to vector<16x1xf32>
    %316 = vector.broadcast %315 : vector<16x1xf32> to vector<16x128xf32>
    %317 = arith.addf %313, %316 : vector<16x128xf32>
    %c0_185 = arith.constant 0 : index
    %c0_186 = arith.constant 0 : index
    %c0_187 = arith.constant 0 : index
    %318 = vector.load %arg13[%c0_185, %c0_186, %c0_187] : memref<1x16x128xf32, #tpu.memory_space<vmem>>, vector<1x16x128xf32>
    %319 = vector.shape_cast %318 : vector<1x16x128xf32> to vector<16x128xf32>
    %320 = vector.shape_cast %317 : vector<16x128xf32> to vector<1x16x128xf32>
    tpu.vector_store %arg13[%c0_185, %c0_186, %c0_187], %320 {strides = array<i32>} : memref<1x16x128xf32, #tpu.memory_space<vmem>>, vector<1x16x128xf32>,
    return
  }
  func.func @transform_0(%arg0: i32) -> (i32, i32, i32) {
    %c0_i32 = arith.constant 0 : i32
    %c0_i32_0 = arith.constant 0 : i32
    %c0_i32_1 = arith.constant 0 : i32
    return %arg0, %c0_i32, %c0_i32_0 : i32, i32, i32
  }
  func.func @transform_1(%arg0: i32) -> (i32, i32, i32, i32) {
    %c0_i32 = arith.constant 0 : i32
    %c0_i32_0 = arith.constant 0 : i32
    %c0_i32_1 = arith.constant 0 : i32
    %c0_i32_2 = arith.constant 0 : i32
    return %arg0, %c0_i32, %c0_i32_0, %c0_i32_1 : i32, i32, i32, i32
  }
  func.func @transform_2(%arg0: i32) -> (i32, i32, i32) {
    %c0_i32 = arith.constant 0 : i32
    %c0_i32_0 = arith.constant 0 : i32
    %c0_i32_1 = arith.constant 0 : i32
    %c0_i32_2 = arith.constant 0 : i32
    return %c0_i32, %c0_i32_0, %c0_i32_1 : i32, i32, i32
  }
  func.func @transform_3(%arg0: i32) -> (i32, i32, i32) {
    %c0_i32 = arith.constant 0 : i32
    %c0_i32_0 = arith.constant 0 : i32
    %c0_i32_1 = arith.constant 0 : i32
    %c0_i32_2 = arith.constant 0 : i32
    return %c0_i32, %c0_i32_0, %c0_i32_1 : i32, i32, i32
  }
  func.func @transform_4(%arg0: i32) -> (i32, i32, i32) {
    %c0_i32 = arith.constant 0 : i32
    %c0_i32_0 = arith.constant 0 : i32
    %c0_i32_1 = arith.constant 0 : i32
    %c0_i32_2 = arith.constant 0 : i32
    return %c0_i32, %c0_i32_0, %c0_i32_1 : i32, i32, i32
  }
  func.func @transform_5(%arg0: i32) -> (i32, i32, i32, i32) {
    %c0_i32 = arith.constant 0 : i32
    %c0_i32_0 = arith.constant 0 : i32
    %c0_i32_1 = arith.constant 0 : i32
    %c0_i32_2 = arith.constant 0 : i32
    %c0_i32_3 = arith.constant 0 : i32
    return %c0_i32, %c0_i32_0, %c0_i32_1, %c0_i32_2 : i32, i32, i32, i32
  }
  func.func @transform_6(%arg0: i32) -> (i32, i32, i32) {
    %c0_i32 = arith.constant 0 : i32
    %c0_i32_0 = arith.constant 0 : i32
    %c0_i32_1 = arith.constant 0 : i32
    %c0_i32_2 = arith.constant 0 : i32
    return %c0_i32, %c0_i32_0, %c0_i32_1 : i32, i32, i32
  }
  func.func @transform_7(%arg0: i32) -> (i32, i32, i32) {
    %c0_i32 = arith.constant 0 : i32
    %c0_i32_0 = arith.constant 0 : i32
    %c0_i32_1 = arith.constant 0 : i32
    %c0_i32_2 = arith.constant 0 : i32
    return %c0_i32, %c0_i32_0, %c0_i32_1 : i32, i32, i32
  }
  func.func @transform_8(%arg0: i32) -> (i32, i32, i32) {
    %c0_i32 = arith.constant 0 : i32
    %c0_i32_0 = arith.constant 0 : i32
    %c0_i32_1 = arith.constant 0 : i32
    %c0_i32_2 = arith.constant 0 : i32
    return %c0_i32, %c0_i32_0, %c0_i32_1 : i32, i32, i32
  }
  func.func @transform_9(%arg0: i32) -> (i32, i32, i32) {
    %c0_i32 = arith.constant 0 : i32
    %c0_i32_0 = arith.constant 0 : i32
    %c0_i32_1 = arith.constant 0 : i32
    %c0_i32_2 = arith.constant 0 : i32
    return %c0_i32, %c0_i32_0, %c0_i32_1 : i32, i32, i32
  }
  func.func @transform_10(%arg0: i32) -> (i32, i32, i32) {
    %c0_i32 = arith.constant 0 : i32
    %c0_i32_0 = arith.constant 0 : i32
    %c0_i32_1 = arith.constant 0 : i32
    %c0_i32_2 = arith.constant 0 : i32
    return %c0_i32, %c0_i32_0, %c0_i32_1 : i32, i32, i32
  }
  func.func @transform_11(%arg0: i32) -> (i32, i32) {
    %c0_i32 = arith.constant 0 : i32
    %c0_i32_0 = arith.constant 0 : i32
    %c0_i32_1 = arith.constant 0 : i32
    return %c0_i32, %c0_i32_0 : i32, i32
  }
  func.func @transform_12(%arg0: i32) -> (i32, i32, i32) {
    %c0_i32 = arith.constant 0 : i32
    %c0_i32_0 = arith.constant 0 : i32
    %c0_i32_1 = arith.constant 0 : i32
    return %arg0, %c0_i32, %c0_i32_0 : i32, i32, i32
  }
}

</mosaic_0001>

<bundles_post_ra>
// kernel: tpu_custom_call.1
= control target key start
LH: loop header
LB: loop body
LE: loop exit
PB: predicated region body
PF: predicated region fallthrough
CT: control target
= control target key end

     0   :  { %s4490_s0 = inlined_call_operand.vmem [shape: f32[2,16,128], index: 0, kind: input, shape index: {}]   ;;  %s4491_s1 = inlined_call_operand.vmem [shape: f32[2,3,32,1], index: 1, kind: input, shape index: {}]   ;;  %s4492_s2 = inlined_call_operand.vmem [shape: f32[3,32,16], index: 2, kind: input, shape index: {}]   ;;  %s4493_s3 = inlined_call_operand.vmem [shape: f32[3,32,1], index: 3, kind: input, shape index: {}]   ;;  %s4494_s4 = inlined_call_operand.vmem [shape: f32[3,32,1], index: 4, kind: input, shape index: {}]   ;;  %s4495_s5 = inlined_call_operand.vmem [shape: f32[3,3,32,1], index: 5, kind: input, shape index: {}]   ;;  %s4496_s6 = inlined_call_operand.vmem [shape: f32[3,32,1], index: 6, kind: input, shape index: {}]   ;;  %s4497_s7 = inlined_call_operand.vmem [shape: f32[3,32,1], index: 7, kind: input, shape index: {}]   ;;  %s4498_s8 = inlined_call_operand.vmem [shape: f32[3,32,1], index: 8, kind: input, shape index: {}]   ;;  %s4499_s9 = inlined_call_operand.vmem [shape: f32[3,16,32], index: 9, kind: input, shape index: {}]   ;;  %s4500_s10 = inlined_call_operand.vmem [shape: f32[3,16,1], index: 10, kind: input, shape index: {}]   ;;  %s4501_s11 = inlined_call_operand.vmem [shape: f32[3,2], index: 11, kind: input, shape index: {}]   ;;  %s4502_s12 = inlined_call_operand.hbm [shape: f32[2,16,128], index: 12, kind: output, shape index: {}]  }
   0x1   :  { %4503 = sst [smem:[#allocation8_spill]] %s4490_s0 }
   0x2   :  { %4504 = sst [smem:[#allocation9_spill]] %s4491_s1 }
   0x3   :  { %4505 = sst [smem:[#allocation10_spill]] %s4501_s11 }
   0x4   :  { %17 = vsyncpa [#allocation4], 0 }
   0x5   :  { %18 = vsyncpa [#allocation3], 0 }
   0x6   :  { %20 = vsyncpa [#allocation3 + $0x1], 0  ;;  %s3747_s21 = smov 0   ;;  %s3749_s22 = smov 0  }
   0x7   :  { %s3751_s23 = smov 0   ;;  %s3753_s24 = smov 0  }
   0x8 LB: > { %s3768_s25 = sadd.s32 4294967295, %s3670_s24   ;;  %s3354_s26 = sadd.s32 4294967294, %s3670_s24   ;;  %s3670_s24 = sphi %s3753_s24, %s4514_s24   ;;  %s3666_s23 = sphi %s3751_s23, %s4513_s23   ;;  %s3662_s22 = sphi %s3749_s22, %s4512_s22   ;;  %s3658_s21 = sphi %s3747_s21, %s4511_s21  }
   0x9   : > { %s3772_s27 = sadd.s32 1, %s3670_s24   ;;  %s295_s28 = sadd.s32 1, %s3666_s23 }
   0xa   : > { %s292_s29 = ssub.s32 %s3670_s24, %s3772_s27  ;;  %p305_p0 = scmp.ne.s32.totalorder %s3666_s23, %s3662_s22 }
   0xb   : > { %p293_p1 = scmp.eq.s32.totalorder %s292_s29, 0  ;;  %p306_p2 = scmp.eq.s32.totalorder %s3768_s25, 1 }
   0xc   : > { %p311_p3 = scmp.ne.s32.totalorder %s3662_s22, %s3658_s21  ;;  %p312_p4 = scmp.eq.s32.totalorder %s3354_s26, 1 }
   0xd   : > { %s3783_s30 = scalar_select %p293_p1, %s3666_s23, %s295_s28  }
   0xe   : > { %p3785_p5 = por %p306_p2, %p305_p0  ;;  %p3789_p6 = por %p312_p4, %p311_p3 }
   0xf   : > { %p3355_p7 = scmp.ge.s32.totalorder %s3670_s24, 1  ;;  %p319_p8 = scmp.lt.s32.totalorder %s3670_s24, 3 }
  0x10   : > { %p3527_p9 = scmp.eq.s32.totalorder %s3768_s25, 0  ;;  %s4508_s11 = sld [smem:[#allocation10_spill]] }
  0x11   : > { %p320_p10 = pnand %p3355_p7, %p319_p8  ;;  %s3672_s18 = smov [#allocation2]  }
  0x13   : > { %p3519_p11 = pneg %p320_p10  ;;  %387 = sbr.rel (%p320_p10) target bundleno = 4321 (0x10e1), region = 68 }
  0x15   : > { %p3520_p12 = pnand %p3527_p9, %p3519_p11 }
  0x16   : > { %s358_s17 = sshll.u32 %s4508_s11, 4  ;;  %s359_s17 = int_to_ptr.vmem [resolvable:$true] %s358_s17 }
  0x17   : > { %3522 = dma.vmem_to_smem (!%p3520_p12), %s359_s17, 64, %s3672_s18, [#allocation4]  }
  0x18   : > { %3649 = dma.done.wait (%p3527_p9), [#allocation4], 64  }
  0x19   : > { %3651 = vsyncadd (%p3527_p9), [#allocation4], 4294967232 }
  0x1a   : > { %394 = sfence }
  0x1b   : > { %p436_p13 = scmp.lt.s32.totalorder %s3768_s25, 1  ;;  %v450_v0 = vld [vmem:[%s4492_s2] sm:$0xff]  ;;  %vm478_vm0 = vcmask 130048   ;;  %v453_v1 = vld [vmem:[%s4492_s2 + $0x18] sm:$0xff]  ;;  %v451_v2 = vld [vmem:[%s4492_s2 + $0x8] sm:$0xff]  ;;  %v3673_v3 = vmov 0  }
  0x1c   : > { %3573 = vset.pattern.permute.xlu1 %v3673_v3  ;;  %3572 = vset.pattern.permute.xlu0 %v3673_v3  ;;  %v480_v4 = vsel %vm478_vm0, %v450_v0, 0  ;;  %v489_v5 = vsel %vm478_vm0, %v453_v1, 0  ;;  %v483_v6 = vsel %vm478_vm0, %v451_v2, 0  ;;  %v452_v10 = vld [vmem:[%s4492_s2 + $0x10] sm:$0xff]  ;;  %s4509_s0 = sld [smem:[#allocation8_spill]]  ;;  %v758_v44 = vld [vmem:[%s4493_s3 + $0x8] sm:$0xff] }
  0x1d   : > { %s437_s16 = scalar_select %p436_p13, %s3768_s25, 1  ;;  %v3813_v7 = vand.u32 4294901760, %v480_v4  ;;  %v3815_v8 = vand.u32 4294901760, %v489_v5  ;;  %v3817_v9 = vand.u32 4294901760, %v483_v6  ;;  %3574 = vset.pattern.permute.xlu2 %v3673_v3  ;;  %v486_v14 = vsel %vm478_vm0, %v452_v10, 0  ;;  %v757_v45 = vld [vmem:[%s4493_s3] sm:$0xff] }
  0x1e   : > { %s4510_s1 = sld [smem:[#allocation9_spill]]  ;;  %v3853_v26 = vand.u32 4294901760, %v486_v14  ;;  %v761_v47 = vld [vmem:[%s4494_s4] sm:$0xff]  ;;  %v760_v48 = vld [vmem:[%s4493_s3 + $0x18] sm:$0xff]  ;;  %v763_v49 = vld [vmem:[%s4494_s4 + $0x10] sm:$0xff] }
  0x1f   : > { %s3476_s19 = smul.u32 96, %s437_s16  ;;  %s3470_s20 = sshll.u32 %s437_s16, 4  ;;  %v3823_v11 = vsub.f32 %v480_v4, %v3813_v7  ;;  %v3826_v12 = vsub.f32 %v489_v5, %v3815_v8  ;;  %v3829_v13 = vsub.f32 %v483_v6, %v3817_v9  ;;  %v762_v50 = vld [vmem:[%s4494_s4 + $0x8] sm:$0xff]  ;;  %v764_v52 = vld [vmem:[%s4494_s4 + $0x18] sm:$0xff]  ;;  %v894_v53 = vld [vmem:[%s4495_s5 + $0x10] sm:$0xff] }
  0x20   : > { %v526_v34 = vsub.f32 %v486_v14, %v3853_v26  ;;  %v893_v51 = vld [vmem:[%s4495_s5 + $0x8] sm:$0xff]  ;;  %v892_v54 = vld [vmem:[%s4495_s5] sm:$0xff]  ;;  %v895_v57 = vld [vmem:[%s4495_s5 + $0x18] sm:$0xff] }
  0x21   : > { %v511_v17 = vand.u32 4294901760, %v3823_v11  ;;  %v535_v18 = vand.u32 4294901760, %v3826_v12  ;;  %v519_v25 = vand.u32 4294901760, %v3829_v13  ;;  %v3369_v55 = vld [vmem:[%s4495_s5 + $0x48] sm:$0xff]  ;;  %v3368_v58 = vld [vmem:[%s4495_s5 + $0x40] sm:$0xff]  ;;  %v3370_v59 = vld [vmem:[%s4495_s5 + $0x50] sm:$0xff] }
  0x22   : > { %s3834_s29 = scalar_lea.vmem %s4509_s0, %s3470_s20  ;;  %v527_v42 = vand.u32 4294901760, %v526_v34  ;;  %v3365_v56 = vld [vmem:[%s4495_s5 + $0x28] sm:$0xff]  ;;  %v986_v60 = vld [vmem:[%s4496_s6] sm:$0xff]  ;;  %s747_s0 = sld [smem:[#allocation2]] }
  0x23   : > { %v447_v15 = vld [vmem:[%s3834_s29 + $0x8] sm:$0xff]  ;;  %v446_v16 = vld [vmem:[%s3834_s29] sm:$0xff]  ;;  %v512_v23 = vsub.f32 %v3823_v11, %v511_v17  ;;  %v536_v24 = vsub.f32 %v3826_v12, %v535_v18  ;;  %v520_v33 = vsub.f32 %v3829_v13, %v519_v25 }
  0x24   : > { %s3840_s17 = scalar_lea.vmem %s4510_s1, %s3476_s19  ;;  %v505_v21 = vand.u32 4294901760, %v447_v15  ;;  %v507_v22 = vand.u32 4294901760, %v446_v16  ;;  %v528_v43 = vsub.f32 %v526_v34, %v527_v42  ;;  %s3381_s1 = sld [smem:[#allocation2 + $0x80]] }
  0x25   : > { %v456_v19 = vld [vmem:[%s3840_s17 + $0x10] sm:$0xff]  ;;  %v454_v20 = vld [vmem:[%s3840_s17] sm:$0xff]  ;;  %v513_v29 = vand.u32 4294901760, %v512_v23  ;;  %v537_v30 = vand.u32 4294901760, %v536_v24  ;;  %v457_v35 = vld [vmem:[%s3840_s17 + $0x18] sm:$0xff]  ;;  %v521_v41 = vand.u32 4294901760, %v520_v33 }
  0x26   : > { %470 = vperm.xlu1 %3573, %v456_v19   ;;  %460 = vperm.xlu0 %3572, %v454_v20   ;;  %v557_v27 = vsub.f32 %v447_v15, %v505_v21  ;;  %v563_v28 = vsub.f32 %v446_v16, %v507_v22  ;;  %v455_v36 = vld [vmem:[%s3840_s17 + $0x8] sm:$0xff]  ;;  %v529_v46 = vand.u32 4294901760, %v528_v43 }
  0x27   : > { %506 = vmatpush.msra.mxu0 %v505_v21  ;;  %3472 = vmatpush.msra.mxu2 %v505_v21 }
  0x28   : > { %v558_v31 = vand.u32 4294901760, %v557_v27  ;;  %v564_v32 = vand.u32 4294901760, %v563_v28 }
  0x29   : > { %508 = vmatpush.msra.mxu0 %v507_v22  ;;  %3473 = vmatpush.msra.mxu2 %v507_v22 }
  0x2a   : > { %514 = vmatmul.f32.vlgmr.msra.gmra.mxu0 %v513_v29  ;;  %538 = vmatmul.f32.vlgmr.msra.gmra.mxu2 %v537_v30  ;;  %v559_v37 = vsub.f32 %v557_v27, %v558_v31  ;;  %v565_v38 = vsub.f32 %v563_v28, %v564_v32 }
  0x2b   : > { %601 = vmatpush.msrb.mxu2 %v557_v27  ;;  %686 = vmatpush.msrb.mxu0 %v558_v31 }
  0x2c   : > { %v560_v39 = vand.u32 4294901760, %v559_v37  ;;  %v566_v40 = vand.u32 4294901760, %v565_v38 }
  0x2d   : > { %604 = vmatpush.msrb.mxu2 %v563_v28  ;;  %690 = vmatpush.msrb.mxu0 %v564_v32 }
  0x2e   : > { %475 = vperm.xlu1 %3573, %v457_v35   ;;  %465 = vperm.xlu0 %3572, %v455_v36  }
  0x2f   : > { %561 = vmatpush.msra.mxu1 %v560_v39  ;;  %3474 = vmatpush.msra.mxu3 %v560_v39 }
  0x31   : > { %567 = vmatpush.msra.mxu1 %v566_v40  ;;  %3475 = vmatpush.msra.mxu3 %v566_v40 }
  0x32   : > { %522 = vmatmul.f32.gmra.mxu0 %v521_v41  ;;  %569 = vmatmul.f32.vlgmr.msra.gmra.mxu1 %v3813_v7 }
  0x33   : > { %581 = vmatmul.f32.vlgmr.msra.gmra.mxu3 %v3815_v8  ;;  %607 = vmatmul.f32.vlgmr.msrb.gmra.mxu2 %v3823_v11 }
  0x34   : > { %641 = vmatpush.msrb.mxu3 %v505_v21  ;;  %723 = vmatpush.msrb.mxu1 %v505_v21 }
  0x36   : > { %807 = vperm.xlu1 %3573, %v758_v44   ;;  %802 = vperm.xlu0 %3572, %v757_v45   ;;  %v748_v44 = vstv %s747_s0 }
  0x37   : > { %643 = vmatpush.msrb.mxu3 %v507_v22  ;;  %725 = vmatpush.msrb.mxu1 %v507_v22 }
  0x3a   : > { %530 = vmatmul.f32.gmra.mxu0 %v529_v46  ;;  %573 = vmatmul.f32.gmra.mxu1 %v3817_v9 }
  0x3b   : > { %612 = vmatmul.f32.gmra.mxu2 %v3829_v13  ;;  %647 = vmatmul.f32.vlgmr.msrb.gmra.mxu3 %v511_v17 }
  0x3e   : > { %844 = vperm.xlu1 %3573, %v761_v47   ;;  %817 = vperm.xlu0 %3572, %v760_v48  }
  0x42   : > { %577 = vmatmul.f32.gmra.mxu1 %v3853_v26  ;;  %692 = vmatmul.f32.vlgmr.msrb.gmra.mxu0 %v3813_v7 }
  0x43   : > { %617 = vmatmul.f32.gmra.mxu2 %v526_v34  ;;  %653 = vmatmul.f32.gmra.mxu3 %v519_v25 }
  0x46   : > { %854 = vperm.xlu1 %3573, %v763_v49   ;;  %849 = vperm.xlu0 %3572, %v762_v50  }
  0x4a   : > { %696 = vmatmul.f32.gmra.mxu0 %v3817_v9  ;;  %727 = vmatmul.f32.vlgmr.msrb.gmra.mxu1 %v3813_v7 }
  0x4b   : > { %622 = vmatmul.f32.gmra.mxu2 %v3826_v12  ;;  %659 = vmatmul.f32.gmra.mxu3 %v527_v42 }
  0x4e   : > { %903 = vperm.xlu1 %3573, %v893_v51   ;;  %859 = vperm.xlu0 %3572, %v764_v52  }
  0x52   : > { %700 = vmatmul.f32.gmra.mxu0 %v3853_v26  ;;  %731 = vmatmul.f32.gmra.mxu1 %v3817_v9 }
  0x53   : > { %665 = vmatmul.f32.gmra.mxu3 %v535_v18 }
  0x56   : > { %908 = vperm.xlu1 %3573, %v894_v53   ;;  %898 = vperm.xlu0 %3572, %v892_v54  }
  0x5a   : > { %704 = vmatmul.f32.gmra.mxu0 %v3815_v8  ;;  %735 = vmatmul.f32.gmra.mxu1 %v3853_v26 }
  0x5e   : > { %965 = vperm.xlu1 %3573, %v3369_v55   ;;  %932 = vperm.xlu0 %3572, %v3365_v56  }
  0x62   : > { %739 = vmatmul.f32.gmra.mxu1 %v3815_v8 }
  0x66   : > { %913 = vperm.xlu1 %3573, %v895_v57   ;;  %960 = vperm.xlu0 %3572, %v3368_v58  }
  0x6e   : > { %970 = vperm.xlu0 %3572, %v3370_v59  }
  0x76   : > { %992 = vperm.xlu0 %3572, %v986_v60  }
  0x98   : > { %v461_v5 = vpop.permute.xlu0 %460  ;;  %v471_v10 = vpop.permute.xlu1 %470 }
  0xa0   : > { %v466_v11 = vpop.permute.xlu0 %465  ;;  %v476_v28 = vpop.permute.xlu1 %475 }
  0xa7   : > { %v515_v61 = vpop.f32.mrf.mxu0 }
  0xa8   : > { %v516_v16 = vadd.f32 %v515_v61, %v461_v5 }
  0xad   : > { %v539_v62 = vpop.f32.mrf.mxu2 }
  0xae   : > { %v540_v30 = vadd.f32 %v539_v62, %v476_v28 }
  0xaf   : > { %v523_v63 = vpop.f32.mrf.mxu0  ;;  %v570_v0 = vpop.f32.mrf.mxu1 }
  0xb0   : > { %v524_v15 = vadd.f32 %v523_v63, %v466_v11  ;;  %v571_v20 = vadd.f32 %v570_v0, %v516_v16  ;;  %v759_v16 = vld [vmem:[%s4493_s3 + $0x10] sm:$0xff] }
  0xb6   : > { %v582_v1 = vpop.f32.mrf.mxu3  ;;  %v608_v2 = vpop.f32.mrf.mxu2 }
  0xb7   : > { %v531_v3 = vpop.f32.mrf.mxu0  ;;  %v574_v4 = vpop.f32.mrf.mxu1  ;;  %v609_v25 = vadd.f32 %v608_v2, %v571_v20  ;;  %v583_v35 = vadd.f32 %v582_v1, %v540_v30 }
  0xb8   : > { %v532_v17 = vadd.f32 %v531_v3, %v471_v10  ;;  %v575_v19 = vadd.f32 %v574_v4, %v524_v15 }
  0xbe   : > { %v648_v6 = vpop.f32.mrf.mxu3  ;;  %v613_v9 = vpop.f32.mrf.mxu2 }
  0xbf   : > { %v578_v7 = vpop.f32.mrf.mxu1  ;;  %v693_v8 = vpop.f32.mrf.mxu0  ;;  %v614_v21 = vadd.f32 %v613_v9, %v575_v19  ;;  %v649_v31 = vadd.f32 %v648_v6, %v609_v25  ;;  %v3367_v19 = vld [vmem:[%s4495_s5 + $0x38] sm:$0xff] }
  0xc0   : > { %v579_v22 = vadd.f32 %v578_v7, %v532_v17  ;;  %v3364_v17 = vld [vmem:[%s4495_s5 + $0x20] sm:$0xff] }
  0xc1   : > { %v694_v36 = vadd.f32 %v693_v8, %v649_v31 }
  0xc6   : > { %v654_v12 = vpop.f32.mrf.mxu3  ;;  %v618_v18 = vpop.f32.mrf.mxu2 }
  0xc7   : > { %v697_v13 = vpop.f32.mrf.mxu0  ;;  %v728_v14 = vpop.f32.mrf.mxu1  ;;  %v619_v26 = vadd.f32 %v618_v18, %v579_v22  ;;  %v655_v27 = vadd.f32 %v654_v12, %v614_v21  ;;  %v3366_v18 = vld [vmem:[%s4495_s5 + $0x30] sm:$0xff] }
  0xc8   : > { %v729_v41 = vadd.f32 %v728_v14, %v694_v36  ;;  %v803_v36 = vpop.permute.xlu0 %802 }
  0xc9   : > { %v698_v33 = vadd.f32 %v697_v13, %v655_v27 }
  0xca   : > { %v749_v48 = vmul.f32 %v748_v44, %v729_v41  ;;  %vm743_vm2 = vcmp.ge.f32.partialorder %v729_v41, 0.0 }
  0xcc   : > { %v753_v54 = vsel %vm743_vm2, %v729_v41, %v749_v48  ;;  %vm1139_vm2 = vcmask 261120  }
  0xce   : > { %v660_v23 = vpop.f32.mrf.mxu3  ;;  %v623_v34 = vpop.f32.mrf.mxu2 }
  0xcf   : > { %v732_v24 = vpop.f32.mrf.mxu1  ;;  %v701_v29 = vpop.f32.mrf.mxu0  ;;  %v661_v32 = vadd.f32 %v660_v23, %v619_v26  ;;  %v624_v42 = vadd.f32 %v623_v34, %v583_v35  ;;  %v3371_v23 = vld [vmem:[%s4495_s5 + $0x58] sm:$0xff] }
  0xd0   : > { %v733_v38 = vadd.f32 %v732_v24, %v698_v33 }
  0xd1   : > { %v702_v37 = vadd.f32 %v701_v29, %v661_v32 }
  0xd2   : > { %v750_v45 = vmul.f32 %v748_v44, %v733_v38  ;;  %vm744_vm1 = vcmp.ge.f32.partialorder %v733_v38, 0.0 }
  0xd4   : > { %v754_v51 = vsel %vm744_vm1, %v733_v38, %v750_v45  ;;  %v818_v38 = vpop.permute.xlu0 %817 }
  0xd5   : > { %v765_v56 = vadd.f32 %v754_v51, %v753_v54 }
  0xd6   : > { %v666_v39 = vpop.f32.mrf.mxu3 }
  0xd7   : > { %v736_v40 = vpop.f32.mrf.mxu1  ;;  %v667_v46 = vadd.f32 %v666_v39, %v624_v42  ;;  %v705_v47 = vpop.f32.mrf.mxu0 }
  0xd8   : > { %v737_v43 = vadd.f32 %v736_v40, %v702_v37  ;;  %v808_v37 = vpop.permute.xlu1 %807 }
  0xd9   : > { %v706_v50 = vadd.f32 %v705_v47, %v667_v46 }
  0xda   : > { %v751_v49 = vmul.f32 %v748_v44, %v737_v43  ;;  %vm745_vm3 = vcmp.ge.f32.partialorder %v737_v43, 0.0 }
  0xdc   : > { %v755_v55 = vsel %vm745_vm3, %v737_v43, %v751_v49  ;;  %v850_v45 = vpop.permute.xlu0 %849 }
  0xdd   : > { %v766_v58 = vadd.f32 %v765_v56, %v755_v55  ;;  %v989_v56 = vld [vmem:[%s4496_s6 + $0x18] sm:$0xff] }
  0xdf   : > { %v740_v52 = vpop.f32.mrf.mxu1 }
  0xe0   : > { %v741_v53 = vadd.f32 %v740_v52, %v706_v50  ;;  %v845_v41 = vpop.permute.xlu1 %844 }
  0xe2   : > { %v752_v57 = vmul.f32 %v748_v44, %v741_v53  ;;  %vm746_vm4 = vcmp.ge.f32.partialorder %v741_v53, 0.0 }
  0xe4   : > { %v756_v59 = vsel %vm746_vm4, %v741_v53, %v752_v57 }
  0xe5   : > { %v767_v60 = vadd.f32 %v766_v58, %v756_v59  ;;  %v988_v58 = vld [vmem:[%s4496_s6 + $0x10] sm:$0xff] }
  0xe7   : > { %768 = vadd.xlane.f32.xlu2 %v767_v60  ;;  %v987_v60 = vld [vmem:[%s4496_s6 + $0x8] sm:$0xff] }
 0x15a   : > { %v769_v61 = vpop.xlane.xlu2 %768 }
 0x15b   : > { %v770_v62 = vrot.slane %v769_v61, 4 }
 0x15d   : > { %v771_v63 = vadd.f32 %v770_v62, %v769_v61  ;;  %v1030_v61 = vld [vmem:[%s4497_s7 + $0x10] sm:$0xff]  ;;  %v1029_v62 = vld [vmem:[%s4497_s7 + $0x8] sm:$0xff] }
 0x15f   : > { %v772_v0 = vrot.slane %v771_v63, 2 }
 0x161   : > { %v773_v1 = vadd.f32 %v772_v0, %v771_v63  ;;  %v1035_v63 = vld [vmem:[%s4498_s8 + $0x18] sm:$0xff]  ;;  %v1028_v0 = vld [vmem:[%s4497_s7] sm:$0xff] }
 0x163   : > { %v774_v2 = vrot.slane %v773_v1, 1 }
 0x165   : > { %v775_v3 = vadd.f32 %v774_v2, %v773_v1  ;;  %v1032_v1 = vld [vmem:[%s4498_s8] sm:$0xff] }
 0x167   : > { %3477 = vpush %v775_v3 }
 0x198   : > { %s3478_s19 = spop %3477 }
 0x199   : > { %s777_s20 = smul.f32 0.00024414063, %s3478_s19  ;;  %s3674_s19 = smov 127  }
 0x19b   : > { %v778_v4 = vstv %s777_s20  ;;  %s3675_s20 = smov 1  }
 0x19c   : > { %v779_v5 = vsub.f32 %v753_v54, %v778_v4  ;;  %v780_v6 = vsub.f32 %v754_v51, %v778_v4  ;;  %v781_v7 = vsub.f32 %v755_v55, %v778_v4  ;;  %v3924_v8 = vsub.f32 %v756_v59, %v778_v4  ;;  %v855_v51 = vpop.permute.xlu1 %854  ;;  %v860_v55 = vpop.permute.xlu0 %859  ;;  %v1031_v59 = vld [vmem:[%s4497_s7 + $0x18] sm:$0xff]  ;;  %v1365_v4 = vld [vmem:[%s4500_s10 + $0x8] sm:$0xff] }
 0x19e   : > { %v783_v9 = vmul.f32 %v779_v5, %v779_v5  ;;  %v784_v10 = vmul.f32 %v780_v6, %v780_v6  ;;  %v785_v11 = vmul.f32 %v781_v7, %v781_v7  ;;  %v786_v13 = vmul.f32 %v3924_v8, %v3924_v8 }
 0x19f   : > { %v820_v39 = vmul.f32 %v803_v36, %v779_v5  ;;  %v821_v40 = vmul.f32 %v808_v37, %v780_v6  ;;  %v823_v53 = vmul.f32 %v818_v38, %v3924_v8 }
 0x1a0   : > { %v787_v12 = vadd.f32 %v784_v10, %v783_v9  ;;  %v3379_v9 = vld [vmem:[%s3840_s17 + $0x30] sm:$0xff] }
 0x1a2   : > { %v788_v14 = vadd.f32 %v787_v12, %v785_v11 }
 0x1a4   : > { %v789_v15 = vadd.f32 %v788_v14, %v786_v13  ;;  %v899_v3 = vpop.permute.xlu0 %898  ;;  %v904_v6 = vpop.permute.xlu1 %903 }
 0x1a6   : > { %790 = vadd.xlane.f32.xlu2 %v789_v15 }
 0x1ac   : > { %v933_v8 = vpop.permute.xlu0 %932  ;;  %v909_v11 = vpop.permute.xlu1 %908 }
 0x1b4   : > { %v961_v12 = vpop.permute.xlu0 %960  ;;  %v966_v14 = vpop.permute.xlu1 %965 }
 0x1bc   : > { %v971_v15 = vpop.permute.xlu0 %970 }
 0x1be   : > { %812 = vperm.xlu2 %3574, %v759_v16  }
 0x1c6   : > { %927 = vperm.xlu2 %3574, %v3364_v17   ;;  %v914_v17 = vpop.permute.xlu1 %913 }
 0x1ce   : > { %937 = vperm.xlu2 %3574, %v3366_v18   ;;  %v993_v18 = vpop.permute.xlu0 %992 }
 0x1d6   : > { %942 = vperm.xlu2 %3574, %v3367_v19   ;;  %v448_v19 = vlaneseq }
 0x1de   : > { %975 = vperm.xlu2 %3574, %v3371_v23  }
 0x219   : > { %v791_v20 = vpop.xlane.xlu2 %790 }
 0x21a   : > { %v792_v21 = vrot.slane %v791_v20, 4 }
 0x21c   : > { %v793_v22 = vadd.f32 %v792_v21, %v791_v20 }
 0x21e   : > { %v794_v24 = vrot.slane %v793_v22, 2 }
 0x220   : > { %v795_v25 = vadd.f32 %v794_v24, %v793_v22  ;;  %v3994_v22 = vand.u32 127, %v448_v19 }
 0x221   : > { %v813_v46 = vpop.permute.xlu2 %812 }
 0x222   : > { %v796_v26 = vrot.slane %v795_v25, 1  ;;  %v822_v49 = vmul.f32 %v813_v46, %v781_v7  ;;  %v1364_v7 = vld [vmem:[%s4500_s10] sm:$0xff]  ;;  %vm866_vm8 = vcmp.ge.s32.totalorder %v3994_v22, 1  ;;  %vm879_vm9 = vcmp.lt.s32.totalorder %v3994_v22, 127 }
 0x224   : > { %v797_v27 = vadd.f32 %v796_v26, %v795_v25 }
 0x226   : > { %3479 = vpush %v797_v27 }
 0x229   : > { %v928_v2 = vpop.permute.xlu2 %927 }
 0x231   : > { %v938_v5 = vpop.permute.xlu2 %937 }
 0x239   : > { %v943_v10 = vpop.permute.xlu2 %942 }
 0x241   : > { %v976_v13 = vpop.permute.xlu2 %975 }
 0x257   : > { %s3480_s15 = spop %3479 }
 0x258   : > { %s799_s16 = smul.f32 0.00024414063, %s3480_s15  ;;  %s3372_s15 = sld [smem:[#allocation2 + $0x1]] }
 0x25a   : > { %s824_s18 = sadd.f32 1e-07, %s799_s16 }
 0x25c   : > { %v825_v28 = vstv %s824_s18 }
 0x25d   : > { %3575 = vrsqrt.f32 %v825_v28  ;;  %vm832_vm6 = vweird.f32 %v825_v28 }
 0x263   : > { %v3576_v29 = vpop.eup %3575 }
 0x264   : > { %v827_v30 = vmul.f32 %v3576_v29, %v825_v28  ;;  %vm833_vm5 = vweird.f32 %v3576_v29 }
 0x265   : > { %vm834_vm7 = vmor %vm832_vm6, %vm833_vm5 }
 0x266   : > { %v828_v31 = vmul.f32 %v3576_v29, %v827_v30 }
 0x268   : > { %v829_v32 = vmul.f32 0.5, %v828_v31 }
 0x26a   : > { %v830_v33 = vsub.f32 1.5, %v829_v32 }
 0x26c   : > { %v831_v34 = vmul.f32 %v3576_v29, %v830_v33 }
 0x26e   : > { %v835_v35 = vsel %vm834_vm7, %v3576_v29, %v831_v34 }
 0x26f   : > { %3481 = vpush %v835_v35 }
 0x2a0   : > { %s3482_s0 = spop %3481 }
 0x2a1   : > { %v837_v42 = vstv %s3482_s0 }
 0x2a2   : > { %v838_v43 = vmul.f32 %v837_v42, %v820_v39  ;;  %v839_v44 = vmul.f32 %v837_v42, %v821_v40  ;;  %v840_v50 = vmul.f32 %v837_v42, %v822_v49  ;;  %v841_v54 = vmul.f32 %v837_v42, %v823_v53 }
 0x2a4   : > { %v3943_v47 = vadd.f32 %v850_v45, %v839_v44  ;;  %v3945_v48 = vadd.f32 %v845_v41, %v838_v43  ;;  %v3950_v52 = vadd.f32 %v855_v51, %v840_v50  ;;  %v3959_v57 = vadd.f32 %v860_v55, %v841_v54 }
 0x2a6   : > { %882 = vrot.lane.b32.xlu0 %v3943_v47, %s3674_s19  ;;  %869 = vrot.lane.b32.xlu2 %v3943_v47, %s3675_s20  ;;  %v945_v29 = vmul.f32 %v928_v2, %v3945_v48  ;;  %v947_v35 = vmul.f32 %v938_v5, %v3950_v52  ;;  %v948_v41 = vmul.f32 %v943_v10, %v3959_v57 }
 0x2a7   : > { %867 = vrot.lane.b32.xlu1 %v3945_v48, %s3675_s20  ;;  %v946_v50 = vmul.f32 %v933_v8, %v3943_v47 }
 0x2ae   : > { %880 = vrot.lane.b32.xlu2 %v3945_v48, %s3674_s19  ;;  %884 = vrot.lane.b32.xlu0 %v3950_v52, %s3674_s19 }
 0x2af   : > { %871 = vrot.lane.b32.xlu1 %v3950_v52, %s3675_s20 }
 0x2b6   : > { %873 = vrot.lane.b32.xlu2 %v3959_v57, %s3675_s20  ;;  %1007 = vperm.xlu0 %3572, %v989_v56  }
 0x2b7   : > { %886 = vrot.lane.b32.xlu1 %v3959_v57, %s3674_s19 }
 0x2be   : > { %1002 = vperm.xlu2 %3574, %v988_v58   ;;  %1088 = vperm.xlu0 %3572, %v1031_v59   ;;  %v1019_v58 = vstv %s3372_s15  ;;  %s3677_s15 = smov 126  }
 0x2bf   : > { %997 = vperm.xlu1 %3573, %v987_v60  }
 0x2c6   : > { %1083 = vperm.xlu0 %3572, %v1030_v61  }
 0x2ce   : > { %1078 = vperm.xlu0 %3572, %v1029_v62  }
 0x2d6   : > { %1130 = vperm.xlu0 %3572, %v1035_v63  }
 0x2de   : > { %1073 = vperm.xlu0 %3572, %v1028_v0  }
 0x2e6   : > { %1115 = vperm.xlu0 %3572, %v1032_v1  }
 0x2ee   : > { %1373 = vperm.xlu0 %3572, %v1365_v4  }
 0x2f6   : > { %1368 = vperm.xlu0 %3572, %v1364_v7  }
 0x2fe   : > { %1400 = vperm.xlu0 %3572, %v3379_v9  }
 0x300   : > { %v870_v16 = vpop.permute.xlu2 %869 }
 0x301   : > { %v876_v36 = vsel %vm866_vm8, %v870_v16, 0.0 }
 0x302   : > { %v917_v44 = vmul.f32 %v904_v6, %v876_v36  ;;  %v3382_v36 = vld [vmem:[%s4493_s3 + $0x20] sm:$0xff] }
 0x304   : > { %v950_v54 = vadd.f32 %v946_v50, %v917_v44  ;;  %v3397_v44 = vld [vmem:[%s4495_s5 + $0x98] sm:$0xff] }
 0x308   : > { %v881_v20 = vpop.permute.xlu2 %880 }
 0x309   : > { %v888_v32 = vsel %vm879_vm9, %v881_v20, 0.0 }
 0x30a   : > { %v978_v38 = vmul.f32 %v961_v12, %v888_v32  ;;  %v3378_v12 = vld [vmem:[%s3840_s17 + $0x28] sm:$0xff] }
 0x310   : > { %v874_v26 = vpop.permute.xlu2 %873 }
 0x311   : > { %v878_v33 = vsel %vm866_vm8, %v874_v26, 0.0 }
 0x312   : > { %v919_v39 = vmul.f32 %v914_v17, %v878_v33  ;;  %v1034_v33 = vld [vmem:[%s4498_s8 + $0x10] sm:$0xff] }
 0x314   : > { %v952_v51 = vadd.f32 %v948_v41, %v919_v39  ;;  %v3385_v39 = vld [vmem:[%s4493_s3 + $0x38] sm:$0xff]  ;;  %v3388_v41 = vld [vmem:[%s4494_s4 + $0x30] sm:$0xff] }
 0x318   : > { %v883_v23 = vpop.permute.xlu0 %882  ;;  %v1003_v57 = vpop.permute.xlu2 %1002 }
 0x319   : > { %v868_v21 = vpop.permute.xlu1 %867  ;;  %v889_v42 = vsel %vm879_vm9, %v883_v23, 0.0 }
 0x31a   : > { %v875_v24 = vsel %vm866_vm8, %v868_v21, 0.0  ;;  %v979_v52 = vmul.f32 %v966_v14, %v889_v42  ;;  %v3394_v42 = vld [vmem:[%s4495_s5 + $0x80] sm:$0xff] }
 0x31b   : > { %v916_v27 = vmul.f32 %v899_v3, %v875_v24 }
 0x31c   : > { %v983_v60 = vadd.f32 %v979_v52, %v950_v54 }
 0x31d   : > { %v949_v34 = vadd.f32 %v945_v29, %v916_v27 }
 0x31f   : > { %v982_v45 = vadd.f32 %v978_v38, %v949_v34  ;;  %v3377_v34 = vld [vmem:[%s3840_s17 + $0x20] sm:$0xff]  ;;  %v3384_v38 = vld [vmem:[%s4493_s3 + $0x30] sm:$0xff] }
 0x320   : > { %v885_v30 = vpop.permute.xlu0 %884 }
 0x321   : > { %v872_v25 = vpop.permute.xlu1 %871  ;;  %v890_v37 = vsel %vm879_vm9, %v885_v30, 0.0  ;;  %v1010_v55 = vadd.f32 %v993_v18, %v982_v45 }
 0x322   : > { %v877_v28 = vsel %vm866_vm8, %v872_v25, 0.0  ;;  %v980_v46 = vmul.f32 %v971_v15, %v890_v37  ;;  %v3383_v37 = vld [vmem:[%s4493_s3 + $0x28] sm:$0xff] }
 0x323   : > { %v918_v31 = vmul.f32 %v909_v11, %v877_v28  ;;  %v1020_v1 = vmul.f32 %v1019_v58, %v1010_v55  ;;  %vm1014_vm10 = vcmp.ge.f32.partialorder %v1010_v55, 0.0  ;;  %v1033_v11 = vld [vmem:[%s4498_s8 + $0x8] sm:$0xff] }
 0x325   : > { %v951_v40 = vadd.f32 %v947_v35, %v918_v31  ;;  %v1024_v5 = vsel %vm1014_vm10, %v1010_v55, %v1020_v1  ;;  %v3380_v35 = vld [vmem:[%s3840_s17 + $0x38] sm:$0xff]  ;;  %vm1797_vm10 = vcmp.ge.s32.totalorder %v3994_v22, 2 }
 0x327   : > { %v984_v53 = vadd.f32 %v980_v46, %v951_v40  ;;  %v3386_v40 = vld [vmem:[%s4494_s4 + $0x20] sm:$0xff] }
 0x328   : > { %v1008_v61 = vpop.permute.xlu0 %1007 }
 0x329   : > { %v887_v43 = vpop.permute.xlu1 %886  ;;  %v1012_v59 = vadd.f32 %v1003_v57, %v984_v53 }
 0x32a   : > { %v891_v48 = vsel %vm879_vm9, %v887_v43, 0.0  ;;  %v3396_v43 = vld [vmem:[%s4495_s5 + $0x90] sm:$0xff] }
 0x32b   : > { %v981_v49 = vmul.f32 %v976_v13, %v891_v48  ;;  %v1022_v47 = vmul.f32 %v1019_v58, %v1012_v59  ;;  %vm1016_vm12 = vcmp.ge.f32.partialorder %v1012_v59, 0.0  ;;  %v3401_v48 = vld [vmem:[%s4495_s5 + $0xb8] sm:$0xff] }
 0x32d   : > { %v985_v56 = vadd.f32 %v981_v49, %v952_v51  ;;  %v1026_v7 = vsel %vm1016_vm12, %v1012_v59, %v1022_v47 }
 0x32f   : > { %v1013_v63 = vadd.f32 %v1008_v61, %v985_v56 }
 0x331   : > { %v998_v62 = vpop.permute.xlu1 %997  ;;  %v1023_v4 = vmul.f32 %v1019_v58, %v1013_v63  ;;  %vm1017_vm13 = vcmp.ge.f32.partialorder %v1013_v63, 0.0 }
 0x332   : > { %v1011_v0 = vadd.f32 %v998_v62, %v983_v60  ;;  %v1089_v62 = vpop.permute.xlu0 %1088 }
 0x333   : > { %v1027_v9 = vsel %vm1017_vm13, %v1013_v63, %v1023_v4 }
 0x334   : > { %vm1015_vm11 = vcmp.ge.f32.partialorder %v1011_v0, 0.0  ;;  %v1021_v2 = vmul.f32 %v1019_v58, %v1011_v0 }
 0x336   : > { %v1025_v3 = vsel %vm1015_vm11, %v1011_v0, %v1021_v2  ;;  %v1137_v2 = vld [vmem:[%s4499_s9] sm:$0xff]  ;;  %vm1810_vm11 = vcmp.lt.s32.totalorder %v3994_v22, 126 }
 0x337   : > { %v1036_v6 = vadd.f32 %v1025_v3, %v1024_v5 }
 0x339   : > { %v1037_v8 = vadd.f32 %v1036_v6, %v1026_v7 }
 0x33a   : > { %v1084_v63 = vpop.permute.xlu0 %1083 }
 0x33b   : > { %v1038_v10 = vadd.f32 %v1037_v8, %v1027_v9 }
 0x33d   : > { %1039 = vadd.xlane.f32.xlu1 %v1038_v10 }
 0x342   : > { %v1079_v0 = vpop.permute.xlu0 %1078 }
 0x34a   : > { %v1131_v1 = vpop.permute.xlu0 %1130 }
 0x352   : > { %v1074_v47 = vpop.permute.xlu0 %1073 }
 0x356   : > { %1120 = vperm.xlu1 %3573, %v1033_v11  }
 0x35e   : > { %1395 = vperm.xlu1 %3573, %v3378_v12  }
 0x3b0   : > { %v1040_v13 = vpop.xlane.xlu1 %1039 }
 0x3b1   : > { %v1041_v14 = vrot.slane %v1040_v13, 4 }
 0x3b3   : > { %v1042_v15 = vadd.f32 %v1041_v14, %v1040_v13  ;;  %v1116_v13 = vpop.permute.xlu0 %1115 }
 0x3b5   : > { %v1043_v16 = vrot.slane %v1042_v15, 2 }
 0x3b7   : > { %v1044_v17 = vadd.f32 %v1043_v16, %v1042_v15 }
 0x3b9   : > { %v1045_v18 = vrot.slane %v1044_v17, 1 }
 0x3bb   : > { %v1046_v19 = vadd.f32 %v1045_v18, %v1044_v17 }
 0x3bd   : > { %3483 = vpush %v1046_v19 }
 0x3c8   : > { %v1121_v18 = vpop.permute.xlu1 %1120 }
 0x3ee   : > { %s3484_s11 = spop %3483 }
 0x3ef   : > { %s1048_s18 = smul.f32 0.00024414063, %s3484_s11 }
 0x3f1   : > { %v1049_v20 = vstv %s1048_s18 }
 0x3f2   : > { %v4014_v21 = vsub.f32 %v1024_v5, %v1049_v20  ;;  %v4016_v23 = vsub.f32 %v1025_v3, %v1049_v20  ;;  %v4018_v24 = vsub.f32 %v1026_v7, %v1049_v20  ;;  %v4020_v25 = vsub.f32 %v1027_v9, %v1049_v20  ;;  %v1138_v5 = vld [vmem:[%s4499_s9 + $0x8] sm:$0xff] }
 0x3f3   : > { %v1141_v3 = vsel %vm1139_vm2, %v1137_v2, 0  ;;  %v1144_v11 = vsel %vm1139_vm2, %v1138_v5, 0 }
 0x3f4   : > { %v1054_v26 = vmul.f32 %v4014_v21, %v4014_v21  ;;  %v1055_v27 = vmul.f32 %v4016_v23, %v4016_v23  ;;  %v1056_v28 = vmul.f32 %v4018_v24, %v4018_v24  ;;  %v1057_v30 = vmul.f32 %v4020_v25, %v4020_v25 }
 0x3f5   : > { %v4069_v4 = vand.u32 4294901760, %v1141_v3  ;;  %v1091_v6 = vmul.f32 %v1074_v47, %v4014_v21  ;;  %v1092_v8 = vmul.f32 %v1079_v0, %v4016_v23  ;;  %v1093_v9 = vmul.f32 %v1084_v63, %v4018_v24 }
 0x3f6   : > { %v1058_v29 = vadd.f32 %v1055_v27, %v1054_v26  ;;  %v1094_v10 = vmul.f32 %v1089_v62, %v4020_v25  ;;  %v1174_v21 = vand.u32 4294901760, %v1144_v11  ;;  %v3373_v62 = vld [vmem:[%s4492_s2 + $0x20] sm:$0xff] }
 0x3f7   : > { %v4076_v7 = vsub.f32 %v1141_v3, %v4069_v4  ;;  %v1409_v47 = vsel %vm478_vm0, %v3373_v62, 0 }
 0x3f8   : > { %v1059_v31 = vadd.f32 %v1058_v29, %v1056_v28  ;;  %v4096_v5 = vand.u32 4294901760, %v1409_v47 }
 0x3f9   : > { %v1168_v20 = vand.u32 4294901760, %v4076_v7 }
 0x3fa   : > { %v1060_v32 = vadd.f32 %v1059_v31, %v1057_v30 }
 0x3fb   : > { %v1169_v31 = vsub.f32 %v4076_v7, %v1168_v20 }
 0x3fc   : > { %1061 = vadd.xlane.f32.xlu2 %v1060_v32  ;;  %v1175_v32 = vsub.f32 %v1144_v11, %v1174_v21  ;;  %v3587_v11 = vld [vmem:[%s3834_s29] sm:$0xff] }
 0x414   : > { %1125 = vperm.xlu2 %3574, %v1034_v33  }
 0x41c   : > { %1390 = vperm.xlu2 %3574, %v3377_v34  }
 0x424   : > { %1405 = vperm.xlu2 %3574, %v3380_v35  }
 0x42c   : > { %1733 = vperm.xlu2 %3574, %v3382_v36  }
 0x434   : > { %1738 = vperm.xlu2 %3574, %v3383_v37  }
 0x43c   : > { %1743 = vperm.xlu2 %3574, %v3384_v38  }
 0x444   : > { %1748 = vperm.xlu2 %3574, %v3385_v39  }
 0x44c   : > { %1775 = vperm.xlu2 %3574, %v3386_v40   ;;  %v1170_v40 = vand.u32 4294901760, %v1169_v31 }
 0x454   : > { %1785 = vperm.xlu2 %3574, %v3388_v41   ;;  %v1176_v41 = vand.u32 4294901760, %v1175_v32 }
 0x45c   : > { %1859 = vperm.xlu2 %3574, %v3394_v42  }
 0x464   : > { %1869 = vperm.xlu2 %3574, %v3396_v43  }
 0x46c   : > { %1874 = vperm.xlu2 %3574, %v3397_v44  }
 0x46f   : > { %v1062_v45 = vpop.xlane.xlu2 %1061 }
 0x470   : > { %v1063_v46 = vrot.slane %v1062_v45, 4 }
 0x472   : > { %v1064_v49 = vadd.f32 %v1063_v46, %v1062_v45 }
 0x474   : > { %v1065_v50 = vrot.slane %v1064_v49, 2  ;;  %1907 = vperm.xlu2 %3574, %v3401_v48   ;;  %v1177_v48 = vsub.f32 %v1175_v32, %v1176_v41 }
 0x476   : > { %v1066_v51 = vadd.f32 %v1065_v50, %v1064_v49 }
 0x477   : > { %v1126_v19 = vpop.permute.xlu2 %1125 }
 0x478   : > { %v1067_v52 = vrot.slane %v1066_v51, 1 }
 0x47a   : > { %v1068_v53 = vadd.f32 %v1067_v52, %v1066_v51  ;;  %v1178_v52 = vand.u32 4294901760, %v1177_v48 }
 0x47c   : > { %3485 = vpush %v1068_v53 }
 0x4ad   : > { %s3486_s20 = spop %3485 }
 0x4ae   : > { %s1070_s19 = smul.f32 0.00024414063, %s3486_s20 }
 0x4b0   : > { %s1095_s28 = sadd.f32 1e-07, %s1070_s19 }
 0x4b2   : > { %v1096_v54 = vstv %s1095_s28  ;;  %s3676_s28 = smov 2  }
 0x4b3   : > { %3577 = vrsqrt.f32 %v1096_v54  ;;  %vm1103_vm15 = vweird.f32 %v1096_v54 }
 0x4b9   : > { %v3578_v55 = vpop.eup %3577 }
 0x4ba   : > { %v1098_v56 = vmul.f32 %v3578_v55, %v1096_v54  ;;  %vm1104_vm14 = vweird.f32 %v3578_v55 }
 0x4bb   : > { %vm1105_vm1 = vmor %vm1103_vm15, %vm1104_vm14 }
 0x4bc   : > { %v1099_v57 = vmul.f32 %v3578_v55, %v1098_v56 }
 0x4be   : > { %v1100_v58 = vmul.f32 0.5, %v1099_v57 }
 0x4c0   : > { %v1101_v59 = vsub.f32 1.5, %v1100_v58 }
 0x4c2   : > { %v1102_v60 = vmul.f32 %v3578_v55, %v1101_v59  ;;  %v1374_v59 = vpop.permute.xlu0 %1373 }
 0x4c4   : > { %v1106_v61 = vsel %vm1105_vm1, %v3578_v55, %v1102_v60 }
 0x4c5   : > { %3487 = vpush %v1106_v61 }
 0x4f6   : > { %s3488_s18 = spop %3487 }
 0x4f7   : > { %v1108_v12 = vstv %s3488_s18 }
 0x4f8   : > { %v1109_v14 = vmul.f32 %v1108_v12, %v1091_v6  ;;  %v1110_v15 = vmul.f32 %v1108_v12, %v1092_v8  ;;  %v1111_v16 = vmul.f32 %v1108_v12, %v1093_v9  ;;  %v1112_v17 = vmul.f32 %v1108_v12, %v1094_v10  ;;  %v3374_v8 = vld [vmem:[%s4492_s2 + $0x28] sm:$0xff]  ;;  %v1369_v9 = vpop.permute.xlu0 %1368 }
 0x4fa   : > { %v1133_v26 = vadd.f32 %v1116_v13, %v1109_v14  ;;  %v1134_v23 = vadd.f32 %v1121_v18, %v1110_v15  ;;  %v1135_v27 = vadd.f32 %v1126_v19, %v1111_v16  ;;  %v1136_v24 = vadd.f32 %v1131_v1, %v1112_v17 }
 0x4fb   : > { %v1439_v15 = vsub.f32 %v1409_v47, %v4096_v5  ;;  %v1412_v18 = vsel %vm478_vm0, %v3374_v8, 0  ;;  %v1391_v8 = vpop.permute.xlu2 %1390 }
 0x4fc   : > { %v1158_v28 = vand.u32 4294901760, %v1136_v24  ;;  %v1160_v25 = vand.u32 4294901760, %v1135_v27  ;;  %v1162_v29 = vand.u32 4294901760, %v1134_v23  ;;  %v1164_v30 = vand.u32 4294901760, %v1133_v26 }
 0x4fe   : > { %1159 = vmatpush.msra.mxu2 %v1158_v28  ;;  %1346 = vmatpush.msra.mxu1 %v1158_v28  ;;  %v1196_v33 = vsub.f32 %v1136_v24, %v1158_v28  ;;  %v1202_v34 = vsub.f32 %v1135_v27, %v1160_v25  ;;  %v1208_v35 = vsub.f32 %v1134_v23, %v1162_v29  ;;  %v3375_v24 = vld [vmem:[%s4492_s2 + $0x30] sm:$0xff] }
 0x4ff   : > { %v1214_v36 = vsub.f32 %v1133_v26, %v1164_v30  ;;  %v4106_v26 = vand.u32 4294901760, %v1412_v18 }
 0x500   : > { %1161 = vmatpush.msra.mxu2 %v1160_v25  ;;  %1348 = vmatpush.msra.mxu1 %v1160_v25  ;;  %v1197_v37 = vand.u32 4294901760, %v1196_v33  ;;  %v1203_v38 = vand.u32 4294901760, %v1202_v34  ;;  %v1209_v39 = vand.u32 4294901760, %v1208_v35 }
 0x501   : > { %v1215_v44 = vand.u32 4294901760, %v1214_v36 }
 0x502   : > { %1163 = vmatpush.msra.mxu2 %v1162_v29  ;;  %1311 = vmatpush.msra.mxu0 %v1197_v37  ;;  %v1198_v42 = vsub.f32 %v1196_v33, %v1197_v37  ;;  %v1204_v43 = vsub.f32 %v1202_v34, %v1203_v38  ;;  %v1210_v46 = vsub.f32 %v1208_v35, %v1209_v39 }
 0x503   : > { %1350 = vmatpush.msra.mxu1 %v1162_v29  ;;  %v1216_v50 = vsub.f32 %v1214_v36, %v1215_v44 }
 0x504   : > { %1165 = vmatpush.msra.mxu2 %v1164_v30  ;;  %1315 = vmatpush.msra.mxu0 %v1203_v38  ;;  %v1199_v45 = vand.u32 4294901760, %v1198_v42  ;;  %v1205_v49 = vand.u32 4294901760, %v1204_v43  ;;  %v1211_v51 = vand.u32 4294901760, %v1210_v46 }
 0x505   : > { %1352 = vmatpush.msra.mxu1 %v1164_v30  ;;  %1171 = vmatmul.f32.vlgmr.msra.gmra.mxu2 %v1170_v40  ;;  %v1217_v53 = vand.u32 4294901760, %v1216_v50  ;;  %v3376_v40 = vld [vmem:[%s4492_s2 + $0x38] sm:$0xff] }
 0x506   : > { %1242 = vmatpush.msrb.mxu2 %v1196_v33  ;;  %1200 = vmatpush.msra.mxu3 %v1199_v45  ;;  %v1415_v33 = vsel %vm478_vm0, %v3375_v24, 0  ;;  %v1418_v46 = vsel %vm478_vm0, %v3376_v40, 0  ;;  %v1406_v24 = vpop.permute.xlu2 %1405 }
 0x507   : > { %1319 = vmatpush.msra.mxu0 %v1209_v39  ;;  %1354 = vmatmul.f32.vlgmr.msra.gmra.mxu1 %v4069_v4  ;;  %v1454_v37 = vand.u32 4294901760, %v1415_v33 }
 0x508   : > { %1245 = vmatpush.msrb.mxu2 %v1202_v34  ;;  %1206 = vmatpush.msra.mxu3 %v1205_v49 }
 0x509   : > { %1323 = vmatpush.msra.mxu0 %v1215_v44  ;;  %v1455_v43 = vsub.f32 %v1415_v33, %v1454_v37 }
 0x50a   : > { %1248 = vmatpush.msrb.mxu2 %v1208_v35  ;;  %1212 = vmatpush.msra.mxu3 %v1211_v51  ;;  %v1462_v51 = vand.u32 4294901760, %v1418_v46 }
 0x50b   : > { %1325 = vmatmul.f32.vlgmr.msra.gmra.mxu0 %v4069_v4  ;;  %v1456_v50 = vand.u32 4294901760, %v1455_v43 }
 0x50c   : > { %1251 = vmatpush.msrb.mxu2 %v1214_v36  ;;  %1218 = vmatpush.msra.mxu3 %v1217_v53 }
 0x50d   : > { %1179 = vmatmul.f32.gmra.mxu2 %v1178_v52  ;;  %1220 = vmatmul.f32.vlgmr.msra.gmra.mxu3 %v4069_v4  ;;  %v1457_v53 = vsub.f32 %v1455_v43, %v1456_v50 }
 0x50e   : > { %1276 = vmatpush.msrb.mxu3 %v1158_v28  ;;  %v3588_v28 = vld [vmem:[%s3834_s29 + $0x8] sm:$0xff] }
 0x50f   : > { %1358 = vmatmul.f32.gmra.mxu1 %v1174_v21 }
 0x510   : > { %1278 = vmatpush.msrb.mxu3 %v1160_v25 }
 0x512   : > { %1280 = vmatpush.msrb.mxu3 %v1162_v29 }
 0x513   : > { %1329 = vmatmul.f32.gmra.mxu0 %v1174_v21 }
 0x514   : > { %1282 = vmatpush.msrb.mxu3 %v1164_v30  ;;  %v1447_v30 = vsub.f32 %v1412_v18, %v4106_v26 }
 0x515   : > { %1224 = vmatmul.f32.gmra.mxu3 %v1174_v21  ;;  %1254 = vmatmul.f32.vlgmr.msrb.gmra.mxu2 %v4076_v7  ;;  %v1440_v21 = vand.u32 4294901760, %v1439_v15 }
 0x516   : > { %v1448_v36 = vand.u32 4294901760, %v1447_v30 }
 0x517   : > { %v1441_v29 = vsub.f32 %v1439_v15, %v1440_v21 }
 0x518   : > { %v1449_v42 = vsub.f32 %v1447_v30, %v1448_v36 }
 0x519   : > { %v1442_v35 = vand.u32 4294901760, %v1441_v29 }
 0x51a   : > { %v1450_v49 = vand.u32 4294901760, %v1449_v42 }
 0x51d   : > { %1259 = vmatmul.f32.gmra.mxu2 %v1175_v32  ;;  %1286 = vmatmul.f32.vlgmr.msrb.gmra.mxu3 %v1168_v20 }
 0x525   : > { %1292 = vmatmul.f32.gmra.mxu3 %v1176_v41 }
 0x584   : > { %v1355_v1 = vpop.f32.mrf.mxu1 }
 0x588   : > { %v1172_v54 = vpop.f32.mrf.mxu2  ;;  %v1326_v61 = vpop.f32.mrf.mxu0 }
 0x58c   : > { %v1359_v19 = vpop.f32.mrf.mxu1 }
 0x590   : > { %v1180_v55 = vpop.f32.mrf.mxu2  ;;  %v1221_v56 = vpop.f32.mrf.mxu3 }
 0x591   : > { %v1222_v60 = vadd.f32 %v1221_v56, %v1172_v54  ;;  %v1330_v14 = vpop.f32.mrf.mxu0  ;;  %v1463_v54 = vsub.f32 %v1418_v46, %v1462_v51 }
 0x593   : > { %v1464_v56 = vand.u32 4294901760, %v1463_v54 }
 0x598   : > { %v1225_v57 = vpop.f32.mrf.mxu3  ;;  %v1255_v58 = vpop.f32.mrf.mxu2 }
 0x599   : > { %v1256_v63 = vadd.f32 %v1255_v58, %v1222_v60  ;;  %v1226_v6 = vadd.f32 %v1225_v57, %v1180_v55  ;;  %v1458_v55 = vand.u32 4294901760, %v1457_v53  ;;  %v1465_v57 = vsub.f32 %v1463_v54, %v1464_v56 }
 0x59b   : > { %v1466_v58 = vand.u32 4294901760, %v1465_v57 }
 0x5a0   : > { %v1287_v0 = vpop.f32.mrf.mxu3  ;;  %v1260_v4 = vpop.f32.mrf.mxu2 }
 0x5a1   : > { %v1288_v2 = vadd.f32 %v1287_v0, %v1256_v63  ;;  %v1261_v10 = vadd.f32 %v1260_v4, %v1226_v6 }
 0x5a3   : > { %v1327_v3 = vadd.f32 %v1326_v61, %v1288_v2 }
 0x5a5   : > { %v1356_v7 = vadd.f32 %v1355_v1, %v1327_v3 }
 0x5a7   : > { %v1362_v12 = vadd.f32 %v3587_v11, %v1356_v7 }
 0x5a8   : > { %v1293_v13 = vpop.f32.mrf.mxu3 }
 0x5a9   : > { %v4103_v16 = vadd.f32 %v1369_v9, %v1362_v12  ;;  %v1294_v17 = vadd.f32 %v1293_v13, %v1261_v10  ;;  %v1401_v12 = vpop.permute.xlu0 %1400 }
 0x5ab   : > { %v1331_v20 = vadd.f32 %v1330_v14, %v1294_v17  ;;  %v1436_v27 = vand.u32 4294901760, %v4103_v16 }
 0x5ad   : > { %v1360_v23 = vadd.f32 %v1359_v19, %v1331_v20  ;;  %v1492_v32 = vsub.f32 %v4103_v16, %v1436_v27 }
 0x5af   : > { %v1363_v25 = vadd.f32 %v3588_v28, %v1360_v23  ;;  %v1493_v39 = vand.u32 4294901760, %v1492_v32 }
 0x5b1   : > { %v4114_v31 = vadd.f32 %v1374_v59, %v1363_v25  ;;  %v1494_v45 = vsub.f32 %v1492_v32, %v1493_v39 }
 0x5b3   : > { %v1434_v34 = vand.u32 4294901760, %v4114_v31  ;;  %v1495_v52 = vand.u32 4294901760, %v1494_v45 }
 0x5b5   : > { %1435 = vmatpush.msra.mxu2 %v1434_v34  ;;  %1570 = vmatpush.msrb.mxu1 %v1434_v34  ;;  %v1486_v38 = vsub.f32 %v4114_v31, %v1434_v34 }
 0x5b7   : > { %1437 = vmatpush.msra.mxu2 %v1436_v27  ;;  %1530 = vmatpush.msrb.mxu0 %v1486_v38  ;;  %v1487_v41 = vand.u32 4294901760, %v1486_v38 }
 0x5b8   : > { %1572 = vmatpush.msrb.mxu1 %v1436_v27  ;;  %1443 = vmatmul.f32.vlgmr.msra.gmra.mxu2 %v1442_v35 }
 0x5b9   : > { %1533 = vmatpush.msrb.mxu0 %v1492_v32  ;;  %1615 = vmatpush.msrb.mxu2 %v1487_v41  ;;  %v1488_v44 = vsub.f32 %v1486_v38, %v1487_v41 }
 0x5ba   : > { %1536 = vmatmul.f32.vlgmr.msrb.gmra.mxu0 %v1439_v15  ;;  %1576 = vmatmul.f32.vlgmr.msrb.gmra.mxu1 %v1440_v21 }
 0x5bb   : > { %1619 = vmatpush.msrb.mxu2 %v1493_v39  ;;  %v1489_v48 = vand.u32 4294901760, %v1488_v44  ;;  %v1677_v44 = vstv %s3381_s1 }
 0x5bd   : > { %1490 = vmatpush.msra.mxu3 %v1489_v48 }
 0x5bf   : > { %1496 = vmatpush.msra.mxu3 %v1495_v52 }
 0x5c0   : > { %1451 = vmatmul.f32.gmra.mxu2 %v1450_v49  ;;  %1498 = vmatmul.f32.vlgmr.msra.gmra.mxu3 %v4096_v5 }
 0x5c1   : > { %1652 = vmatpush.msrb.mxu3 %v1434_v34 }
 0x5c2   : > { %1541 = vmatmul.f32.gmra.mxu0 %v1447_v30  ;;  %1582 = vmatmul.f32.gmra.mxu1 %v1448_v36 }
 0x5c3   : > { %1654 = vmatpush.msrb.mxu3 %v1436_v27 }
 0x5c8   : > { %1459 = vmatmul.f32.gmra.mxu2 %v1458_v55  ;;  %1502 = vmatmul.f32.gmra.mxu3 %v4106_v26 }
 0x5ca   : > { %1546 = vmatmul.f32.gmra.mxu0 %v1455_v43  ;;  %1588 = vmatmul.f32.gmra.mxu1 %v1456_v50 }
 0x5d0   : > { %1467 = vmatmul.f32.gmra.mxu2 %v1466_v58  ;;  %1506 = vmatmul.f32.gmra.mxu3 %v1454_v37 }
 0x5d2   : > { %1551 = vmatmul.f32.gmra.mxu0 %v1463_v54  ;;  %1594 = vmatmul.f32.gmra.mxu1 %v1464_v56 }
 0x5d8   : > { %1510 = vmatmul.f32.gmra.mxu3 %v1462_v51  ;;  %1621 = vmatmul.f32.vlgmr.msrb.gmra.mxu2 %v4096_v5 }
 0x5e0   : > { %1625 = vmatmul.f32.gmra.mxu2 %v4106_v26  ;;  %1656 = vmatmul.f32.vlgmr.msrb.gmra.mxu3 %v4096_v5  ;;  %v1396_v5 = vpop.permute.xlu1 %1395 }
 0x5e8   : > { %1629 = vmatmul.f32.gmra.mxu2 %v1454_v37  ;;  %1660 = vmatmul.f32.gmra.mxu3 %v4106_v26 }
 0x5f0   : > { %1633 = vmatmul.f32.gmra.mxu2 %v1462_v51  ;;  %1664 = vmatmul.f32.gmra.mxu3 %v1454_v37 }
 0x5f8   : > { %1668 = vmatmul.f32.gmra.mxu3 %v1462_v51 }
 0x637   : > { %v1537_v0 = vpop.f32.mrf.mxu0  ;;  %v1577_v47 = vpop.f32.mrf.mxu1 }
 0x63b   : > { %v1444_v59 = vpop.f32.mrf.mxu2 }
 0x63c   : > { %v1445_v13 = vadd.f32 %v1444_v59, %v1391_v8 }
 0x63f   : > { %v1542_v6 = vpop.f32.mrf.mxu0  ;;  %v1583_v7 = vpop.f32.mrf.mxu1 }
 0x643   : > { %v1452_v60 = vpop.f32.mrf.mxu2  ;;  %v1499_v61 = vpop.f32.mrf.mxu3 }
 0x644   : > { %v1453_v11 = vadd.f32 %v1452_v60, %v1396_v5  ;;  %v1500_v18 = vadd.f32 %v1499_v61, %v1445_v13 }
 0x646   : > { %v1538_v23 = vadd.f32 %v1537_v0, %v1500_v18  ;;  %v3392_v0 = vld [vmem:[%s4495_s5 + $0x70] sm:$0xff] }
 0x647   : > { %v1547_v17 = vpop.f32.mrf.mxu0  ;;  %v1589_v21 = vpop.f32.mrf.mxu1 }
 0x648   : > { %v1578_v30 = vadd.f32 %v1577_v47, %v1538_v23  ;;  %v3390_v23 = vld [vmem:[%s4495_s5 + $0x60] sm:$0xff] }
 0x64b   : > { %v1460_v62 = vpop.f32.mrf.mxu2  ;;  %v1503_v63 = vpop.f32.mrf.mxu3 }
 0x64c   : > { %v1461_v14 = vadd.f32 %v1460_v62, %v1401_v12  ;;  %v1504_v15 = vadd.f32 %v1503_v63, %v1453_v11  ;;  %v3387_v62 = vld [vmem:[%s4494_s4 + $0x28] sm:$0xff] }
 0x64d   : > { %v3391_v63 = vld [vmem:[%s4495_s5 + $0x68] sm:$0xff] }
 0x64e   : > { %v1543_v20 = vadd.f32 %v1542_v6, %v1504_v15 }
 0x64f   : > { %v1552_v35 = vpop.f32.mrf.mxu0  ;;  %v1595_v43 = vpop.f32.mrf.mxu1 }
 0x650   : > { %v1584_v25 = vadd.f32 %v1583_v7, %v1543_v20 }
 0x653   : > { %v1468_v1 = vpop.f32.mrf.mxu2  ;;  %v1507_v2 = vpop.f32.mrf.mxu3 }
 0x654   : > { %v1508_v19 = vadd.f32 %v1507_v2, %v1461_v14  ;;  %v1469_v29 = vadd.f32 %v1468_v1, %v1406_v24  ;;  %v3399_v1 = vld [vmem:[%s4495_s5 + $0xa8] sm:$0xff]  ;;  %v3393_v2 = vld [vmem:[%s4495_s5 + $0x78] sm:$0xff]  ;;  %v3398_v24 = vld [vmem:[%s4495_s5 + $0xa0] sm:$0xff] }
 0x656   : > { %v1548_v27 = vadd.f32 %v1547_v17, %v1508_v19 }
 0x658   : > { %v1590_v32 = vadd.f32 %v1589_v21, %v1548_v27  ;;  %v3395_v27 = vld [vmem:[%s4495_s5 + $0x88] sm:$0xff] }
 0x65b   : > { %v1511_v3 = vpop.f32.mrf.mxu3  ;;  %v1622_v4 = vpop.f32.mrf.mxu2 }
 0x65c   : > { %v1512_v33 = vadd.f32 %v1511_v3, %v1469_v29  ;;  %v1623_v36 = vadd.f32 %v1622_v4, %v1578_v30 }
 0x65e   : > { %v1553_v40 = vadd.f32 %v1552_v35, %v1512_v33 }
 0x660   : > { %v1596_v48 = vadd.f32 %v1595_v43, %v1553_v40 }
 0x663   : > { %v1626_v9 = vpop.f32.mrf.mxu2  ;;  %v1657_v10 = vpop.f32.mrf.mxu3 }
 0x664   : > { %v1627_v34 = vadd.f32 %v1626_v9, %v1584_v25  ;;  %v1658_v41 = vadd.f32 %v1657_v10, %v1623_v36  ;;  %v3402_v25 = vld [vmem:[%s4496_s6 + $0x20] sm:$0xff] }
 0x666   : > { %v1678_v49 = vmul.f32 %v1677_v44, %v1658_v41  ;;  %vm1672_vm4 = vcmp.ge.f32.partialorder %v1658_v41, 0.0 }
 0x668   : > { %v1682_v54 = vsel %vm1672_vm4, %v1658_v41, %v1678_v49 }
 0x66b   : > { %v1661_v26 = vpop.f32.mrf.mxu3  ;;  %v1630_v28 = vpop.f32.mrf.mxu2 }
 0x66c   : > { %v1631_v37 = vadd.f32 %v1630_v28, %v1590_v32  ;;  %v1662_v38 = vadd.f32 %v1661_v26, %v1627_v34  ;;  %v3389_v26 = vld [vmem:[%s4494_s4 + $0x38] sm:$0xff]  ;;  %v3400_v28 = vld [vmem:[%s4495_s5 + $0xb0] sm:$0xff] }
 0x66e   : > { %v1679_v45 = vmul.f32 %v1677_v44, %v1662_v38  ;;  %vm1673_vm3 = vcmp.ge.f32.partialorder %v1662_v38, 0.0 }
 0x670   : > { %v1683_v51 = vsel %vm1673_vm3, %v1662_v38, %v1679_v45  ;;  %v1734_v45 = vpop.permute.xlu2 %1733 }
 0x671   : > { %v1696_v57 = vadd.f32 %v1683_v51, %v1682_v54 }
 0x673   : > { %v1665_v39 = vpop.f32.mrf.mxu3  ;;  %v1634_v46 = vpop.f32.mrf.mxu2 }
 0x674   : > { %v1666_v42 = vadd.f32 %v1665_v39, %v1631_v37  ;;  %v1635_v52 = vadd.f32 %v1634_v46, %v1596_v48 }
 0x676   : > { %v1680_v50 = vmul.f32 %v1677_v44, %v1666_v42  ;;  %vm1674_vm5 = vcmp.ge.f32.partialorder %v1666_v42, 0.0 }
 0x678   : > { %v1684_v56 = vsel %vm1674_vm5, %v1666_v42, %v1680_v50  ;;  %v1739_v46 = vpop.permute.xlu2 %1738 }
 0x679   : > { %v1697_v59 = vadd.f32 %v1696_v57, %v1684_v56 }
 0x67b   : > { %v1669_v53 = vpop.f32.mrf.mxu3 }
 0x67c   : > { %v1670_v55 = vadd.f32 %v1669_v53, %v1635_v52 }
 0x67e   : > { %v1681_v58 = vmul.f32 %v1677_v44, %v1670_v55  ;;  %vm1675_vm6 = vcmp.ge.f32.partialorder %v1670_v55, 0.0 }
 0x680   : > { %v1685_v60 = vsel %vm1675_vm6, %v1670_v55, %v1681_v58  ;;  %v1744_v48 = vpop.permute.xlu2 %1743 }
 0x681   : > { %v1698_v61 = vadd.f32 %v1697_v59, %v1685_v60 }
 0x683   : > { %1699 = vadd.xlane.f32.xlu1 %v1698_v61 }
 0x688   : > { %v1749_v49 = vpop.permute.xlu2 %1748 }
 0x690   : > { %v1776_v50 = vpop.permute.xlu2 %1775 }
 0x698   : > { %v1786_v58 = vpop.permute.xlu2 %1785 }
 0x69c   : > { %1780 = vperm.xlu1 %3573, %v3387_v62  }
 0x6a4   : > { %1835 = vperm.xlu1 %3573, %v3391_v63  }
 0x6ac   : > { %1840 = vperm.xlu1 %3573, %v3392_v0  }
 0x6b4   : > { %1897 = vperm.xlu1 %3573, %v3399_v1  }
 0x6bc   : > { %1845 = vperm.xlu1 %3573, %v3393_v2  }
 0x6f6   : > { %v1700_v47 = vpop.xlane.xlu1 %1699 }
 0x6f7   : > { %v1701_v3 = vrot.slane %v1700_v47, 4 }
 0x6f9   : > { %v1702_v4 = vadd.f32 %v1701_v3, %v1700_v47  ;;  %v3403_v47 = vld [vmem:[%s4496_s6 + $0x28] sm:$0xff]  ;;  %v3405_v3 = vld [vmem:[%s4496_s6 + $0x38] sm:$0xff] }
 0x6fb   : > { %v1703_v6 = vrot.slane %v1702_v4, 2 }
 0x6fd   : > { %v1704_v7 = vadd.f32 %v1703_v6, %v1702_v4  ;;  %v3410_v4 = vld [vmem:[%s4497_s7 + $0x38] sm:$0xff]  ;;  %v3404_v6 = vld [vmem:[%s4496_s6 + $0x30] sm:$0xff] }
 0x6ff   : > { %v1705_v5 = vrot.slane %v1704_v7, 1 }
 0x701   : > { %v1706_v8 = vadd.f32 %v1705_v5, %v1704_v7  ;;  %v3409_v7 = vld [vmem:[%s4497_s7 + $0x30] sm:$0xff]  ;;  %v3408_v5 = vld [vmem:[%s4497_s7 + $0x28] sm:$0xff] }
 0x703   : > { %3489 = vpush %v1706_v8  ;;  %v3414_v8 = vld [vmem:[%s4498_s8 + $0x38] sm:$0xff] }
 0x70e   : > { %v1781_v59 = vpop.permute.xlu1 %1780 }
 0x734   : > { %s3490_s1 = spop %3489 }
 0x735   : > { %s1708_s11 = smul.f32 0.00024414063, %s3490_s1 }
 0x737   : > { %v1709_v9 = vstv %s1708_s11 }
 0x738   : > { %v1710_v10 = vsub.f32 %v1682_v54, %v1709_v9  ;;  %v1711_v11 = vsub.f32 %v1683_v51, %v1709_v9  ;;  %v1712_v12 = vsub.f32 %v1684_v56, %v1709_v9  ;;  %v4145_v13 = vsub.f32 %v1685_v60, %v1709_v9  ;;  %v1860_v9 = vpop.permute.xlu2 %1859 }
 0x73a   : > { %v1714_v14 = vmul.f32 %v1710_v10, %v1710_v10  ;;  %v1715_v15 = vmul.f32 %v1711_v11, %v1711_v11  ;;  %v1716_v17 = vmul.f32 %v1712_v12, %v1712_v12  ;;  %v1717_v19 = vmul.f32 %v4145_v13, %v4145_v13 }
 0x73b   : > { %v1751_v51 = vmul.f32 %v1734_v45, %v1710_v10  ;;  %v1752_v52 = vmul.f32 %v1739_v46, %v1711_v11  ;;  %v1753_v53 = vmul.f32 %v1744_v48, %v1712_v12  ;;  %v1754_v63 = vmul.f32 %v1749_v49, %v4145_v13  ;;  %v3407_v10 = vld [vmem:[%s4497_s7 + $0x20] sm:$0xff] }
 0x73c   : > { %v1718_v18 = vadd.f32 %v1715_v15, %v1714_v14  ;;  %v3411_v12 = vld [vmem:[%s4498_s8 + $0x20] sm:$0xff]  ;;  %v3418_v14 = vld [vmem:[%s4500_s10 + $0x18] sm:$0xff] }
 0x73e   : > { %v1719_v20 = vadd.f32 %v1718_v18, %v1716_v17  ;;  %v1836_v17 = vpop.permute.xlu1 %1835 }
 0x740   : > { %v1720_v21 = vadd.f32 %v1719_v20, %v1717_v19  ;;  %v1870_v11 = vpop.permute.xlu2 %1869  ;;  %v3417_v19 = vld [vmem:[%s4500_s10 + $0x10] sm:$0xff] }
 0x742   : > { %1721 = vadd.xlane.f32.xlu0 %v1720_v21 }
 0x746   : > { %v1841_v21 = vpop.permute.xlu1 %1840 }
 0x748   : > { %v1875_v15 = vpop.permute.xlu2 %1874 }
 0x750   : > { %v1908_v20 = vpop.permute.xlu2 %1907 }
 0x756   : > { %1790 = vperm.xlu0 %3572, %v3389_v26   ;;  %v3425_v26 = vld [vmem:[%s3840_s17 + $0x50] sm:$0xff] }
 0x75e   : > { %1830 = vperm.xlu0 %3572, %v3390_v23  }
 0x766   : > { %1864 = vperm.xlu0 %3572, %v3395_v27  }
 0x76e   : > { %1892 = vperm.xlu0 %3572, %v3398_v24   ;;  %v1898_v24 = vpop.permute.xlu1 %1897 }
 0x776   : > { %1902 = vperm.xlu0 %3572, %v3400_v28  }
 0x77e   : > { %1925 = vperm.xlu0 %3572, %v3402_v25  }
 0x7b5   : > { %v1722_v29 = vpop.xlane.xlu0 %1721 }
 0x7b6   : > { %v1723_v30 = vrot.slane %v1722_v29, 4 }
 0x7b8   : > { %v1724_v32 = vadd.f32 %v1723_v30, %v1722_v29  ;;  %v1846_v29 = vpop.permute.xlu1 %1845 }
 0x7ba   : > { %v1725_v33 = vrot.slane %v1724_v32, 2 }
 0x7bc   : > { %v1726_v34 = vadd.f32 %v1725_v33, %v1724_v32 }
 0x7be   : > { %v1727_v35 = vrot.slane %v1726_v34, 1 }
 0x7c0   : > { %v1728_v36 = vadd.f32 %v1727_v35, %v1726_v34 }
 0x7c2   : > { %3491 = vpush %v1728_v36 }
 0x7c8   : > { %v1791_v1 = vpop.permute.xlu0 %1790 }
 0x7d0   : > { %v1831_v13 = vpop.permute.xlu0 %1830 }
 0x7d8   : > { %v1865_v18 = vpop.permute.xlu0 %1864 }
 0x7e0   : > { %v1893_v23 = vpop.permute.xlu0 %1892 }
 0x7e8   : > { %v1903_v28 = vpop.permute.xlu0 %1902 }
 0x7f0   : > { %v1926_v30 = vpop.permute.xlu0 %1925 }
 0x7f3   : > { %s3492_s0 = spop %3491 }
 0x7f4   : > { %s1730_s26 = smul.f32 0.00024414063, %s3492_s0 }
 0x7f6   : > { %s1755_s20 = sadd.f32 1e-07, %s1730_s26 }
 0x7f8   : > { %v1756_v37 = vstv %s1755_s20 }
 0x7f9   : > { %3579 = vrsqrt.f32 %v1756_v37  ;;  %vm1763_vm8 = vweird.f32 %v1756_v37 }
 0x7ff   : > { %v3580_v38 = vpop.eup %3579 }
 0x800   : > { %v1758_v39 = vmul.f32 %v3580_v38, %v1756_v37  ;;  %vm1764_vm7 = vweird.f32 %v3580_v38 }
 0x801   : > { %vm1765_vm9 = vmor %vm1763_vm8, %vm1764_vm7 }
 0x802   : > { %v1759_v40 = vmul.f32 %v3580_v38, %v1758_v39 }
 0x804   : > { %v1760_v41 = vmul.f32 0.5, %v1759_v40 }
 0x806   : > { %v1761_v42 = vsub.f32 1.5, %v1760_v41 }
 0x808   : > { %v1762_v43 = vmul.f32 %v3580_v38, %v1761_v42 }
 0x80a   : > { %v1766_v44 = vsel %vm1765_vm9, %v3580_v38, %v1762_v43 }
 0x80b   : > { %3493 = vpush %v1766_v44 }
 0x83c   : > { %s3494_s19 = spop %3493 }
 0x83d   : > { %v1768_v54 = vstv %s3494_s19  ;;  %s3427_s19 = sld [smem:[#allocation2 + $0x100]] }
 0x83e   : > { %v1769_v55 = vmul.f32 %v1768_v54, %v1751_v51  ;;  %v1770_v56 = vmul.f32 %v1768_v54, %v1752_v52  ;;  %v1771_v57 = vmul.f32 %v1768_v54, %v1753_v53  ;;  %v1772_v0 = vmul.f32 %v1768_v54, %v1754_v63 }
 0x840   : > { %v4167_v60 = vadd.f32 %v1786_v58, %v1771_v57  ;;  %v4169_v61 = vadd.f32 %v1776_v50, %v1769_v55  ;;  %v4171_v62 = vadd.f32 %v1781_v59, %v1770_v56  ;;  %v4177_v2 = vadd.f32 %v1791_v1, %v1772_v0 }
 0x842   : > { %1802 = vrot.lane.b32.xlu1 %v4167_v60, %s3676_s28  ;;  %1798 = vrot.lane.b32.xlu2 %v4169_v61, %s3676_s28  ;;  %v1877_v40 = vmul.f32 %v1860_v9, %v4169_v61  ;;  %v1879_v51 = vmul.f32 %v1870_v11, %v4167_v60  ;;  %v1878_v56 = vmul.f32 %v1865_v18, %v4171_v62 }
 0x843   : > { %1813 = vrot.lane.b32.xlu0 %v4171_v62, %s3677_s15 }
 0x84a   : > { %1817 = vrot.lane.b32.xlu1 %v4177_v2, %s3677_s15  ;;  %1800 = vrot.lane.b32.xlu2 %v4171_v62, %s3676_s28 }
 0x84b   : > { %1815 = vrot.lane.b32.xlu0 %v4167_v60, %s3677_s15 }
 0x852   : > { %1930 = vperm.xlu1 %3573, %v3403_v47   ;;  %1811 = vrot.lane.b32.xlu2 %v4169_v61, %s3677_s15  ;;  %s3406_s15 = sld [smem:[#allocation2 + $0x81]]  ;;  %v1880_v61 = vmul.f32 %v1875_v15, %v4177_v2 }
 0x853   : > { %1940 = vperm.xlu0 %3572, %v3405_v3  }
 0x858   : > { %v1952_v3 = vstv %s3406_s15 }
 0x85a   : > { %1804 = vrot.lane.b32.xlu2 %v4177_v2, %s3676_s28  ;;  %s3679_s28 = smov 4  }
 0x85b   : > { %2023 = vperm.xlu0 %3572, %v3410_v4  }
 0x862   : > { %1935 = vperm.xlu2 %3574, %v3404_v6  }
 0x863   : > { %2018 = vperm.xlu0 %3572, %v3409_v7  }
 0x86b   : > { %2013 = vperm.xlu0 %3572, %v3408_v5  }
 0x873   : > { %2065 = vperm.xlu0 %3572, %v3414_v8  }
 0x87b   : > { %2008 = vperm.xlu0 %3572, %v3407_v10  }
 0x883   : > { %2050 = vperm.xlu0 %3572, %v3411_v12  }
 0x88b   : > { %2309 = vperm.xlu0 %3572, %v3418_v14  }
 0x893   : > { %2304 = vperm.xlu0 %3572, %v3417_v19  }
 0x89b   : > { %2336 = vperm.xlu0 %3572, %v3425_v26   ;;  %v3413_v26 = vld [vmem:[%s4498_s8 + $0x30] sm:$0xff] }
 0x89c   : > { %v1799_v27 = vpop.permute.xlu2 %1798 }
 0x89d   : > { %v1806_v33 = vsel %vm1797_vm10, %v1799_v27, 0.0  ;;  %v3426_v27 = vld [vmem:[%s3840_s17 + $0x58] sm:$0xff] }
 0x89e   : > { %v1848_v37 = vmul.f32 %v1831_v13, %v1806_v33  ;;  %v3440_v33 = vld [vmem:[%s4495_s5 + $0xe0] sm:$0xff] }
 0x8a0   : > { %v1881_v43 = vadd.f32 %v1877_v40, %v1848_v37 }
 0x8a4   : > { %v1801_v25 = vpop.permute.xlu2 %1800 }
 0x8a5   : > { %v1807_v42 = vsel %vm1797_vm10, %v1801_v25, 0.0  ;;  %v3430_v25 = vld [vmem:[%s4493_s3 + $0x50] sm:$0xff] }
 0x8a6   : > { %v1849_v49 = vmul.f32 %v1836_v17, %v1807_v42 }
 0x8a8   : > { %v1882_v0 = vadd.f32 %v1878_v56, %v1849_v49 }
 0x8ac   : > { %v1812_v32 = vpop.permute.xlu2 %1811 }
 0x8ad   : > { %v1819_v36 = vsel %vm1810_vm11, %v1812_v32, 0.0  ;;  %v3435_v32 = vld [vmem:[%s4494_s4 + $0x58] sm:$0xff] }
 0x8ae   : > { %v1910_v41 = vmul.f32 %v1893_v23, %v1819_v36  ;;  %v3423_v23 = vld [vmem:[%s3840_s17 + $0x40] sm:$0xff] }
 0x8b0   : > { %v1914_v50 = vadd.f32 %v1910_v41, %v1881_v43 }
 0x8b2   : > { %v1943_v1 = vadd.f32 %v1926_v30, %v1914_v50  ;;  %v3432_v30 = vld [vmem:[%s4494_s4 + $0x40] sm:$0xff] }
 0x8b4   : > { %v1803_v34 = vpop.permute.xlu1 %1802  ;;  %v1805_v38 = vpop.permute.xlu2 %1804  ;;  %v1953_v11 = vmul.f32 %v1952_v3, %v1943_v1  ;;  %vm1947_vm12 = vcmp.ge.f32.partialorder %v1943_v1, 0.0 }
 0x8b5   : > { %v1814_v35 = vpop.permute.xlu0 %1813  ;;  %v1808_v39 = vsel %vm1797_vm10, %v1803_v34, 0.0  ;;  %v1809_v44 = vsel %vm1797_vm10, %v1805_v38, 0.0  ;;  %v3442_v34 = vld [vmem:[%s4495_s5 + $0xf0] sm:$0xff] }
 0x8b6   : > { %v1850_v45 = vmul.f32 %v1841_v21, %v1808_v39  ;;  %v1820_v46 = vsel %vm1810_vm11, %v1814_v35, 0.0  ;;  %v1851_v54 = vmul.f32 %v1846_v29, %v1809_v44  ;;  %v1957_v15 = vsel %vm1947_vm12, %v1943_v1, %v1953_v11  ;;  %v3431_v29 = vld [vmem:[%s4493_s3 + $0x58] sm:$0xff] }
 0x8b7   : > { %v1911_v57 = vmul.f32 %v1898_v24, %v1820_v46  ;;  %v3428_v24 = vld [vmem:[%s4493_s3 + $0x40] sm:$0xff]  ;;  %v3443_v35 = vld [vmem:[%s4495_s5 + $0xf8] sm:$0xff]  ;;  %vm2746_vm12 = vcmp.lt.s32.totalorder %v3994_v22, 124 }
 0x8b8   : > { %v1883_v58 = vadd.f32 %v1879_v51, %v1850_v45  ;;  %v1884_v60 = vadd.f32 %v1880_v61, %v1851_v54  ;;  %v3447_v39 = vld [vmem:[%s4495_s5 + $0x118] sm:$0xff] }
 0x8b9   : > { %v1915_v7 = vadd.f32 %v1911_v57, %v1882_v0  ;;  %v3412_v57 = vld [vmem:[%s4498_s8 + $0x28] sm:$0xff] }
 0x8bc   : > { %v1818_v48 = vpop.permute.xlu1 %1817  ;;  %v1936_v4 = vpop.permute.xlu2 %1935 }
 0x8bd   : > { %v1816_v52 = vpop.permute.xlu0 %1815  ;;  %v1822_v53 = vsel %vm1810_vm11, %v1818_v48, 0.0 }
 0x8be   : > { %v1821_v55 = vsel %vm1810_vm11, %v1816_v52, 0.0  ;;  %v1913_v63 = vmul.f32 %v1908_v20, %v1822_v53  ;;  %vm2733_vm11 = vcmp.ge.s32.totalorder %v3994_v22, 4 }
 0x8bf   : > { %v1912_v59 = vmul.f32 %v1903_v28, %v1821_v55  ;;  %v3429_v28 = vld [vmem:[%s4493_s3 + $0x48] sm:$0xff] }
 0x8c0   : > { %v1917_v5 = vadd.f32 %v1913_v63, %v1884_v60 }
 0x8c1   : > { %v1916_v47 = vadd.f32 %v1912_v59, %v1883_v58  ;;  %v3424_v58 = vld [vmem:[%s3840_s17 + $0x48] sm:$0xff] }
 0x8c3   : > { %v1945_v6 = vadd.f32 %v1936_v4, %v1916_v47 }
 0x8c4   : > { %v1931_v8 = vpop.permute.xlu1 %1930 }
 0x8c5   : > { %v1941_v9 = vpop.permute.xlu0 %1940  ;;  %v1944_v10 = vadd.f32 %v1931_v8, %v1915_v7  ;;  %v1955_v12 = vmul.f32 %v1952_v3, %v1945_v6  ;;  %vm1949_vm14 = vcmp.ge.f32.partialorder %v1945_v6, 0.0 }
 0x8c6   : > { %v1946_v62 = vadd.f32 %v1941_v9, %v1917_v5 }
 0x8c7   : > { %vm1948_vm13 = vcmp.ge.f32.partialorder %v1944_v10, 0.0  ;;  %v1954_v2 = vmul.f32 %v1952_v3, %v1944_v10  ;;  %v1959_v18 = vsel %vm1949_vm14, %v1945_v6, %v1955_v12 }
 0x8c8   : > { %v1956_v13 = vmul.f32 %v1952_v3, %v1946_v62  ;;  %vm1950_vm15 = vcmp.ge.f32.partialorder %v1946_v62, 0.0 }
 0x8c9   : > { %v1958_v14 = vsel %vm1948_vm13, %v1944_v10, %v1954_v2 }
 0x8ca   : > { %v1971_v17 = vadd.f32 %v1958_v14, %v1957_v15  ;;  %v1960_v20 = vsel %vm1950_vm15, %v1946_v62, %v1956_v13  ;;  %v3415_v13 = vld [vmem:[%s4499_s9 + $0x10] sm:$0xff] }
 0x8cc   : > { %v1972_v19 = vadd.f32 %v1971_v17, %v1959_v18 }
 0x8cd   : > { %v2024_v11 = vpop.permute.xlu0 %2023 }
 0x8ce   : > { %v1973_v21 = vadd.f32 %v1972_v19, %v1960_v20 }
 0x8d0   : > { %1974 = vadd.xlane.f32.xlu1 %v1973_v21 }
 0x8d5   : > { %v2019_v62 = vpop.permute.xlu0 %2018 }
 0x8dd   : > { %v2014_v12 = vpop.permute.xlu0 %2013 }
 0x8e5   : > { %v2066_v2 = vpop.permute.xlu0 %2065 }
 0x8e9   : > { %2060 = vperm.xlu1 %3573, %v3413_v26  }
 0x8f1   : > { %2326 = vperm.xlu1 %3573, %v3423_v23  }
 0x8f9   : > { %2341 = vperm.xlu1 %3573, %v3426_v27  }
 0x901   : > { %2669 = vperm.xlu1 %3573, %v3428_v24  }
 0x909   : > { %2674 = vperm.xlu1 %3573, %v3429_v28  }
 0x911   : > { %2679 = vperm.xlu1 %3573, %v3430_v25  }
 0x919   : > { %2684 = vperm.xlu1 %3573, %v3431_v29  }
 0x921   : > { %2711 = vperm.xlu1 %3573, %v3432_v30  }
 0x929   : > { %2726 = vperm.xlu1 %3573, %v3435_v32  }
 0x931   : > { %2795 = vperm.xlu1 %3573, %v3440_v33  }
 0x939   : > { %2805 = vperm.xlu1 %3573, %v3442_v34  }
 0x941   : > { %2810 = vperm.xlu1 %3573, %v3443_v35  }
 0x943   : > { %v1975_v36 = vpop.xlane.xlu1 %1974 }
 0x944   : > { %v1976_v37 = vrot.slane %v1975_v36, 4 }
 0x946   : > { %v1977_v38 = vadd.f32 %v1976_v37, %v1975_v36 }
 0x948   : > { %v1978_v40 = vrot.slane %v1977_v38, 2 }
 0x949   : > { %2843 = vperm.xlu1 %3573, %v3447_v39  }
 0x94a   : > { %v1979_v41 = vadd.f32 %v1978_v40, %v1977_v38 }
 0x94c   : > { %v1980_v42 = vrot.slane %v1979_v41, 1 }
 0x94e   : > { %v1981_v43 = vadd.f32 %v1980_v42, %v1979_v41 }
 0x950   : > { %3495 = vpush %v1981_v43 }
 0x95b   : > { %v2061_v33 = vpop.permute.xlu1 %2060 }
 0x981   : > { %s3496_s1 = spop %3495 }
 0x982   : > { %s1983_s11 = smul.f32 0.00024414063, %s3496_s1 }
 0x984   : > { %v1984_v44 = vstv %s1983_s11  ;;  %s3678_s11 = smov 124  }
 0x985   : > { %v1985_v45 = vsub.f32 %v1957_v15, %v1984_v44  ;;  %v1986_v46 = vsub.f32 %v1958_v14, %v1984_v44  ;;  %v1987_v48 = vsub.f32 %v1959_v18, %v1984_v44  ;;  %v1988_v49 = vsub.f32 %v1960_v20, %v1984_v44  ;;  %v2009_v14 = vpop.permute.xlu0 %2008  ;;  %v3416_v18 = vld [vmem:[%s4499_s9 + $0x18] sm:$0xff] }
 0x986   : > { %v2076_v15 = vsel %vm1139_vm2, %v3415_v13, 0  ;;  %v2079_v27 = vsel %vm1139_vm2, %v3416_v18, 0 }
 0x987   : > { %v1989_v50 = vmul.f32 %v1985_v45, %v1985_v45  ;;  %v1990_v51 = vmul.f32 %v1986_v46, %v1986_v46  ;;  %v1991_v52 = vmul.f32 %v1987_v48, %v1987_v48  ;;  %v1992_v54 = vmul.f32 %v1988_v49, %v1988_v49 }
 0x988   : > { %v4275_v17 = vand.u32 4294901760, %v2076_v15  ;;  %v2026_v19 = vmul.f32 %v2009_v14, %v1985_v45  ;;  %v2027_v21 = vmul.f32 %v2014_v12, %v1986_v46  ;;  %v2028_v26 = vmul.f32 %v2019_v62, %v1987_v48  ;;  %v3419_v12 = vld [vmem:[%s4492_s2 + $0x40] sm:$0xff] }
 0x989   : > { %v1993_v53 = vadd.f32 %v1990_v51, %v1989_v50  ;;  %v2029_v23 = vmul.f32 %v2024_v11, %v1988_v49  ;;  %v2109_v36 = vand.u32 4294901760, %v2079_v27 }
 0x98a   : > { %v4281_v20 = vsub.f32 %v2076_v15, %v4275_v17 }
 0x98b   : > { %v1994_v55 = vadd.f32 %v1993_v53, %v1991_v52  ;;  %v2110_v46 = vsub.f32 %v2079_v27, %v2109_v36 }
 0x98c   : > { %v2103_v35 = vand.u32 4294901760, %v4281_v20 }
 0x98d   : > { %v1995_v56 = vadd.f32 %v1994_v55, %v1992_v54  ;;  %v2051_v28 = vpop.permute.xlu0 %2050 }
 0x98e   : > { %v2104_v45 = vsub.f32 %v4281_v20, %v2103_v35 }
 0x98f   : > { %1996 = vadd.xlane.f32.xlu2 %v1995_v56  ;;  %v2111_v56 = vand.u32 4294901760, %v2110_v46 }
 0x990   : > { %v2105_v55 = vand.u32 4294901760, %v2104_v45 }
 0x9a7   : > { %2055 = vperm.xlu2 %3574, %v3412_v57  }
 0x9af   : > { %2331 = vperm.xlu2 %3574, %v3424_v58  }
 0xa02   : > { %v1997_v59 = vpop.xlane.xlu2 %1996 }
 0xa03   : > { %v1998_v61 = vrot.slane %v1997_v59, 4 }
 0xa05   : > { %v1999_v63 = vadd.f32 %v1998_v61, %v1997_v59 }
 0xa07   : > { %v2000_v0 = vrot.slane %v1999_v63, 2 }
 0xa09   : > { %v2001_v1 = vadd.f32 %v2000_v0, %v1999_v63  ;;  %v2112_v0 = vsub.f32 %v2110_v46, %v2111_v56 }
 0xa0a   : > { %v2056_v34 = vpop.permute.xlu2 %2055 }
 0xa0b   : > { %v2002_v47 = vrot.slane %v2001_v1, 1 }
 0xa0d   : > { %v2003_v60 = vadd.f32 %v2002_v47, %v2001_v1 }
 0xa0f   : > { %3497 = vpush %v2003_v60 }
 0xa40   : > { %s3498_s0 = spop %3497 }
 0xa41   : > { %s2005_s26 = smul.f32 0.00024414063, %s3498_s0 }
 0xa43   : > { %s2030_s20 = sadd.f32 1e-07, %s2005_s26 }
 0xa45   : > { %v2031_v3 = vstv %s2030_s20  ;;  %s3471_s20 = sshll.u32 %s3768_s25, 4 }
 0xa46   : > { %3581 = vrsqrt.f32 %v2031_v3  ;;  %vm2038_vm3 = vweird.f32 %v2031_v3 }
 0xa4c   : > { %v3582_v4 = vpop.eup %3581 }
 0xa4d   : > { %v2033_v6 = vmul.f32 %v3582_v4, %v2031_v3  ;;  %vm2039_vm1 = vweird.f32 %v3582_v4  ;;  %v2113_v3 = vand.u32 4294901760, %v2112_v0 }
 0xa4e   : > { %vm2040_vm4 = vmor %vm2038_vm3, %vm2039_vm1 }
 0xa4f   : > { %v2034_v7 = vmul.f32 %v3582_v4, %v2033_v6 }
 0xa51   : > { %v2035_v5 = vmul.f32 0.5, %v2034_v7 }
 0xa53   : > { %v2036_v8 = vsub.f32 1.5, %v2035_v5 }
 0xa55   : > { %v2037_v9 = vmul.f32 %v3582_v4, %v2036_v8 }
 0xa57   : > { %v2041_v10 = vsel %vm2040_vm4, %v3582_v4, %v2037_v9 }
 0xa58   : > { %3499 = vpush %v2041_v10  ;;  %v2310_v10 = vpop.permute.xlu0 %2309 }
 0xa60   : > { %v2305_v27 = vpop.permute.xlu0 %2304 }
 0xa89   : > { %s3500_s15 = spop %3499 }
 0xa8a   : > { %v2043_v24 = vstv %s3500_s15 }
 0xa8b   : > { %v2044_v25 = vmul.f32 %v2043_v24, %v2026_v19  ;;  %v2045_v29 = vmul.f32 %v2043_v24, %v2027_v21  ;;  %v2046_v30 = vmul.f32 %v2043_v24, %v2028_v26  ;;  %v2047_v32 = vmul.f32 %v2043_v24, %v2029_v23  ;;  %v3420_v23 = vld [vmem:[%s4492_s2 + $0x48] sm:$0xff] }
 0xa8d   : > { %v2068_v37 = vadd.f32 %v2051_v28, %v2044_v25  ;;  %v2069_v38 = vadd.f32 %v2056_v34, %v2045_v29  ;;  %v2070_v39 = vadd.f32 %v2061_v33, %v2046_v30  ;;  %v2071_v40 = vadd.f32 %v2066_v2, %v2047_v32 }
 0xa8e   : > { %v2348_v34 = vsel %vm478_vm0, %v3420_v23, 0 }
 0xa8f   : > { %v2093_v41 = vand.u32 4294901760, %v2071_v40  ;;  %v2095_v42 = vand.u32 4294901760, %v2070_v39  ;;  %v2097_v43 = vand.u32 4294901760, %v2069_v38  ;;  %v2099_v44 = vand.u32 4294901760, %v2068_v37 }
 0xa91   : > { %2094 = vmatpush.msra.mxu0 %v2093_v41  ;;  %2281 = vmatpush.msra.mxu3 %v2093_v41  ;;  %v2131_v48 = vsub.f32 %v2071_v40, %v2093_v41  ;;  %v2137_v49 = vsub.f32 %v2070_v39, %v2095_v42  ;;  %v2143_v50 = vsub.f32 %v2069_v38, %v2097_v43  ;;  %v4308_v38 = vand.u32 4294901760, %v2348_v34 }
 0xa92   : > { %v2149_v51 = vsub.f32 %v2068_v37, %v2099_v44 }
 0xa93   : > { %2096 = vmatpush.msra.mxu0 %v2095_v42  ;;  %2283 = vmatpush.msra.mxu3 %v2095_v42  ;;  %v2132_v52 = vand.u32 4294901760, %v2131_v48  ;;  %v2138_v53 = vand.u32 4294901760, %v2137_v49  ;;  %v2144_v54 = vand.u32 4294901760, %v2143_v50 }
 0xa94   : > { %v2150_v59 = vand.u32 4294901760, %v2149_v51 }
 0xa95   : > { %2098 = vmatpush.msra.mxu0 %v2097_v43  ;;  %2246 = vmatpush.msra.mxu2 %v2132_v52  ;;  %v2133_v57 = vsub.f32 %v2131_v48, %v2132_v52  ;;  %v2139_v58 = vsub.f32 %v2137_v49, %v2138_v53  ;;  %v2145_v63 = vsub.f32 %v2143_v50, %v2144_v54 }
 0xa96   : > { %2285 = vmatpush.msra.mxu3 %v2097_v43  ;;  %v2151_v47 = vsub.f32 %v2149_v51, %v2150_v59 }
 0xa97   : > { %2100 = vmatpush.msra.mxu0 %v2099_v44  ;;  %2250 = vmatpush.msra.mxu2 %v2138_v53  ;;  %v2134_v61 = vand.u32 4294901760, %v2133_v57  ;;  %v2140_v1 = vand.u32 4294901760, %v2139_v58  ;;  %v2146_v60 = vand.u32 4294901760, %v2145_v63 }
 0xa98   : > { %2287 = vmatpush.msra.mxu3 %v2099_v44  ;;  %2106 = vmatmul.f32.vlgmr.msra.gmra.mxu0 %v2105_v55  ;;  %v2152_v4 = vand.u32 4294901760, %v2151_v47 }
 0xa99   : > { %2177 = vmatpush.msrb.mxu0 %v2131_v48  ;;  %2135 = vmatpush.msra.mxu1 %v2134_v61 }
 0xa9a   : > { %2254 = vmatpush.msra.mxu2 %v2144_v54  ;;  %2289 = vmatmul.f32.vlgmr.msra.gmra.mxu3 %v4275_v17 }
 0xa9b   : > { %2180 = vmatpush.msrb.mxu0 %v2137_v49  ;;  %2141 = vmatpush.msra.mxu1 %v2140_v1 }
 0xa9c   : > { %2258 = vmatpush.msra.mxu2 %v2150_v59 }
 0xa9d   : > { %2183 = vmatpush.msrb.mxu0 %v2143_v50  ;;  %2147 = vmatpush.msra.mxu1 %v2146_v60 }
 0xa9e   : > { %2260 = vmatmul.f32.vlgmr.msra.gmra.mxu2 %v4275_v17 }
 0xa9f   : > { %2186 = vmatpush.msrb.mxu0 %v2149_v51  ;;  %2153 = vmatpush.msra.mxu1 %v2152_v4 }
 0xaa0   : > { %2114 = vmatmul.f32.gmra.mxu0 %v2113_v3  ;;  %2155 = vmatmul.f32.vlgmr.msra.gmra.mxu1 %v4275_v17  ;;  %v2345_v17 = vsel %vm478_vm0, %v3419_v12, 0 }
 0xaa1   : > { %2211 = vmatpush.msrb.mxu1 %v2093_v41 }
 0xaa2   : > { %2293 = vmatmul.f32.gmra.mxu3 %v2109_v36 }
 0xaa3   : > { %2213 = vmatpush.msrb.mxu1 %v2095_v42 }
 0xaa5   : > { %2215 = vmatpush.msrb.mxu1 %v2097_v43  ;;  %v2383_v43 = vsub.f32 %v2348_v34, %v4308_v38 }
 0xaa6   : > { %2264 = vmatmul.f32.gmra.mxu2 %v2109_v36 }
 0xaa7   : > { %2217 = vmatpush.msrb.mxu1 %v2099_v44  ;;  %v2384_v50 = vand.u32 4294901760, %v2383_v43 }
 0xaa8   : > { %2159 = vmatmul.f32.gmra.mxu1 %v2109_v36  ;;  %2189 = vmatmul.f32.vlgmr.msrb.gmra.mxu0 %v4281_v20  ;;  %v4298_v20 = vand.u32 4294901760, %v2345_v17 }
 0xaa9   : > { %v2385_v55 = vsub.f32 %v2383_v43, %v2384_v50 }
 0xaaa   : > { %v2375_v30 = vsub.f32 %v2345_v17, %v4298_v20 }
 0xaab   : > { %v2386_v63 = vand.u32 4294901760, %v2385_v55 }
 0xaac   : > { %v2376_v37 = vand.u32 4294901760, %v2375_v30 }
 0xaae   : > { %v2377_v42 = vsub.f32 %v2375_v30, %v2376_v37 }
 0xab0   : > { %2194 = vmatmul.f32.gmra.mxu0 %v2110_v46  ;;  %2221 = vmatmul.f32.vlgmr.msrb.gmra.mxu1 %v2103_v35  ;;  %v2378_v49 = vand.u32 4294901760, %v2377_v42 }
 0xab8   : > { %2227 = vmatmul.f32.gmra.mxu1 %v2111_v56 }
 0xb15   : > { %v2107_v6 = vpop.f32.mrf.mxu0 }
 0xb1d   : > { %v2115_v7 = vpop.f32.mrf.mxu0  ;;  %v2156_v5 = vpop.f32.mrf.mxu1 }
 0xb1e   : > { %v2157_v11 = vadd.f32 %v2156_v5, %v2107_v6  ;;  %v2290_v14 = vpop.f32.mrf.mxu3 }
 0xb21   : > { %v2261_v62 = vpop.f32.mrf.mxu2 }
 0xb25   : > { %v2160_v8 = vpop.f32.mrf.mxu1  ;;  %v2190_v9 = vpop.f32.mrf.mxu0 }
 0xb26   : > { %v2191_v2 = vadd.f32 %v2190_v9, %v2157_v11  ;;  %v2161_v21 = vadd.f32 %v2160_v8, %v2115_v7  ;;  %v2294_v35 = vpop.f32.mrf.mxu3 }
 0xb29   : > { %v2265_v29 = vpop.f32.mrf.mxu2 }
 0xb2d   : > { %v2222_v13 = vpop.f32.mrf.mxu1  ;;  %v2195_v19 = vpop.f32.mrf.mxu0 }
 0xb2e   : > { %v2223_v15 = vadd.f32 %v2222_v13, %v2191_v2  ;;  %v2196_v24 = vadd.f32 %v2195_v19, %v2161_v21  ;;  %v2332_v21 = vpop.permute.xlu2 %2331 }
 0xb30   : > { %v2262_v18 = vadd.f32 %v2261_v62, %v2223_v15 }
 0xb32   : > { %v2291_v26 = vadd.f32 %v2290_v14, %v2262_v18 }
 0xb34   : > { %v2297_v28 = vadd.f32 %v2291_v26, %v4103_v16  ;;  %v3421_v16 = vld [vmem:[%s4492_s2 + $0x50] sm:$0xff] }
 0xb35   : > { %v2228_v25 = vpop.f32.mrf.mxu1  ;;  %v2351_v46 = vsel %vm478_vm0, %v3421_v16, 0 }
 0xb36   : > { %v4305_v32 = vadd.f32 %v2305_v27, %v2297_v28  ;;  %v2229_v33 = vadd.f32 %v2228_v25, %v2196_v24  ;;  %v2390_v51 = vand.u32 4294901760, %v2351_v46  ;;  %v2337_v24 = vpop.permute.xlu0 %2336 }
 0xb38   : > { %v2266_v36 = vadd.f32 %v2265_v29, %v2229_v33  ;;  %v2372_v40 = vand.u32 4294901760, %v4305_v32  ;;  %v2391_v56 = vsub.f32 %v2351_v46, %v2390_v51 }
 0xb3a   : > { %v2295_v39 = vadd.f32 %v2294_v35, %v2266_v36  ;;  %v2428_v45 = vsub.f32 %v4305_v32, %v2372_v40  ;;  %v2392_v0 = vand.u32 4294901760, %v2391_v56 }
 0xb3c   : > { %v2298_v41 = vadd.f32 %v2295_v39, %v4114_v31  ;;  %v2429_v53 = vand.u32 4294901760, %v2428_v45  ;;  %v3422_v31 = vld [vmem:[%s4492_s2 + $0x58] sm:$0xff]  ;;  %v2393_v60 = vsub.f32 %v2391_v56, %v2392_v0 }
 0xb3d   : > { %v2354_v59 = vsel %vm478_vm0, %v3422_v31, 0 }
 0xb3e   : > { %v4316_v44 = vadd.f32 %v2310_v10, %v2298_v41  ;;  %v2430_v58 = vsub.f32 %v2428_v45, %v2429_v53  ;;  %v2398_v1 = vand.u32 4294901760, %v2354_v59  ;;  %v2394_v4 = vand.u32 4294901760, %v2393_v60 }
 0xb40   : > { %v2370_v48 = vand.u32 4294901760, %v4316_v44  ;;  %v2431_v47 = vand.u32 4294901760, %v2430_v58  ;;  %v2399_v3 = vsub.f32 %v2354_v59, %v2398_v1 }
 0xb42   : > { %2371 = vmatpush.msra.mxu0 %v2370_v48  ;;  %2506 = vmatpush.msrb.mxu3 %v2370_v48  ;;  %v2422_v52 = vsub.f32 %v4316_v44, %v2370_v48  ;;  %v2400_v6 = vand.u32 4294901760, %v2399_v3 }
 0xb44   : > { %2373 = vmatpush.msra.mxu0 %v2372_v40  ;;  %2466 = vmatpush.msrb.mxu2 %v2422_v52  ;;  %v2423_v54 = vand.u32 4294901760, %v2422_v52  ;;  %v2401_v7 = vsub.f32 %v2399_v3, %v2400_v6 }
 0xb45   : > { %2508 = vmatpush.msrb.mxu3 %v2372_v40  ;;  %2379 = vmatmul.f32.vlgmr.msra.gmra.mxu0 %v2378_v49 }
 0xb46   : > { %2469 = vmatpush.msrb.mxu2 %v2428_v45  ;;  %2551 = vmatpush.msrb.mxu0 %v2423_v54  ;;  %v2424_v57 = vsub.f32 %v2422_v52, %v2423_v54  ;;  %v2402_v5 = vand.u32 4294901760, %v2401_v7 }
 0xb47   : > { %2472 = vmatmul.f32.vlgmr.msrb.gmra.mxu2 %v2375_v30  ;;  %2512 = vmatmul.f32.vlgmr.msrb.gmra.mxu3 %v2376_v37 }
 0xb48   : > { %2555 = vmatpush.msrb.mxu0 %v2429_v53  ;;  %v2425_v61 = vand.u32 4294901760, %v2424_v57  ;;  %v2613_v57 = vstv %s3427_s19 }
 0xb4a   : > { %2426 = vmatpush.msra.mxu1 %v2425_v61 }
 0xb4c   : > { %2432 = vmatpush.msra.mxu1 %v2431_v47 }
 0xb4d   : > { %2387 = vmatmul.f32.gmra.mxu0 %v2386_v63  ;;  %2434 = vmatmul.f32.vlgmr.msra.gmra.mxu1 %v4298_v20 }
 0xb4e   : > { %2588 = vmatpush.msrb.mxu1 %v2370_v48 }
 0xb4f   : > { %2477 = vmatmul.f32.gmra.mxu2 %v2383_v43  ;;  %2518 = vmatmul.f32.gmra.mxu3 %v2384_v50 }
 0xb50   : > { %2590 = vmatpush.msrb.mxu1 %v2372_v40 }
 0xb55   : > { %2395 = vmatmul.f32.gmra.mxu0 %v2394_v4  ;;  %2438 = vmatmul.f32.gmra.mxu1 %v4308_v38 }
 0xb57   : > { %2482 = vmatmul.f32.gmra.mxu2 %v2391_v56  ;;  %2524 = vmatmul.f32.gmra.mxu3 %v2392_v0 }
 0xb5d   : > { %2403 = vmatmul.f32.gmra.mxu0 %v2402_v5  ;;  %2442 = vmatmul.f32.gmra.mxu1 %v2390_v51 }
 0xb5f   : > { %2487 = vmatmul.f32.gmra.mxu2 %v2399_v3  ;;  %2530 = vmatmul.f32.gmra.mxu3 %v2400_v6 }
 0xb65   : > { %2446 = vmatmul.f32.gmra.mxu1 %v2398_v1  ;;  %2557 = vmatmul.f32.vlgmr.msrb.gmra.mxu0 %v4298_v20 }
 0xb6d   : > { %2561 = vmatmul.f32.gmra.mxu0 %v4308_v38  ;;  %2592 = vmatmul.f32.vlgmr.msrb.gmra.mxu1 %v4298_v20  ;;  %v2327_v20 = vpop.permute.xlu1 %2326 }
 0xb75   : > { %2565 = vmatmul.f32.gmra.mxu0 %v2390_v51  ;;  %2596 = vmatmul.f32.gmra.mxu1 %v4308_v38  ;;  %v2342_v40 = vpop.permute.xlu1 %2341 }
 0xb7d   : > { %2569 = vmatmul.f32.gmra.mxu0 %v2398_v1  ;;  %2600 = vmatmul.f32.gmra.mxu1 %v2390_v51 }
 0xb85   : > { %2604 = vmatmul.f32.gmra.mxu1 %v2398_v1 }
 0xbc2   : > { %v2380_v8 = vpop.f32.mrf.mxu0 }
 0xbc3   : > { %v2381_v28 = vadd.f32 %v2380_v8, %v2327_v20 }
 0xbca   : > { %v2388_v9 = vpop.f32.mrf.mxu0  ;;  %v2435_v10 = vpop.f32.mrf.mxu1 }
 0xbcb   : > { %v2473_v12 = vpop.f32.mrf.mxu2  ;;  %v2513_v14 = vpop.f32.mrf.mxu3  ;;  %v2389_v27 = vadd.f32 %v2388_v9, %v2332_v21  ;;  %v2436_v33 = vadd.f32 %v2435_v10, %v2381_v28 }
 0xbcd   : > { %v2474_v38 = vadd.f32 %v2473_v12, %v2436_v33  ;;  %v3441_v12 = vld [vmem:[%s4495_s5 + $0xe8] sm:$0xff] }
 0xbcf   : > { %v2514_v43 = vadd.f32 %v2513_v14, %v2474_v38  ;;  %v3448_v14 = vld [vmem:[%s4496_s6 + $0x40] sm:$0xff]  ;;  %v3434_v38 = vld [vmem:[%s4494_s4 + $0x50] sm:$0xff] }
 0xbd2   : > { %v2396_v11 = vpop.f32.mrf.mxu0  ;;  %v2439_v62 = vpop.f32.mrf.mxu1 }
 0xbd3   : > { %v2478_v18 = vpop.f32.mrf.mxu2  ;;  %v2519_v19 = vpop.f32.mrf.mxu3  ;;  %v2397_v25 = vadd.f32 %v2396_v11, %v2337_v24  ;;  %v2440_v29 = vadd.f32 %v2439_v62, %v2389_v27  ;;  %v3433_v11 = vld [vmem:[%s4494_s4 + $0x48] sm:$0xff]  ;;  %v3436_v62 = vld [vmem:[%s4495_s5 + $0xc0] sm:$0xff] }
 0xbd5   : > { %v2479_v35 = vadd.f32 %v2478_v18, %v2440_v29 }
 0xbd7   : > { %v2520_v41 = vadd.f32 %v2519_v19, %v2479_v35 }
 0xbda   : > { %v2404_v2 = vpop.f32.mrf.mxu0  ;;  %v2443_v13 = vpop.f32.mrf.mxu1 }
 0xbdb   : > { %v2483_v30 = vpop.f32.mrf.mxu2  ;;  %v2444_v34 = vadd.f32 %v2443_v13, %v2397_v25  ;;  %v2525_v36 = vpop.f32.mrf.mxu3  ;;  %v2405_v42 = vadd.f32 %v2404_v2, %v2342_v40  ;;  %v3444_v2 = vld [vmem:[%s4495_s5 + $0x100] sm:$0xff]  ;;  %v3446_v13 = vld [vmem:[%s4495_s5 + $0x110] sm:$0xff] }
 0xbdc   : > { %v3438_v40 = vld [vmem:[%s4495_s5 + $0xd0] sm:$0xff] }
 0xbdd   : > { %v2484_v39 = vadd.f32 %v2483_v30, %v2444_v34 }
 0xbdf   : > { %v2526_v45 = vadd.f32 %v2525_v36, %v2484_v39  ;;  %v3437_v39 = vld [vmem:[%s4495_s5 + $0xc8] sm:$0xff] }
 0xbe2   : > { %v2447_v15 = vpop.f32.mrf.mxu1  ;;  %v2558_v17 = vpop.f32.mrf.mxu0 }
 0xbe3   : > { %v2448_v46 = vadd.f32 %v2447_v15, %v2405_v42  ;;  %v2488_v49 = vpop.f32.mrf.mxu2  ;;  %v2559_v50 = vadd.f32 %v2558_v17, %v2514_v43  ;;  %v2531_v56 = vpop.f32.mrf.mxu3 }
 0xbe5   : > { %v2489_v31 = vadd.f32 %v2488_v49, %v2448_v46 }
 0xbe7   : > { %v2532_v61 = vadd.f32 %v2531_v56, %v2489_v31 }
 0xbea   : > { %v2562_v26 = vpop.f32.mrf.mxu0  ;;  %v2593_v23 = vpop.f32.mrf.mxu1 }
 0xbeb   : > { %v2563_v48 = vadd.f32 %v2562_v26, %v2520_v41  ;;  %v2594_v54 = vadd.f32 %v2593_v23, %v2559_v50  ;;  %v3439_v41 = vld [vmem:[%s4495_s5 + $0xd8] sm:$0xff] }
 0xbed   : > { %v2614_v63 = vmul.f32 %v2613_v57, %v2594_v54  ;;  %vm2608_vm5 = vcmp.ge.f32.partialorder %v2594_v54, 0.0 }
 0xbef   : > { %v2618_v3 = vsel %vm2608_vm5, %v2594_v54, %v2614_v63 }
 0xbf2   : > { %v2597_v37 = vpop.f32.mrf.mxu1  ;;  %v2566_v16 = vpop.f32.mrf.mxu0 }
 0xbf3   : > { %v2567_v51 = vadd.f32 %v2566_v16, %v2526_v45  ;;  %v2598_v52 = vadd.f32 %v2597_v37, %v2563_v48  ;;  %v3445_v16 = vld [vmem:[%s4495_s5 + $0x108] sm:$0xff] }
 0xbf5   : > { %v2615_v58 = vmul.f32 %v2613_v57, %v2598_v52  ;;  %vm2609_vm0 = vcmp.ge.f32.partialorder %v2598_v52, 0.0 }
 0xbf7   : > { %v2619_v1 = vsel %vm2609_vm0, %v2598_v52, %v2615_v58  ;;  %v2670_v58 = vpop.permute.xlu1 %2669 }
 0xbf8   : > { %v2632_v7 = vadd.f32 %v2619_v1, %v2618_v3 }
 0xbfa   : > { %v2601_v53 = vpop.f32.mrf.mxu1  ;;  %v2570_v59 = vpop.f32.mrf.mxu0 }
 0xbfb   : > { %v2602_v55 = vadd.f32 %v2601_v53, %v2567_v51  ;;  %v2571_v47 = vadd.f32 %v2570_v59, %v2532_v61 }
 0xbfd   : > { %v2616_v0 = vmul.f32 %v2613_v57, %v2602_v55  ;;  %vm2610_vm6 = vcmp.ge.f32.partialorder %v2602_v55, 0.0 }
 0xbff   : > { %v2620_v6 = vsel %vm2610_vm6, %v2602_v55, %v2616_v0  ;;  %v2675_v59 = vpop.permute.xlu1 %2674 }
 0xc00   : > { %v2633_v8 = vadd.f32 %v2632_v7, %v2620_v6 }
 0xc02   : > { %v2605_v60 = vpop.f32.mrf.mxu1 }
 0xc03   : > { %v2606_v4 = vadd.f32 %v2605_v60, %v2571_v47 }
 0xc05   : > { %v2617_v5 = vmul.f32 %v2613_v57, %v2606_v4  ;;  %vm2611_vm7 = vcmp.ge.f32.partialorder %v2606_v4, 0.0 }
 0xc07   : > { %v2621_v9 = vsel %vm2611_vm7, %v2606_v4, %v2617_v5  ;;  %v2680_v61 = vpop.permute.xlu1 %2679 }
 0xc08   : > { %v2634_v10 = vadd.f32 %v2633_v8, %v2621_v9 }
 0xc0a   : > { %2635 = vadd.xlane.f32.xlu2 %v2634_v10 }
 0xc0f   : > { %v2685_v63 = vpop.permute.xlu1 %2684 }
 0xc17   : > { %v2712_v60 = vpop.permute.xlu1 %2711 }
 0xc22   : > { %2716 = vperm.xlu2 %3574, %v3433_v11  }
 0xc2a   : > { %2766 = vperm.xlu2 %3574, %v3436_v62  }
 0xc32   : > { %2800 = vperm.xlu2 %3574, %v3441_v12  }
 0xc3a   : > { %2828 = vperm.xlu2 %3574, %v3444_v2   ;;  %v2727_v2 = vpop.permute.xlu1 %2726 }
 0xc42   : > { %2838 = vperm.xlu2 %3574, %v3446_v13  }
 0xc4a   : > { %2861 = vperm.xlu2 %3574, %v3448_v14   ;;  %v3451_v14 = vld [vmem:[%s4496_s6 + $0x58] sm:$0xff] }
 0xc7d   : > { %v2636_v15 = vpop.xlane.xlu2 %2635 }
 0xc7e   : > { %v2637_v17 = vrot.slane %v2636_v15, 4 }
 0xc80   : > { %v2638_v18 = vadd.f32 %v2637_v17, %v2636_v15  ;;  %v3449_v15 = vld [vmem:[%s4496_s6 + $0x48] sm:$0xff]  ;;  %v3456_v17 = vld [vmem:[%s4497_s7 + $0x58] sm:$0xff] }
 0xc82   : > { %v2639_v19 = vrot.slane %v2638_v18, 2 }
 0xc84   : > { %v2640_v20 = vadd.f32 %v2639_v19, %v2638_v18  ;;  %v3455_v18 = vld [vmem:[%s4497_s7 + $0x50] sm:$0xff] }
 0xc85   : > { %v2717_v5 = vpop.permute.xlu2 %2716  ;;  %v3450_v19 = vld [vmem:[%s4496_s6 + $0x50] sm:$0xff] }
 0xc86   : > { %v2641_v21 = vrot.slane %v2640_v20, 1 }
 0xc88   : > { %v2642_v26 = vadd.f32 %v2641_v21, %v2640_v20  ;;  %v3454_v20 = vld [vmem:[%s4497_s7 + $0x48] sm:$0xff]  ;;  %v3460_v21 = vld [vmem:[%s4498_s8 + $0x58] sm:$0xff] }
 0xc8a   : > { %3501 = vpush %v2642_v26  ;;  %v3453_v26 = vld [vmem:[%s4497_s7 + $0x40] sm:$0xff] }
 0xcbb   : > { %s3502_s29 = spop %3501 }
 0xcbc   : > { %s2644_s16 = smul.f32 0.00024414063, %s3502_s29 }
 0xcbe   : > { %v2645_v23 = vstv %s2644_s16 }
 0xcbf   : > { %v2646_v27 = vsub.f32 %v2618_v3, %v2645_v23  ;;  %v2647_v24 = vsub.f32 %v2619_v1, %v2645_v23  ;;  %v2648_v28 = vsub.f32 %v2620_v6, %v2645_v23  ;;  %v2649_v25 = vsub.f32 %v2621_v9, %v2645_v23  ;;  %v3457_v23 = vld [vmem:[%s4498_s8 + $0x40] sm:$0xff] }
 0xcc1   : > { %v2650_v29 = vmul.f32 %v2646_v27, %v2646_v27  ;;  %v2651_v30 = vmul.f32 %v2647_v24, %v2647_v24  ;;  %v2652_v33 = vmul.f32 %v2648_v28, %v2648_v28  ;;  %v2653_v35 = vmul.f32 %v2649_v25, %v2649_v25 }
 0xcc2   : > { %v2687_v0 = vmul.f32 %v2670_v58, %v2646_v27  ;;  %v2688_v1 = vmul.f32 %v2675_v59, %v2647_v24  ;;  %v2689_v47 = vmul.f32 %v2680_v61, %v2648_v28  ;;  %v2690_v62 = vmul.f32 %v2685_v63, %v2649_v25  ;;  %v3463_v27 = vld [vmem:[%s4500_s10 + $0x20] sm:$0xff]  ;;  %v2796_v24 = vpop.permute.xlu1 %2795  ;;  %v2767_v28 = vpop.permute.xlu2 %2766 }
 0xcc3   : > { %v2654_v34 = vadd.f32 %v2651_v30, %v2650_v29 }
 0xcc5   : > { %v2655_v36 = vadd.f32 %v2654_v34, %v2652_v33 }
 0xcc7   : > { %v2656_v37 = vadd.f32 %v2655_v36, %v2653_v35 }
 0xcc9   : > { %2657 = vadd.xlane.f32.xlu0 %v2656_v37 }
 0xcca   : > { %v2806_v29 = vpop.permute.xlu1 %2805  ;;  %v2801_v30 = vpop.permute.xlu2 %2800 }
 0xcd2   : > { %v2811_v34 = vpop.permute.xlu1 %2810  ;;  %v2829_v35 = vpop.permute.xlu2 %2828 }
 0xcda   : > { %v2844_v37 = vpop.permute.xlu1 %2843 }
 0xcdd   : > { %2721 = vperm.xlu0 %3572, %v3434_v38   ;;  %v2839_v38 = vpop.permute.xlu2 %2838 }
 0xce5   : > { %2771 = vperm.xlu0 %3572, %v3437_v39  }
 0xced   : > { %2776 = vperm.xlu0 %3572, %v3438_v40  }
 0xcf5   : > { %2833 = vperm.xlu0 %3572, %v3445_v16   ;;  %v2862_v16 = vpop.permute.xlu2 %2861 }
 0xcfd   : > { %2781 = vperm.xlu0 %3572, %v3439_v41  }
 0xd3c   : > { %v2658_v42 = vpop.xlane.xlu0 %2657 }
 0xd3d   : > { %v2659_v43 = vrot.slane %v2658_v42, 4 }
 0xd3f   : > { %v2660_v45 = vadd.f32 %v2659_v43, %v2658_v42 }
 0xd41   : > { %v2661_v46 = vrot.slane %v2660_v45, 2 }
 0xd43   : > { %v2662_v48 = vadd.f32 %v2661_v46, %v2660_v45 }
 0xd45   : > { %v2663_v49 = vrot.slane %v2662_v48, 1 }
 0xd47   : > { %v2664_v50 = vadd.f32 %v2663_v49, %v2662_v48 }
 0xd49   : > { %3503 = vpush %v2664_v50 }
 0xd4f   : > { %v2722_v8 = vpop.permute.xlu0 %2721 }
 0xd57   : > { %v2772_v25 = vpop.permute.xlu0 %2771 }
 0xd5f   : > { %v2777_v33 = vpop.permute.xlu0 %2776 }
 0xd67   : > { %v2834_v36 = vpop.permute.xlu0 %2833 }
 0xd6f   : > { %v2782_v39 = vpop.permute.xlu0 %2781 }
 0xd7a   : > { %s3504_s29 = spop %3503 }
 0xd7b   : > { %s2666_s16 = smul.f32 0.00024414063, %s3504_s29 }
 0xd7d   : > { %s2691_s15 = sadd.f32 1e-07, %s2666_s16 }
 0xd7f   : > { %v2692_v51 = vstv %s2691_s15  ;;  %s3452_s15 = sld [smem:[#allocation2 + $0x101]] }
 0xd80   : > { %3583 = vrsqrt.f32 %v2692_v51  ;;  %vm2699_vm9 = vweird.f32 %v2692_v51 }
 0xd86   : > { %v3584_v52 = vpop.eup %3583 }
 0xd87   : > { %v2694_v53 = vmul.f32 %v3584_v52, %v2692_v51  ;;  %vm2700_vm8 = vweird.f32 %v3584_v52 }
 0xd88   : > { %vm2701_vm10 = vmor %vm2699_vm9, %vm2700_vm8 }
 0xd89   : > { %v2695_v31 = vmul.f32 %v3584_v52, %v2694_v53 }
 0xd8b   : > { %v2696_v54 = vmul.f32 0.5, %v2695_v31 }
 0xd8d   : > { %v2697_v55 = vsub.f32 1.5, %v2696_v54 }
 0xd8f   : > { %v2698_v56 = vmul.f32 %v3584_v52, %v2697_v55 }
 0xd91   : > { %v2702_v57 = vsel %vm2701_vm10, %v3584_v52, %v2698_v56 }
 0xd92   : > { %3505 = vpush %v2702_v57 }
 0xdc3   : > { %s3506_s1 = spop %3505 }
 0xdc4   : > { %v2704_v3 = vstv %s3506_s1 }
 0xdc5   : > { %v2705_v4 = vmul.f32 %v2704_v3, %v2687_v0  ;;  %v2706_v6 = vmul.f32 %v2704_v3, %v2688_v1  ;;  %v2707_v7 = vmul.f32 %v2704_v3, %v2689_v47  ;;  %v2708_v12 = vmul.f32 %v2704_v3, %v2690_v62 }
 0xdc7   : > { %v4365_v9 = vadd.f32 %v2717_v5, %v2706_v6  ;;  %v4367_v10 = vadd.f32 %v2722_v8, %v2707_v7  ;;  %v2729_v11 = vadd.f32 %v2712_v60, %v2705_v4  ;;  %v4371_v13 = vadd.f32 %v2727_v2, %v2708_v12 }
 0xdc8   : > { %v2888_v2 = vstv %s3452_s15 }
 0xdc9   : > { %2749 = vrot.lane.b32.xlu2 %v4365_v9, %s3678_s11  ;;  %2738 = vrot.lane.b32.xlu0 %v4367_v10, %s3679_s28  ;;  %v2813_v52 = vmul.f32 %v2796_v24, %v2729_v11  ;;  %v2814_v53 = vmul.f32 %v2801_v30, %v4365_v9  ;;  %v2815_v3 = vmul.f32 %v2806_v29, %v4367_v10 }
 0xdca   : > { %2734 = vrot.lane.b32.xlu1 %v2729_v11, %s3679_s28  ;;  %v2816_v8 = vmul.f32 %v2811_v34, %v4371_v13  ;;  %v3459_v34 = vld [vmem:[%s4498_s8 + $0x50] sm:$0xff] }
 0xdd1   : > { %2751 = vrot.lane.b32.xlu2 %v4367_v10, %s3678_s11  ;;  %2753 = vrot.lane.b32.xlu0 %v4371_v13, %s3678_s11 }
 0xdd2   : > { %2736 = vrot.lane.b32.xlu1 %v4365_v9, %s3679_s28 }
 0xdd9   : > { %2876 = vperm.xlu2 %3574, %v3451_v14   ;;  %2866 = vperm.xlu0 %3572, %v3449_v15  }
 0xdda   : > { %2747 = vrot.lane.b32.xlu1 %v2729_v11, %s3678_s11 }
 0xde1   : > { %2959 = vperm.xlu2 %3574, %v3456_v17  }
 0xde2   : > { %2740 = vrot.lane.b32.xlu1 %v4371_v13, %s3679_s28 }
 0xde9   : > { %2954 = vperm.xlu2 %3574, %v3455_v18  }
 0xdea   : > { %2871 = vperm.xlu1 %3573, %v3450_v19  }
 0xdf1   : > { %2949 = vperm.xlu2 %3574, %v3454_v20  }
 0xdf9   : > { %3001 = vperm.xlu2 %3574, %v3460_v21  }
 0xe01   : > { %2944 = vperm.xlu2 %3574, %v3453_v26  }
 0xe09   : > { %2986 = vperm.xlu2 %3574, %v3457_v23  }
 0xe11   : > { %3240 = vperm.xlu2 %3574, %v3463_v27  }
 0xe23   : > { %v2750_v43 = vpop.permute.xlu2 %2749 }
 0xe24   : > { %v2756_v54 = vsel %vm2746_vm12, %v2750_v43, 0.0 }
 0xe25   : > { %v2847_v59 = vmul.f32 %v2834_v36, %v2756_v54 }
 0xe2b   : > { %v2752_v61 = vpop.permute.xlu2 %2751 }
 0xe2c   : > { %v2757_v5 = vsel %vm2746_vm12, %v2752_v61, 0.0 }
 0xe2d   : > { %v2848_v15 = vmul.f32 %v2839_v38, %v2757_v5 }
 0xe33   : > { %v2877_v18 = vpop.permute.xlu2 %2876 }
 0xe3b   : > { %v2739_v41 = vpop.permute.xlu0 %2738 }
 0xe3c   : > { %v2735_v40 = vpop.permute.xlu1 %2734  ;;  %v2744_v58 = vsel %vm2733_vm11, %v2739_v41, 0.0 }
 0xe3d   : > { %v2742_v45 = vsel %vm2733_vm11, %v2735_v40, 0.0  ;;  %v2786_v0 = vmul.f32 %v2777_v33, %v2744_v58 }
 0xe3e   : > { %v2784_v49 = vmul.f32 %v2767_v28, %v2742_v45 }
 0xe3f   : > { %v2819_v11 = vadd.f32 %v2815_v3, %v2786_v0 }
 0xe40   : > { %v2817_v56 = vadd.f32 %v2813_v52, %v2784_v49 }
 0xe41   : > { %v2852_v20 = vadd.f32 %v2848_v15, %v2819_v11 }
 0xe43   : > { %v2754_v48 = vpop.permute.xlu0 %2753 }
 0xe44   : > { %v2737_v42 = vpop.permute.xlu1 %2736  ;;  %v2758_v4 = vsel %vm2746_vm12, %v2754_v48, 0.0 }
 0xe45   : > { %v2743_v46 = vsel %vm2733_vm11, %v2737_v42, 0.0  ;;  %v2849_v12 = vmul.f32 %v2844_v37, %v2758_v4 }
 0xe46   : > { %v2785_v50 = vmul.f32 %v2772_v25, %v2743_v46 }
 0xe48   : > { %v2818_v57 = vadd.f32 %v2814_v53, %v2785_v50 }
 0xe4a   : > { %v2851_v1 = vadd.f32 %v2847_v59, %v2818_v57 }
 0xe4b   : > { %v2867_v47 = vpop.permute.xlu0 %2866 }
 0xe4c   : > { %v2748_v51 = vpop.permute.xlu1 %2747  ;;  %v2880_v62 = vadd.f32 %v2867_v47, %v2851_v1 }
 0xe4d   : > { %v2755_v31 = vsel %vm2746_vm12, %v2748_v51, 0.0 }
 0xe4e   : > { %v2846_v55 = vmul.f32 %v2829_v35, %v2755_v31  ;;  %v2890_v19 = vmul.f32 %v2888_v2, %v2880_v62  ;;  %vm2884_vm14 = vcmp.ge.f32.partialorder %v2880_v62, 0.0  ;;  %v3464_v35 = vld [vmem:[%s4500_s10 + $0x28] sm:$0xff] }
 0xe50   : > { %v2850_v63 = vadd.f32 %v2846_v55, %v2817_v56  ;;  %v2894_v27 = vsel %vm2884_vm14, %v2880_v62, %v2890_v19  ;;  %v3458_v55 = vld [vmem:[%s4498_s8 + $0x48] sm:$0xff] }
 0xe52   : > { %v2879_v6 = vadd.f32 %v2862_v16, %v2850_v63 }
 0xe54   : > { %v2741_v60 = vpop.permute.xlu1 %2740  ;;  %v2889_v10 = vmul.f32 %v2888_v2, %v2879_v6  ;;  %vm2883_vm13 = vcmp.ge.f32.partialorder %v2879_v6, 0.0 }
 0xe55   : > { %v2745_v7 = vsel %vm2733_vm11, %v2741_v60, 0.0 }
 0xe56   : > { %v2787_v9 = vmul.f32 %v2782_v39, %v2745_v7  ;;  %v2893_v23 = vsel %vm2883_vm13, %v2879_v6, %v2889_v10 }
 0xe57   : > { %v2907_v28 = vadd.f32 %v2894_v27, %v2893_v23 }
 0xe58   : > { %v2820_v14 = vadd.f32 %v2816_v8, %v2787_v9  ;;  %v2960_v8 = vpop.permute.xlu2 %2959 }
 0xe5a   : > { %v2853_v17 = vadd.f32 %v2849_v12, %v2820_v14 }
 0xe5c   : > { %v2882_v21 = vadd.f32 %v2877_v18, %v2853_v17  ;;  %v2872_v26 = vpop.permute.xlu1 %2871 }
 0xe5d   : > { %v2881_v22 = vadd.f32 %v2872_v26, %v2852_v20 }
 0xe5e   : > { %v2892_v24 = vmul.f32 %v2888_v2, %v2882_v21  ;;  %vm2886_vm1 = vcmp.ge.f32.partialorder %v2882_v21, 0.0 }
 0xe5f   : > { %vm2885_vm15 = vcmp.ge.f32.partialorder %v2881_v22, 0.0  ;;  %v2891_v13 = vmul.f32 %v2888_v2, %v2881_v22  ;;  %v3461_v2 = vld [vmem:[%s4499_s9 + $0x20] sm:$0xff] }
 0xe60   : > { %v2896_v30 = vsel %vm2886_vm1, %v2882_v21, %v2892_v24  ;;  %v2955_v9 = vpop.permute.xlu2 %2954  ;;  %v3012_v14 = vsel %vm1139_vm2, %v3461_v2, 0 }
 0xe61   : > { %v2895_v25 = vsel %vm2885_vm15, %v2881_v22, %v2891_v13  ;;  %v4441_v15 = vand.u32 4294901760, %v3012_v14  ;;  %v3462_v13 = vld [vmem:[%s4499_s9 + $0x28] sm:$0xff] }
 0xe62   : > { %v2908_v29 = vadd.f32 %v2907_v28, %v2895_v25 }
 0xe64   : > { %v2909_v33 = vadd.f32 %v2908_v29, %v2896_v30 }
 0xe66   : > { %2910 = vadd.xlane.f32.xlu0 %v2909_v33 }
 0xe68   : > { %v2950_v11 = vpop.permute.xlu2 %2949 }
 0xe70   : > { %v3002_v62 = vpop.permute.xlu2 %3001 }
 0xe78   : > { %v2945_v12 = vpop.permute.xlu2 %2944 }
 0xe7a   : > { %2996 = vperm.xlu0 %3572, %v3459_v34  }
 0xe80   : > { %v2987_v21 = vpop.permute.xlu2 %2986 }
 0xe82   : > { %3245 = vperm.xlu0 %3572, %v3464_v35   ;;  %v3015_v35 = vsel %vm1139_vm2, %v3462_v13, 0 }
 0xed9   : > { %v2911_v36 = vpop.xlane.xlu0 %2910 }
 0xeda   : > { %v2912_v37 = vrot.slane %v2911_v36, 4 }
 0xedc   : > { %v2913_v38 = vadd.f32 %v2912_v37, %v2911_v36 }
 0xede   : > { %v2914_v39 = vrot.slane %v2913_v38, 2 }
 0xee0   : > { %v2915_v40 = vadd.f32 %v2914_v39, %v2913_v38 }
 0xee2   : > { %v2916_v16 = vrot.slane %v2915_v40, 1 }
 0xee4   : > { %v2917_v41 = vadd.f32 %v2916_v16, %v2915_v40 }
 0xee6   : > { %3507 = vpush %v2917_v41 }
 0xeec   : > { %v2997_v24 = vpop.permute.xlu0 %2996 }
 0xef4   : > { %v3246_v13 = vpop.permute.xlu0 %3245 }
 0xf17   : > { %s3508_s26 = spop %3507 }
 0xf18   : > { %s2919_s28 = smul.f32 0.00024414063, %s3508_s26  ;;  %s433_s26 = sand.u32 1, %s3662_s22  }
 0xf19   : > { %s3253_s25 = scalar_lea.sflag [#allocation3], %s433_s26 }
 0xf1a   : > { %v2920_v42 = vstv %s2919_s28  ;;  %s3360_s28 = sshll.u32 %s433_s26, 4 }
 0xf1b   : > { %v2921_v43 = vsub.f32 %v2893_v23, %v2920_v42  ;;  %v2922_v45 = vsub.f32 %v2894_v27, %v2920_v42  ;;  %v2923_v46 = vsub.f32 %v2895_v25, %v2920_v42  ;;  %v2924_v48 = vsub.f32 %v2896_v30, %v2920_v42  ;;  %s435_s17 = scalar_lea.vmem [#allocation5], %s3360_s28 }
 0xf1c   : > { %v4447_v25 = vsub.f32 %v3012_v14, %v4441_v15  ;;  %s3265_s15 = sshll.u32 %s435_s17, 4  ;;  %s3266_s15 = int_to_ptr.vmem [resolvable:$true] %s3265_s15 }
 0xf1d   : > { %v2925_v49 = vmul.f32 %v2921_v43, %v2921_v43  ;;  %v2926_v50 = vmul.f32 %v2922_v45, %v2922_v45  ;;  %v2927_v51 = vmul.f32 %v2923_v46, %v2923_v46  ;;  %v2928_v53 = vmul.f32 %v2924_v48, %v2924_v48 }
 0xf1e   : > { %v2962_v10 = vmul.f32 %v2945_v12, %v2921_v43  ;;  %v2963_v17 = vmul.f32 %v2950_v11, %v2922_v45  ;;  %v2964_v18 = vmul.f32 %v2955_v9, %v2923_v46  ;;  %v2965_v19 = vmul.f32 %v2960_v8, %v2924_v48 }
 0xf1f   : > { %v2929_v52 = vadd.f32 %v2926_v50, %v2925_v49  ;;  %v3039_v40 = vand.u32 4294901760, %v4447_v25  ;;  %v3045_v43 = vand.u32 4294901760, %v3015_v35 }
 0xf21   : > { %v2930_v31 = vadd.f32 %v2929_v52, %v2927_v51  ;;  %v3040_v50 = vsub.f32 %v4447_v25, %v3039_v40 }
 0xf23   : > { %v2931_v54 = vadd.f32 %v2930_v31, %v2928_v53  ;;  %v3046_v31 = vsub.f32 %v3015_v35, %v3045_v43 }
 0xf25   : > { %2932 = vadd.xlane.f32.xlu1 %v2931_v54 }
 0xf3e   : > { %2991 = vperm.xlu1 %3573, %v3458_v55  }
 0xf98   : > { %v2933_v56 = vpop.xlane.xlu1 %2932 }
 0xf99   : > { %v2934_v57 = vrot.slane %v2933_v56, 4 }
 0xf9b   : > { %v2935_v58 = vadd.f32 %v2934_v57, %v2933_v56  ;;  %v3041_v57 = vand.u32 4294901760, %v3040_v50 }
 0xf9d   : > { %v2936_v59 = vrot.slane %v2935_v58, 2 }
 0xf9f   : > { %v2937_v61 = vadd.f32 %v2936_v59, %v2935_v58  ;;  %v3047_v59 = vand.u32 4294901760, %v3046_v31 }
 0xfa1   : > { %v2938_v63 = vrot.slane %v2937_v61, 1 }
 0xfa3   : > { %v2939_v0 = vadd.f32 %v2938_v63, %v2937_v61 }
 0xfa5   : > { %3509 = vpush %v2939_v0  ;;  %v3048_v0 = vsub.f32 %v3046_v31, %v3047_v59 }
 0xfb0   : > { %v2992_v28 = vpop.permute.xlu1 %2991 }
 0xfd6   : > { %s3510_s19 = spop %3509 }
 0xfd7   : > { %s2941_s29 = smul.f32 0.00024414063, %s3510_s19 }
 0xfd9   : > { %s2966_s16 = sadd.f32 1e-07, %s2941_s29 }
 0xfdb   : > { %v2967_v1 = vstv %s2966_s16  ;;  %s3264_s16 = scalar_lea.hbm %s4502_s12, %s3471_s20  ;;  %s3624_s20 = scalar_lea.hbm %s4502_s12, 32 }
 0xfdc   : > { %3585 = vrsqrt.f32 %v2967_v1  ;;  %vm2974_vm4 = vweird.f32 %v2967_v1  ;;  %s3267_s1 = sshll.u32 %s3264_s16, 4  ;;  %s3268_s1 = int_to_ptr.hbm [resolvable:$true] %s3267_s1 }
 0xfe2   : > { %v3586_v47 = vpop.eup %3585 }
 0xfe3   : > { %v2969_v60 = vmul.f32 %v3586_v47, %v2967_v1  ;;  %vm2975_vm3 = vweird.f32 %v3586_v47  ;;  %v3049_v1 = vand.u32 4294901760, %v3048_v0 }
 0xfe4   : > { %vm2976_vm0 = vmor %vm2974_vm4, %vm2975_vm3 }
 0xfe5   : > { %v2970_v3 = vmul.f32 %v3586_v47, %v2969_v60 }
 0xfe7   : > { %v2971_v4 = vmul.f32 0.5, %v2970_v3 }
 0xfe9   : > { %v2972_v6 = vsub.f32 1.5, %v2971_v4 }
 0xfeb   : > { %v2973_v7 = vmul.f32 %v3586_v47, %v2972_v6 }
 0xfed   : > { %v2977_v5 = vsel %vm2976_vm0, %v3586_v47, %v2973_v7 }
 0xfee   : > { %3511 = vpush %v2977_v5 }
0x101f   : > { %s3512_s18 = spop %3511 }
0x1020   : > { %v2979_v20 = vstv %s3512_s18  ;;  %s3618_s18 = sshra.s32 %s3268_s1, 4  ;;  %s3619_s18 = int_to_ptr.hbm [resolvable:$true] %s3618_s18 }
0x1021   : > { %v2980_v26 = vmul.f32 %v2979_v20, %v2962_v10  ;;  %v2981_v22 = vmul.f32 %v2979_v20, %v2963_v17  ;;  %v2982_v23 = vmul.f32 %v2979_v20, %v2964_v18  ;;  %v2983_v27 = vmul.f32 %v2979_v20, %v2965_v19  ;;  %v3241_v10 = vpop.permute.xlu2 %3240  ;;  %s3620_s0 = scalar_lea.hbm %s3619_s18, 16  ;;  %p3625_p3 = scmp.lt.s32.totalorder %s3619_s18, %s4502_s12 }
0x1022   : > { %p3621_p0 = scmp.ne.s32.totalorder %s3619_s18, %s3620_s0  ;;  %p3626_p4 = scmp.lt.s32.totalorder %s3624_s20, %s3620_s0 }
0x1023   : > { %v3004_v29 = vadd.f32 %v2987_v21, %v2980_v26  ;;  %v3005_v30 = vadd.f32 %v2992_v28, %v2981_v22  ;;  %v3006_v33 = vadd.f32 %v2997_v24, %v2982_v23  ;;  %v3007_v34 = vadd.f32 %v3002_v62, %v2983_v27 }
0x1024   : > { %p3622_p1 = pnand %p3621_p0, %p3785_p5  ;;  %p3627_p7 = por %p3626_p4, %p3625_p3 }
0x1025   : > { %v3029_v36 = vand.u32 4294901760, %v3007_v34  ;;  %v3031_v37 = vand.u32 4294901760, %v3006_v33  ;;  %v3033_v38 = vand.u32 4294901760, %v3005_v30  ;;  %v3035_v39 = vand.u32 4294901760, %v3004_v29 }
0x1026   : > { %p3623_p2 = pneg %p3622_p1 }
0x1027   : > { %3030 = vmatpush.msra.mxu2 %v3029_v36  ;;  %3217 = vmatpush.msra.mxu1 %v3029_v36  ;;  %v3067_v16 = vsub.f32 %v3007_v34, %v3029_v36  ;;  %v3073_v41 = vsub.f32 %v3006_v33, %v3031_v37  ;;  %v3079_v42 = vsub.f32 %v3005_v30, %v3033_v38 }
0x1028   : > { %v3085_v45 = vsub.f32 %v3004_v29, %v3035_v39  ;;  %p3628_p8 = pnand %p3627_p7, %p3623_p2 }
0x1029   : > { %3032 = vmatpush.msra.mxu2 %v3031_v37  ;;  %3219 = vmatpush.msra.mxu1 %v3031_v37  ;;  %v3068_v46 = vand.u32 4294901760, %v3067_v16  ;;  %v3074_v48 = vand.u32 4294901760, %v3073_v41  ;;  %v3080_v49 = vand.u32 4294901760, %v3079_v42 }
0x102a   : > { %v3086_v53 = vand.u32 4294901760, %v3085_v45 }
0x102b   : > { %3034 = vmatpush.msra.mxu2 %v3033_v38  ;;  %3182 = vmatpush.msra.mxu0 %v3068_v46  ;;  %v3069_v51 = vsub.f32 %v3067_v16, %v3068_v46  ;;  %v3075_v52 = vsub.f32 %v3073_v41, %v3074_v48  ;;  %v3081_v55 = vsub.f32 %v3079_v42, %v3080_v49 }
0x102c   : > { %3221 = vmatpush.msra.mxu1 %v3033_v38  ;;  %v3087_v58 = vsub.f32 %v3085_v45, %v3086_v53 }
0x102d   : > { %3036 = vmatpush.msra.mxu2 %v3035_v39  ;;  %3186 = vmatpush.msra.mxu0 %v3074_v48  ;;  %v3070_v54 = vand.u32 4294901760, %v3069_v51  ;;  %v3076_v56 = vand.u32 4294901760, %v3075_v52  ;;  %v3082_v61 = vand.u32 4294901760, %v3081_v55 }
0x102e   : > { %3223 = vmatpush.msra.mxu1 %v3035_v39  ;;  %3042 = vmatmul.f32.vlgmr.msra.gmra.mxu2 %v3041_v57  ;;  %v3088_v63 = vand.u32 4294901760, %v3087_v58 }
0x102f   : > { %3113 = vmatpush.msrb.mxu2 %v3067_v16  ;;  %3071 = vmatpush.msra.mxu3 %v3070_v54 }
0x1030   : > { %3190 = vmatpush.msra.mxu0 %v3080_v49  ;;  %3225 = vmatmul.f32.vlgmr.msra.gmra.mxu1 %v4441_v15 }
0x1031   : > { %3116 = vmatpush.msrb.mxu2 %v3073_v41  ;;  %3077 = vmatpush.msra.mxu3 %v3076_v56 }
0x1032   : > { %3194 = vmatpush.msra.mxu0 %v3086_v53 }
0x1033   : > { %3119 = vmatpush.msrb.mxu2 %v3079_v42  ;;  %3196 = vmatmul.f32.vlgmr.msra.gmra.mxu0 %v4441_v15 }
0x1034   : > { %3083 = vmatpush.msra.mxu3 %v3082_v61 }
0x1035   : > { %3122 = vmatpush.msrb.mxu2 %v3085_v45 }
0x1036   : > { %3089 = vmatpush.msra.mxu3 %v3088_v63  ;;  %3050 = vmatmul.f32.gmra.mxu2 %v3049_v1 }
0x1037   : > { %3091 = vmatmul.f32.vlgmr.msra.gmra.mxu3 %v4441_v15 }
0x1038   : > { %3147 = vmatpush.msrb.mxu3 %v3029_v36  ;;  %3229 = vmatmul.f32.gmra.mxu1 %v3045_v43 }
0x103a   : > { %3149 = vmatpush.msrb.mxu3 %v3031_v37 }
0x103b   : > { %3200 = vmatmul.f32.gmra.mxu0 %v3045_v43 }
0x103c   : > { %3151 = vmatpush.msrb.mxu3 %v3033_v38 }
0x103e   : > { %3153 = vmatpush.msrb.mxu3 %v3035_v39  ;;  %3125 = vmatmul.f32.vlgmr.msrb.gmra.mxu2 %v4447_v25 }
0x103f   : > { %3095 = vmatmul.f32.gmra.mxu3 %v3045_v43 }
0x1046   : > { %3130 = vmatmul.f32.gmra.mxu2 %v3046_v31 }
0x1047   : > { %3157 = vmatmul.f32.vlgmr.msrb.gmra.mxu3 %v3039_v40 }
0x104f   : > { %3163 = vmatmul.f32.gmra.mxu3 %v3047_v59 }
0x10ad   : > { %v3226_v11 = vpop.f32.mrf.mxu1 }
0x10b0   : > { %v3197_v5 = vpop.f32.mrf.mxu0 }
0x10b1   : > { %v3043_v47 = vpop.f32.mrf.mxu2 }
0x10b5   : > { %v3230_v22 = vpop.f32.mrf.mxu1 }
0x10b8   : > { %v3201_v20 = vpop.f32.mrf.mxu0 }
0x10b9   : > { %v3051_v3 = vpop.f32.mrf.mxu2 }
0x10ba   : > { %v3092_v60 = vpop.f32.mrf.mxu3 }
0x10bb   : > { %v3093_v6 = vadd.f32 %v3092_v60, %v3043_v47 }
0x10c1   : > { %v3126_v7 = vpop.f32.mrf.mxu2 }
0x10c2   : > { %v3096_v4 = vpop.f32.mrf.mxu3  ;;  %v3127_v8 = vadd.f32 %v3126_v7, %v3093_v6 }
0x10c3   : > { %v3097_v2 = vadd.f32 %v3096_v4, %v3051_v3 }
0x10c9   : > { %v3131_v15 = vpop.f32.mrf.mxu2 }
0x10ca   : > { %v3158_v9 = vpop.f32.mrf.mxu3  ;;  %v3132_v18 = vadd.f32 %v3131_v15, %v3097_v2 }
0x10cb   : > { %v3159_v62 = vadd.f32 %v3158_v9, %v3127_v8 }
0x10cd   : > { %v3198_v12 = vadd.f32 %v3197_v5, %v3159_v62 }
0x10cf   : > { %v3227_v14 = vadd.f32 %v3226_v11, %v3198_v12 }
0x10d1   : > { %v3233_v17 = vadd.f32 %v3227_v14, %v4305_v32 }
0x10d2   : > { %v3164_v19 = vpop.f32.mrf.mxu3 }
0x10d3   : > { %v3248_v21 = vadd.f32 %v3241_v10, %v3233_v17  ;;  %v3165_v26 = vadd.f32 %v3164_v19, %v3132_v18 }
0x10d5   : > { %3250 = vst [vmem:[%s435_s17] sm:$0xff] %v3248_v21  ;;  %v3202_v23 = vadd.f32 %v3201_v20, %v3165_v26 }
0x10d7   : > { %v3231_v27 = vadd.f32 %v3230_v22, %v3202_v23 }
0x10d9   : > { %v3234_v32 = vadd.f32 %v3231_v27, %v4316_v44 }
0x10db   : > { %v3249_v24 = vadd.f32 %v3246_v13, %v3234_v32 }
0x10dd   : > { %3251 = vst [vmem:[%s435_s17 + $0x8] sm:$0xff] %v3249_v24 }
0x10de   : > { %3631 = shalt.err (!%p3628_p8)
}
0x10df   : > { %s3680_s26 = smov 128   ;;  %s3681_s17 = smov 8  }
0x10e0   : > { %3517 = dma.vmem_to_hbm [thread:$0]  (%p3785_p5), %s3266_s15, 256, %s3268_s1, %s3253_s25, %s3680_s26, %s3680_s26, %s3681_s17  }
0x10e1 PF: > { %p3529_p9 = scmp.ge.s32.totalorder %s3670_s24, 2  ;;  %s3282_s16 = sand.u32 1, %s3658_s21  }
0x10e2   : > { %s3283_s11 = scalar_lea.sflag [#allocation3], %s3282_s16 }
0x10e3   : > { %p3524_p10 = pnand %p3529_p9, %p3789_p6 }
0x10e5   : > { %p3525_p11 = pneg %p3524_p10 }
0x10e7   : > { %3653 = dma.done.wait (%p3525_p11), %s3283_s11, 256  }
0x10e8   : > { %3655 = vsyncadd (%p3525_p11), %s3283_s11, 4294967040  ;;  %p23_p12 = scmp.ge.s32.totalorder %s3772_s27, 4   ;;  %s4511_s21 = smov %s3662_s22 }
0x10e9   : > { %s4512_s22 = smov %s3666_s23  ;;  %s4513_s23 = smov %s3783_s30 }
0x10ea   : > { %s4514_s24 = smov %s3772_s27  ;;  %25 = sbr.rel (!%p23_p12) target bundleno = 8 (0x8), region = 137 }
0x10ef   :  { %3289 = vsyncpa [#allocation3], 1 }
0x10f0   :  { %3291 = vsyncpa [#allocation3 + $0x1], 1 }
0x10f1   :  { %3292 = vsyncpa [#allocation4], 1 }
0x10f2   :  { %3294 = vsyncpa [#allocation4 + $0x1], 1 }

</bundles_post_ra>
